<compile_context>
chip_gen: v5e
topology: v5e:2x2
jax: 0.10.0
libtpu: 0.0.40
codegen_flags: <defaults>
</compile_context>

<pallas_src>
import jax
import jax.numpy as jnp
from jax.experimental import pallas as pl
from jax.experimental.pallas import tpu as pltpu


# ----------------------------------------------------------------------------
# Kernel: entire recurrence (2 stacked LSTM cells x T steps) + final FC.
# ----------------------------------------------------------------------------
def lstm_kernel(xp_ref, whh0_ref, wih1_ref, whh1_ref, b1_ref, wfc_ref, bfc_ref,
                out_ref):
    # xp_ref   : (T*B, 4*HP) f32  layer-0 input projection (bias folded in),
    #                             gate order [i|f|o|g]
    # whh0_ref : (HP, 4*HP)  bf16 layer-0 recurrent weight (pre-transposed, padded)
    # wih1_ref : (HP, 4*HP)  bf16 layer-1 input weight
    # whh1_ref : (HP, 4*HP)  bf16 layer-1 recurrent weight
    # b1_ref   : (1, 4*HP)   f32  layer-1 bias (b_ih1 + b_hh1, padded)
    # wfc_ref  : (HP, O)     bf16 FC weight (pre-transposed, padded rows zero)
    # bfc_ref  : (1, O)      f32
    # out_ref  : (B, O)      f32
    TB, G = xp_ref.shape
    B = out_ref.shape[0]
    T = TB // B
    HP = G // 4
    bf16 = jnp.bfloat16

    whh0 = whh0_ref[...]
    wih1 = wih1_ref[...]
    whh1 = whh1_ref[...]
    # Hoist the bias broadcast out of the loop (traced once).
    b1 = jnp.broadcast_to(b1_ref[...], (B, G))

    def gates_to_state(gates, c):
        # Gate order [i | f | o | g]: one wide sigmoid slab + one tanh.
        # Every slice is a clean 128-lane-aligned vreg group (HP = 128*k).
        sig = jax.nn.sigmoid(gates[:, :3 * HP])
        i_g = sig[:, 0 * HP:1 * HP]
        f_g = sig[:, 1 * HP:2 * HP]
        o_g = sig[:, 2 * HP:3 * HP]
        g_g = jnp.tanh(gates[:, 3 * HP:4 * HP])
        c_new = f_g * c + i_g * g_g
        h_new = o_g * jnp.tanh(c_new)
        return h_new, c_new

    zeros = jnp.zeros((B, HP), jnp.float32)
    h0, c0, h1, c1 = zeros, zeros, zeros, zeros

    # T is small & static -> full unroll (static indices, cross-step scheduling).
    for t in range(T):
        # Layer 1's recurrent half depends only on h1(t-1): issue it first so
        # the MXU can overlap it with layer 0's work for this step.
        g1_rec = jnp.dot(h1.astype(bf16), whh1,
                         preferred_element_type=jnp.float32) + b1
        # Layer 0: only the recurrent matmul remains on the serial path
        # (input projection + bias were hoisted into xp_ref by the wrapper).
        g0 = xp_ref[t * B:(t + 1) * B, :] + jnp.dot(
            h0.astype(bf16), whh0, preferred_element_type=jnp.float32)
        h0, c0 = gates_to_state(g0, c0)
        # Layer 1: split dots (no concat copy, no false dependency on h0(t)).
        g1 = g1_rec + jnp.dot(h0.astype(bf16), wih1,
                              preferred_element_type=jnp.float32)
        h1, c1 = gates_to_state(g1, c1)

    # FC on the last timestep's top-layer hidden state (padded lanes are zero
    # and the corresponding wfc rows are zero, so the result is exact).
    out_ref[...] = (jnp.dot(h1.astype(bf16), wfc_ref[...],
                            preferred_element_type=jnp.float32)
                    + bfc_ref[...])


# ----------------------------------------------------------------------------
# Wrapper: weight re-layout (transpose + gate reorder/pad), layer-0 input hoist.
# ----------------------------------------------------------------------------
_GATE_PERM = (0, 1, 3, 2)  # PyTorch gate order [i,f,g,o] -> kernel [i,f,o,g]


def _pad_gate_cols(w_t, H, HP):
    """w_t: (K, 4H), gates [i|f|g|o] -> (K, 4*HP), reordered to [i|f|o|g] and
    zero-padded per gate.  Padding bias columns (as well as weight columns) to
    zero is what keeps the padded h/c lanes identically zero — do not change."""
    K = w_t.shape[0]
    w4 = w_t.reshape(K, 4, H)[:, _GATE_PERM, :]
    out = jnp.zeros((K, 4, HP), w_t.dtype).at[:, :, :H].set(w4)
    return out.reshape(K, 4 * HP)


def _pad_rows(w_t, H, HP):
    """w_t: (H, N) -> (HP, N), zero-padded rows (padded h lanes are zero anyway)."""
    N = w_t.shape[1]
    return jnp.zeros((HP, N), w_t.dtype).at[:H, :].set(w_t)


def lstm_model_forward(x, params):
    """x: (B, T, I) float32 -> (B, O) float32 (same semantics as LSTMModel.forward)."""
    B, T, I = x.shape
    H = params["whh0"].shape[1]
    O = params["wfc"].shape[0]
    HP = ((H + 127) // 128) * 128                       # lane-aligned hidden size

    f32, bf16 = jnp.float32, jnp.bfloat16
    # Layer 0 weights / bias (gate-reordered + padded, transposed).
    wih0_p = _pad_gate_cols(params["wih0"].T.astype(f32), H, HP)            # (I, 4HP)
    whh0_p = _pad_rows(_pad_gate_cols(params["whh0"].T.astype(f32), H, HP),
                       H, HP).astype(bf16)                                  # (HP, 4HP)
    b0_p = _pad_gate_cols((params["b_ih0"] + params["b_hh0"])
                          .reshape(1, 4 * H).astype(f32), H, HP)            # (1, 4HP)
    # Layer 1: two separate weight refs (split dots in the kernel, no concat).
    wih1_p = _pad_rows(_pad_gate_cols(params["wih1"].T.astype(f32), H, HP),
                       H, HP).astype(bf16)                                  # (HP, 4HP)
    whh1_p = _pad_rows(_pad_gate_cols(params["whh1"].T.astype(f32), H, HP),
                       H, HP).astype(bf16)                                  # (HP, 4HP)
    b1_p = _pad_gate_cols((params["b_ih1"] + params["b_hh1"])
                          .reshape(1, 4 * H).astype(f32), H, HP)            # (1, 4HP)
    # FC.
    wfc_p = _pad_rows(params["wfc"].T.astype(f32), H, HP).astype(bf16)      # (HP, O)
    bfc = params["b_fc"].reshape(1, O).astype(f32)

    # Hoist the non-recurrent layer-0 input projection (one big f32 matmul,
    # bias folded).  Stored flat as (T*B, 4HP) so the tiny B dim is not
    # sublane-padded in VMEM.
    x_tbi = jnp.transpose(x, (1, 0, 2)).astype(f32)                         # (T, B, I)
    x_proj = (jnp.einsum("tbi,ig->tbg", x_tbi, wih0_p) + b0_p)              # (T, B, 4HP)
    x_proj = x_proj.reshape(T * B, 4 * HP)

    inputs = (x_proj, whh0_p, wih1_p, whh1_p, b1_p, wfc_p, bfc)
    vmem = pl.BlockSpec(memory_space=pltpu.MemorySpace.VMEM)
    return pl.pallas_call(
        lstm_kernel,
        out_shape=jax.ShapeDtypeStruct((B, O), jnp.float32),
        in_specs=[vmem] * len(inputs),
        out_specs=vmem,
    )(*inputs)


# ----------------------------------------------------------------------------
# Init + pure-JAX reference (PyTorch semantics) for correctness checking.
# ----------------------------------------------------------------------------
def init_params(key, input_size=1, hidden_size=50, output_size=1):
    """Deterministic init mirroring PyTorch shapes: U(-1/sqrt(H), 1/sqrt(H))."""
    H = hidden_size
    k = 1.0 / (H ** 0.5)
    keys = jax.random.split(key, 11)
    u = lambda kk, shape: jax.random.uniform(kk, shape, jnp.float32, -k, k)
    return {
        "wih0": u(keys[0], (4 * H, input_size)),
        "whh0": u(keys[1], (4 * H, H)),
        "b_ih0": u(keys[2], (4 * H,)),
        "b_hh0": u(keys[3], (4 * H,)),
        "wih1": u(keys[4], (4 * H, H)),
        "whh1": u(keys[5], (4 * H, H)),
        "b_ih1": u(keys[6], (4 * H,)),
        "b_hh1": u(keys[7], (4 * H,)),
        "wfc": u(keys[8], (output_size, H)),
        "b_fc": u(keys[9], (output_size,)),
    }


def lstm_model_reference(x, params):
    """Pure-JAX f32 reference of the PyTorch forward."""
    B, T, I = x.shape
    H = params["whh0"].shape[1]

    def cell(x_in, h, c, wih, whh, b_ih, b_hh):
        g = x_in @ wih.T + b_ih + h @ whh.T + b_hh
        i_g = jax.nn.sigmoid(g[:, 0 * H:1 * H])
        f_g = jax.nn.sigmoid(g[:, 1 * H:2 * H])
        g_g = jnp.tanh(g[:, 2 * H:3 * H])
        o_g = jax.nn.sigmoid(g[:, 3 * H:4 * H])
        c_new = f_g * c + i_g * g_g
        return o_g * jnp.tanh(c_new), c_new

    h0 = c0 = h1 = c1 = jnp.zeros((B, H), jnp.float32)
    for t in range(T):
        x_t = x[:, t, :]
        h0, c0 = cell(x_t, h0, c0, params["wih0"], params["whh0"],
                      params["b_ih0"], params["b_hh0"])
        h1, c1 = cell(h0, h1, c1, params["wih1"], params["whh1"],
                      params["b_ih1"], params["b_hh1"])
    return h1 @ params["wfc"].T + params["b_fc"]


if __name__ == "__main__":
    key = jax.random.PRNGKey(0)
    k_x, k_p = jax.random.split(key)

    B, T, I, H, O = 2, 8, 1, 50, 1   # input_size=1, hidden_size=50, num_layers=2, output_size=1
    x = jax.random.normal(k_x, (B, T, I), jnp.float32)
    params = init_params(k_p, input_size=I, hidden_size=H, output_size=O)

    out = lstm_model_forward(x, params)
    out = jax.block_until_ready(out)

    ref = lstm_model_reference(x, params)
    assert out.shape == (B, O)
    # Tolerance deliberately loosened vs the pure-f32 version: the recurrent
    # matmuls now run on the MXU with bf16 operands (f32 accumulate), which
    # introduces ~1e-3-level error accumulated over 8 steps.
    assert jnp.allclose(out, ref, atol=2e-2, rtol=2e-2), (out, ref)

    print("KERNEL_OK")
</pallas_src>

<mosaic_0001>
module attributes {stable_mosaic.version = 11 : i64} {
  func.func @lstm_kernel(%arg0: memref<16x512xf32, #tpu.memory_space<vmem>>, %arg1: memref<128x512xbf16, #tpu.memory_space<vmem>>, %arg2: memref<128x512xbf16, #tpu.memory_space<vmem>>, %arg3: memref<128x512xbf16, #tpu.memory_space<vmem>>, %arg4: memref<1x512xf32, #tpu.memory_space<vmem>>, %arg5: memref<128x1xbf16, #tpu.memory_space<vmem>>, %arg6: memref<1x1xf32, #tpu.memory_space<vmem>>, %arg7: memref<2x1xf32, #tpu.memory_space<vmem>>) attributes {dimension_semantics = [], scalar_prefetch = 0 : i64, scratch_operands = 0 : i64, tpu.core_type = #tpu.core_type<tc>} {
    %c0 = arith.constant 0 : index
    %c0_0 = arith.constant 0 : index
    %0 = vector.load %arg1[%c0, %c0_0] : memref<128x512xbf16, #tpu.memory_space<vmem>>, vector<128x512xbf16>
    %c0_1 = arith.constant 0 : index
    %c0_2 = arith.constant 0 : index
    %1 = vector.load %arg2[%c0_1, %c0_2] : memref<128x512xbf16, #tpu.memory_space<vmem>>, vector<128x512xbf16>
    %c0_3 = arith.constant 0 : index
    %c0_4 = arith.constant 0 : index
    %2 = vector.load %arg3[%c0_3, %c0_4] : memref<128x512xbf16, #tpu.memory_space<vmem>>, vector<128x512xbf16>
    %c0_5 = arith.constant 0 : index
    %c0_6 = arith.constant 0 : index
    %3 = vector.load %arg4[%c0_5, %c0_6] : memref<1x512xf32, #tpu.memory_space<vmem>>, vector<1x512xf32>
    %4 = vector.shape_cast %3 : vector<1x512xf32> to vector<1x512xf32>
    %5 = vector.broadcast %4 : vector<1x512xf32> to vector<2x512xf32>
    %cst = arith.constant 0.000000e+00 : f32
    %6 = vector.broadcast %cst : f32 to vector<2x128xf32>
    %7 = arith.truncf %6 : vector<2x128xf32> to vector<2x128xbf16>
    %cst_7 = arith.constant dense<0.000000e+00> : vector<2x512xf32>
    %8 = tpu.matmul %7, %2, %cst_7 {dimension_numbers = #tpu.dot_dimension_numbers<[1], [0], [0], [1], [0, 0, 1, 1], [], []>} : vector<2x128xbf16>, vector<128x512xbf16>, vector<2x512xf32> -> vector<2x512xf32>
    %9 = arith.addf %8, %5 : vector<2x512xf32>
    %c0_8 = arith.constant 0 : index
    %c0_9 = arith.constant 0 : index
    %10 = vector.load %arg0[%c0_8, %c0_9] : memref<16x512xf32, #tpu.memory_space<vmem>>, vector<2x512xf32>
    %11 = arith.truncf %6 : vector<2x128xf32> to vector<2x128xbf16>
    %cst_10 = arith.constant dense<0.000000e+00> : vector<2x512xf32>
    %12 = tpu.matmul %11, %0, %cst_10 {dimension_numbers = #tpu.dot_dimension_numbers<[1], [0], [0], [1], [0, 0, 1, 1], [], []>} : vector<2x128xbf16>, vector<128x512xbf16>, vector<2x512xf32> -> vector<2x512xf32>
    %13 = arith.addf %10, %12 : vector<2x512xf32>
    %14 = vector.extract_strided_slice %13 {offsets = [0, 0], sizes = [2, 384], strides = [1, 1]} : vector<2x512xf32> to vector<2x384xf32>
    %15 = arith.negf %14 : vector<2x384xf32>
    %16 = math.exp %15 : vector<2x384xf32>
    %cst_11 = arith.constant 1.000000e+00 : f32
    %17 = vector.broadcast %cst_11 : f32 to vector<2x384xf32>
    %18 = arith.addf %17, %16 : vector<2x384xf32>
    %19 = arith.divf %17, %18 : vector<2x384xf32>
    %20 = vector.extract_strided_slice %19 {offsets = [0, 0], sizes = [2, 128], strides = [1, 1]} : vector<2x384xf32> to vector<2x128xf32>
    %21 = vector.extract_strided_slice %19 {offsets = [0, 128], sizes = [2, 128], strides = [1, 1]} : vector<2x384xf32> to vector<2x128xf32>
    %22 = vector.extract_strided_slice %19 {offsets = [0, 256], sizes = [2, 128], strides = [1, 1]} : vector<2x384xf32> to vector<2x128xf32>
    %23 = vector.extract_strided_slice %13 {offsets = [0, 384], sizes = [2, 128], strides = [1, 1]} : vector<2x512xf32> to vector<2x128xf32>
    %24 = math.tanh %23 : vector<2x128xf32>
    %25 = arith.mulf %21, %6 : vector<2x128xf32>
    %26 = arith.mulf %20, %24 : vector<2x128xf32>
    %27 = arith.addf %25, %26 : vector<2x128xf32>
    %28 = math.tanh %27 : vector<2x128xf32>
    %29 = arith.mulf %22, %28 : vector<2x128xf32>
    %30 = arith.truncf %29 : vector<2x128xf32> to vector<2x128xbf16>
    %cst_12 = arith.constant dense<0.000000e+00> : vector<2x512xf32>
    %31 = tpu.matmul %30, %1, %cst_12 {dimension_numbers = #tpu.dot_dimension_numbers<[1], [0], [0], [1], [0, 0, 1, 1], [], []>} : vector<2x128xbf16>, vector<128x512xbf16>, vector<2x512xf32> -> vector<2x512xf32>
    %32 = arith.addf %9, %31 : vector<2x512xf32>
    %33 = vector.extract_strided_slice %32 {offsets = [0, 0], sizes = [2, 384], strides = [1, 1]} : vector<2x512xf32> to vector<2x384xf32>
    %34 = arith.negf %33 : vector<2x384xf32>
    %35 = math.exp %34 : vector<2x384xf32>
    %cst_13 = arith.constant 1.000000e+00 : f32
    %36 = vector.broadcast %cst_13 : f32 to vector<2x384xf32>
    %37 = arith.addf %36, %35 : vector<2x384xf32>
    %38 = arith.divf %36, %37 : vector<2x384xf32>
    %39 = vector.extract_strided_slice %38 {offsets = [0, 0], sizes = [2, 128], strides = [1, 1]} : vector<2x384xf32> to vector<2x128xf32>
    %40 = vector.extract_strided_slice %38 {offsets = [0, 128], sizes = [2, 128], strides = [1, 1]} : vector<2x384xf32> to vector<2x128xf32>
    %41 = vector.extract_strided_slice %38 {offsets = [0, 256], sizes = [2, 128], strides = [1, 1]} : vector<2x384xf32> to vector<2x128xf32>
    %42 = vector.extract_strided_slice %32 {offsets = [0, 384], sizes = [2, 128], strides = [1, 1]} : vector<2x512xf32> to vector<2x128xf32>
    %43 = math.tanh %42 : vector<2x128xf32>
    %44 = arith.mulf %40, %6 : vector<2x128xf32>
    %45 = arith.mulf %39, %43 : vector<2x128xf32>
    %46 = arith.addf %44, %45 : vector<2x128xf32>
    %47 = math.tanh %46 : vector<2x128xf32>
    %48 = arith.mulf %41, %47 : vector<2x128xf32>
    %49 = arith.truncf %48 : vector<2x128xf32> to vector<2x128xbf16>
    %cst_14 = arith.constant dense<0.000000e+00> : vector<2x512xf32>
    %50 = tpu.matmul %49, %2, %cst_14 {dimension_numbers = #tpu.dot_dimension_numbers<[1], [0], [0], [1], [0, 0, 1, 1], [], []>} : vector<2x128xbf16>, vector<128x512xbf16>, vector<2x512xf32> -> vector<2x512xf32>
    %51 = arith.addf %50, %5 : vector<2x512xf32>
    %c2 = arith.constant 2 : index
    %c0_15 = arith.constant 0 : index
    %52 = vector.load %arg0[%c2, %c0_15] : memref<16x512xf32, #tpu.memory_space<vmem>>, vector<2x512xf32>
    %53 = arith.truncf %29 : vector<2x128xf32> to vector<2x128xbf16>
    %cst_16 = arith.constant dense<0.000000e+00> : vector<2x512xf32>
    %54 = tpu.matmul %53, %0, %cst_16 {dimension_numbers = #tpu.dot_dimension_numbers<[1], [0], [0], [1], [0, 0, 1, 1], [], []>} : vector<2x128xbf16>, vector<128x512xbf16>, vector<2x512xf32> -> vector<2x512xf32>
    %55 = arith.addf %52, %54 : vector<2x512xf32>
    %56 = vector.extract_strided_slice %55 {offsets = [0, 0], sizes = [2, 384], strides = [1, 1]} : vector<2x512xf32> to vector<2x384xf32>
    %57 = arith.negf %56 : vector<2x384xf32>
    %58 = math.exp %57 : vector<2x384xf32>
    %cst_17 = arith.constant 1.000000e+00 : f32
    %59 = vector.broadcast %cst_17 : f32 to vector<2x384xf32>
    %60 = arith.addf %59, %58 : vector<2x384xf32>
    %61 = arith.divf %59, %60 : vector<2x384xf32>
    %62 = vector.extract_strided_slice %61 {offsets = [0, 0], sizes = [2, 128], strides = [1, 1]} : vector<2x384xf32> to vector<2x128xf32>
    %63 = vector.extract_strided_slice %61 {offsets = [0, 128], sizes = [2, 128], strides = [1, 1]} : vector<2x384xf32> to vector<2x128xf32>
    %64 = vector.extract_strided_slice %61 {offsets = [0, 256], sizes = [2, 128], strides = [1, 1]} : vector<2x384xf32> to vector<2x128xf32>
    %65 = vector.extract_strided_slice %55 {offsets = [0, 384], sizes = [2, 128], strides = [1, 1]} : vector<2x512xf32> to vector<2x128xf32>
    %66 = math.tanh %65 : vector<2x128xf32>
    %67 = arith.mulf %63, %27 : vector<2x128xf32>
    %68 = arith.mulf %62, %66 : vector<2x128xf32>
    %69 = arith.addf %67, %68 : vector<2x128xf32>
    %70 = math.tanh %69 : vector<2x128xf32>
    %71 = arith.mulf %64, %70 : vector<2x128xf32>
    %72 = arith.truncf %71 : vector<2x128xf32> to vector<2x128xbf16>
    %cst_18 = arith.constant dense<0.000000e+00> : vector<2x512xf32>
    %73 = tpu.matmul %72, %1, %cst_18 {dimension_numbers = #tpu.dot_dimension_numbers<[1], [0], [0], [1], [0, 0, 1, 1], [], []>} : vector<2x128xbf16>, vector<128x512xbf16>, vector<2x512xf32> -> vector<2x512xf32>
    %74 = arith.addf %51, %73 : vector<2x512xf32>
    %75 = vector.extract_strided_slice %74 {offsets = [0, 0], sizes = [2, 384], strides = [1, 1]} : vector<2x512xf32> to vector<2x384xf32>
    %76 = arith.negf %75 : vector<2x384xf32>
    %77 = math.exp %76 : vector<2x384xf32>
    %cst_19 = arith.constant 1.000000e+00 : f32
    %78 = vector.broadcast %cst_19 : f32 to vector<2x384xf32>
    %79 = arith.addf %78, %77 : vector<2x384xf32>
    %80 = arith.divf %78, %79 : vector<2x384xf32>
    %81 = vector.extract_strided_slice %80 {offsets = [0, 0], sizes = [2, 128], strides = [1, 1]} : vector<2x384xf32> to vector<2x128xf32>
    %82 = vector.extract_strided_slice %80 {offsets = [0, 128], sizes = [2, 128], strides = [1, 1]} : vector<2x384xf32> to vector<2x128xf32>
    %83 = vector.extract_strided_slice %80 {offsets = [0, 256], sizes = [2, 128], strides = [1, 1]} : vector<2x384xf32> to vector<2x128xf32>
    %84 = vector.extract_strided_slice %74 {offsets = [0, 384], sizes = [2, 128], strides = [1, 1]} : vector<2x512xf32> to vector<2x128xf32>
    %85 = math.tanh %84 : vector<2x128xf32>
    %86 = arith.mulf %82, %46 : vector<2x128xf32>
    %87 = arith.mulf %81, %85 : vector<2x128xf32>
    %88 = arith.addf %86, %87 : vector<2x128xf32>
    %89 = math.tanh %88 : vector<2x128xf32>
    %90 = arith.mulf %83, %89 : vector<2x128xf32>
    %91 = arith.truncf %90 : vector<2x128xf32> to vector<2x128xbf16>
    %cst_20 = arith.constant dense<0.000000e+00> : vector<2x512xf32>
    %92 = tpu.matmul %91, %2, %cst_20 {dimension_numbers = #tpu.dot_dimension_numbers<[1], [0], [0], [1], [0, 0, 1, 1], [], []>} : vector<2x128xbf16>, vector<128x512xbf16>, vector<2x512xf32> -> vector<2x512xf32>
    %93 = arith.addf %92, %5 : vector<2x512xf32>
    %c4 = arith.constant 4 : index
    %c0_21 = arith.constant 0 : index
    %94 = vector.load %arg0[%c4, %c0_21] : memref<16x512xf32, #tpu.memory_space<vmem>>, vector<2x512xf32>
    %95 = arith.truncf %71 : vector<2x128xf32> to vector<2x128xbf16>
    %cst_22 = arith.constant dense<0.000000e+00> : vector<2x512xf32>
    %96 = tpu.matmul %95, %0, %cst_22 {dimension_numbers = #tpu.dot_dimension_numbers<[1], [0], [0], [1], [0, 0, 1, 1], [], []>} : vector<2x128xbf16>, vector<128x512xbf16>, vector<2x512xf32> -> vector<2x512xf32>
    %97 = arith.addf %94, %96 : vector<2x512xf32>
    %98 = vector.extract_strided_slice %97 {offsets = [0, 0], sizes = [2, 384], strides = [1, 1]} : vector<2x512xf32> to vector<2x384xf32>
    %99 = arith.negf %98 : vector<2x384xf32>
    %100 = math.exp %99 : vector<2x384xf32>
    %cst_23 = arith.constant 1.000000e+00 : f32
    %101 = vector.broadcast %cst_23 : f32 to vector<2x384xf32>
    %102 = arith.addf %101, %100 : vector<2x384xf32>
    %103 = arith.divf %101, %102 : vector<2x384xf32>
    %104 = vector.extract_strided_slice %103 {offsets = [0, 0], sizes = [2, 128], strides = [1, 1]} : vector<2x384xf32> to vector<2x128xf32>
    %105 = vector.extract_strided_slice %103 {offsets = [0, 128], sizes = [2, 128], strides = [1, 1]} : vector<2x384xf32> to vector<2x128xf32>
    %106 = vector.extract_strided_slice %103 {offsets = [0, 256], sizes = [2, 128], strides = [1, 1]} : vector<2x384xf32> to vector<2x128xf32>
    %107 = vector.extract_strided_slice %97 {offsets = [0, 384], sizes = [2, 128], strides = [1, 1]} : vector<2x512xf32> to vector<2x128xf32>
    %108 = math.tanh %107 : vector<2x128xf32>
    %109 = arith.mulf %105, %69 : vector<2x128xf32>
    %110 = arith.mulf %104, %108 : vector<2x128xf32>
    %111 = arith.addf %109, %110 : vector<2x128xf32>
    %112 = math.tanh %111 : vector<2x128xf32>
    %113 = arith.mulf %106, %112 : vector<2x128xf32>
    %114 = arith.truncf %113 : vector<2x128xf32> to vector<2x128xbf16>
    %cst_24 = arith.constant dense<0.000000e+00> : vector<2x512xf32>
    %115 = tpu.matmul %114, %1, %cst_24 {dimension_numbers = #tpu.dot_dimension_numbers<[1], [0], [0], [1], [0, 0, 1, 1], [], []>} : vector<2x128xbf16>, vector<128x512xbf16>, vector<2x512xf32> -> vector<2x512xf32>
    %116 = arith.addf %93, %115 : vector<2x512xf32>
    %117 = vector.extract_strided_slice %116 {offsets = [0, 0], sizes = [2, 384], strides = [1, 1]} : vector<2x512xf32> to vector<2x384xf32>
    %118 = arith.negf %117 : vector<2x384xf32>
    %119 = math.exp %118 : vector<2x384xf32>
    %cst_25 = arith.constant 1.000000e+00 : f32
    %120 = vector.broadcast %cst_25 : f32 to vector<2x384xf32>
    %121 = arith.addf %120, %119 : vector<2x384xf32>
    %122 = arith.divf %120, %121 : vector<2x384xf32>
    %123 = vector.extract_strided_slice %122 {offsets = [0, 0], sizes = [2, 128], strides = [1, 1]} : vector<2x384xf32> to vector<2x128xf32>
    %124 = vector.extract_strided_slice %122 {offsets = [0, 128], sizes = [2, 128], strides = [1, 1]} : vector<2x384xf32> to vector<2x128xf32>
    %125 = vector.extract_strided_slice %122 {offsets = [0, 256], sizes = [2, 128], strides = [1, 1]} : vector<2x384xf32> to vector<2x128xf32>
    %126 = vector.extract_strided_slice %116 {offsets = [0, 384], sizes = [2, 128], strides = [1, 1]} : vector<2x512xf32> to vector<2x128xf32>
    %127 = math.tanh %126 : vector<2x128xf32>
    %128 = arith.mulf %124, %88 : vector<2x128xf32>
    %129 = arith.mulf %123, %127 : vector<2x128xf32>
    %130 = arith.addf %128, %129 : vector<2x128xf32>
    %131 = math.tanh %130 : vector<2x128xf32>
    %132 = arith.mulf %125, %131 : vector<2x128xf32>
    %133 = arith.truncf %132 : vector<2x128xf32> to vector<2x128xbf16>
    %cst_26 = arith.constant dense<0.000000e+00> : vector<2x512xf32>
    %134 = tpu.matmul %133, %2, %cst_26 {dimension_numbers = #tpu.dot_dimension_numbers<[1], [0], [0], [1], [0, 0, 1, 1], [], []>} : vector<2x128xbf16>, vector<128x512xbf16>, vector<2x512xf32> -> vector<2x512xf32>
    %135 = arith.addf %134, %5 : vector<2x512xf32>
    %c6 = arith.constant 6 : index
    %c0_27 = arith.constant 0 : index
    %136 = vector.load %arg0[%c6, %c0_27] : memref<16x512xf32, #tpu.memory_space<vmem>>, vector<2x512xf32>
    %137 = arith.truncf %113 : vector<2x128xf32> to vector<2x128xbf16>
    %cst_28 = arith.constant dense<0.000000e+00> : vector<2x512xf32>
    %138 = tpu.matmul %137, %0, %cst_28 {dimension_numbers = #tpu.dot_dimension_numbers<[1], [0], [0], [1], [0, 0, 1, 1], [], []>} : vector<2x128xbf16>, vector<128x512xbf16>, vector<2x512xf32> -> vector<2x512xf32>
    %139 = arith.addf %136, %138 : vector<2x512xf32>
    %140 = vector.extract_strided_slice %139 {offsets = [0, 0], sizes = [2, 384], strides = [1, 1]} : vector<2x512xf32> to vector<2x384xf32>
    %141 = arith.negf %140 : vector<2x384xf32>
    %142 = math.exp %141 : vector<2x384xf32>
    %cst_29 = arith.constant 1.000000e+00 : f32
    %143 = vector.broadcast %cst_29 : f32 to vector<2x384xf32>
    %144 = arith.addf %143, %142 : vector<2x384xf32>
    %145 = arith.divf %143, %144 : vector<2x384xf32>
    %146 = vector.extract_strided_slice %145 {offsets = [0, 0], sizes = [2, 128], strides = [1, 1]} : vector<2x384xf32> to vector<2x128xf32>
    %147 = vector.extract_strided_slice %145 {offsets = [0, 128], sizes = [2, 128], strides = [1, 1]} : vector<2x384xf32> to vector<2x128xf32>
    %148 = vector.extract_strided_slice %145 {offsets = [0, 256], sizes = [2, 128], strides = [1, 1]} : vector<2x384xf32> to vector<2x128xf32>
    %149 = vector.extract_strided_slice %139 {offsets = [0, 384], sizes = [2, 128], strides = [1, 1]} : vector<2x512xf32> to vector<2x128xf32>
    %150 = math.tanh %149 : vector<2x128xf32>
    %151 = arith.mulf %147, %111 : vector<2x128xf32>
    %152 = arith.mulf %146, %150 : vector<2x128xf32>
    %153 = arith.addf %151, %152 : vector<2x128xf32>
    %154 = math.tanh %153 : vector<2x128xf32>
    %155 = arith.mulf %148, %154 : vector<2x128xf32>
    %156 = arith.truncf %155 : vector<2x128xf32> to vector<2x128xbf16>
    %cst_30 = arith.constant dense<0.000000e+00> : vector<2x512xf32>
    %157 = tpu.matmul %156, %1, %cst_30 {dimension_numbers = #tpu.dot_dimension_numbers<[1], [0], [0], [1], [0, 0, 1, 1], [], []>} : vector<2x128xbf16>, vector<128x512xbf16>, vector<2x512xf32> -> vector<2x512xf32>
    %158 = arith.addf %135, %157 : vector<2x512xf32>
    %159 = vector.extract_strided_slice %158 {offsets = [0, 0], sizes = [2, 384], strides = [1, 1]} : vector<2x512xf32> to vector<2x384xf32>
    %160 = arith.negf %159 : vector<2x384xf32>
    %161 = math.exp %160 : vector<2x384xf32>
    %cst_31 = arith.constant 1.000000e+00 : f32
    %162 = vector.broadcast %cst_31 : f32 to vector<2x384xf32>
    %163 = arith.addf %162, %161 : vector<2x384xf32>
    %164 = arith.divf %162, %163 : vector<2x384xf32>
    %165 = vector.extract_strided_slice %164 {offsets = [0, 0], sizes = [2, 128], strides = [1, 1]} : vector<2x384xf32> to vector<2x128xf32>
    %166 = vector.extract_strided_slice %164 {offsets = [0, 128], sizes = [2, 128], strides = [1, 1]} : vector<2x384xf32> to vector<2x128xf32>
    %167 = vector.extract_strided_slice %164 {offsets = [0, 256], sizes = [2, 128], strides = [1, 1]} : vector<2x384xf32> to vector<2x128xf32>
    %168 = vector.extract_strided_slice %158 {offsets = [0, 384], sizes = [2, 128], strides = [1, 1]} : vector<2x512xf32> to vector<2x128xf32>
    %169 = math.tanh %168 : vector<2x128xf32>
    %170 = arith.mulf %166, %130 : vector<2x128xf32>
    %171 = arith.mulf %165, %169 : vector<2x128xf32>
    %172 = arith.addf %170, %171 : vector<2x128xf32>
    %173 = math.tanh %172 : vector<2x128xf32>
    %174 = arith.mulf %167, %173 : vector<2x128xf32>
    %175 = arith.truncf %174 : vector<2x128xf32> to vector<2x128xbf16>
    %cst_32 = arith.constant dense<0.000000e+00> : vector<2x512xf32>
    %176 = tpu.matmul %175, %2, %cst_32 {dimension_numbers = #tpu.dot_dimension_numbers<[1], [0], [0], [1], [0, 0, 1, 1], [], []>} : vector<2x128xbf16>, vector<128x512xbf16>, vector<2x512xf32> -> vector<2x512xf32>
    %177 = arith.addf %176, %5 : vector<2x512xf32>
    %c8 = arith.constant 8 : index
    %c0_33 = arith.constant 0 : index
    %178 = vector.load %arg0[%c8, %c0_33] : memref<16x512xf32, #tpu.memory_space<vmem>>, vector<2x512xf32>
    %179 = arith.truncf %155 : vector<2x128xf32> to vector<2x128xbf16>
    %cst_34 = arith.constant dense<0.000000e+00> : vector<2x512xf32>
    %180 = tpu.matmul %179, %0, %cst_34 {dimension_numbers = #tpu.dot_dimension_numbers<[1], [0], [0], [1], [0, 0, 1, 1], [], []>} : vector<2x128xbf16>, vector<128x512xbf16>, vector<2x512xf32> -> vector<2x512xf32>
    %181 = arith.addf %178, %180 : vector<2x512xf32>
    %182 = vector.extract_strided_slice %181 {offsets = [0, 0], sizes = [2, 384], strides = [1, 1]} : vector<2x512xf32> to vector<2x384xf32>
    %183 = arith.negf %182 : vector<2x384xf32>
    %184 = math.exp %183 : vector<2x384xf32>
    %cst_35 = arith.constant 1.000000e+00 : f32
    %185 = vector.broadcast %cst_35 : f32 to vector<2x384xf32>
    %186 = arith.addf %185, %184 : vector<2x384xf32>
    %187 = arith.divf %185, %186 : vector<2x384xf32>
    %188 = vector.extract_strided_slice %187 {offsets = [0, 0], sizes = [2, 128], strides = [1, 1]} : vector<2x384xf32> to vector<2x128xf32>
    %189 = vector.extract_strided_slice %187 {offsets = [0, 128], sizes = [2, 128], strides = [1, 1]} : vector<2x384xf32> to vector<2x128xf32>
    %190 = vector.extract_strided_slice %187 {offsets = [0, 256], sizes = [2, 128], strides = [1, 1]} : vector<2x384xf32> to vector<2x128xf32>
    %191 = vector.extract_strided_slice %181 {offsets = [0, 384], sizes = [2, 128], strides = [1, 1]} : vector<2x512xf32> to vector<2x128xf32>
    %192 = math.tanh %191 : vector<2x128xf32>
    %193 = arith.mulf %189, %153 : vector<2x128xf32>
    %194 = arith.mulf %188, %192 : vector<2x128xf32>
    %195 = arith.addf %193, %194 : vector<2x128xf32>
    %196 = math.tanh %195 : vector<2x128xf32>
    %197 = arith.mulf %190, %196 : vector<2x128xf32>
    %198 = arith.truncf %197 : vector<2x128xf32> to vector<2x128xbf16>
    %cst_36 = arith.constant dense<0.000000e+00> : vector<2x512xf32>
    %199 = tpu.matmul %198, %1, %cst_36 {dimension_numbers = #tpu.dot_dimension_numbers<[1], [0], [0], [1], [0, 0, 1, 1], [], []>} : vector<2x128xbf16>, vector<128x512xbf16>, vector<2x512xf32> -> vector<2x512xf32>
    %200 = arith.addf %177, %199 : vector<2x512xf32>
    %201 = vector.extract_strided_slice %200 {offsets = [0, 0], sizes = [2, 384], strides = [1, 1]} : vector<2x512xf32> to vector<2x384xf32>
    %202 = arith.negf %201 : vector<2x384xf32>
    %203 = math.exp %202 : vector<2x384xf32>
    %cst_37 = arith.constant 1.000000e+00 : f32
    %204 = vector.broadcast %cst_37 : f32 to vector<2x384xf32>
    %205 = arith.addf %204, %203 : vector<2x384xf32>
    %206 = arith.divf %204, %205 : vector<2x384xf32>
    %207 = vector.extract_strided_slice %206 {offsets = [0, 0], sizes = [2, 128], strides = [1, 1]} : vector<2x384xf32> to vector<2x128xf32>
    %208 = vector.extract_strided_slice %206 {offsets = [0, 128], sizes = [2, 128], strides = [1, 1]} : vector<2x384xf32> to vector<2x128xf32>
    %209 = vector.extract_strided_slice %206 {offsets = [0, 256], sizes = [2, 128], strides = [1, 1]} : vector<2x384xf32> to vector<2x128xf32>
    %210 = vector.extract_strided_slice %200 {offsets = [0, 384], sizes = [2, 128], strides = [1, 1]} : vector<2x512xf32> to vector<2x128xf32>
    %211 = math.tanh %210 : vector<2x128xf32>
    %212 = arith.mulf %208, %172 : vector<2x128xf32>
    %213 = arith.mulf %207, %211 : vector<2x128xf32>
    %214 = arith.addf %212, %213 : vector<2x128xf32>
    %215 = math.tanh %214 : vector<2x128xf32>
    %216 = arith.mulf %209, %215 : vector<2x128xf32>
    %217 = arith.truncf %216 : vector<2x128xf32> to vector<2x128xbf16>
    %cst_38 = arith.constant dense<0.000000e+00> : vector<2x512xf32>
    %218 = tpu.matmul %217, %2, %cst_38 {dimension_numbers = #tpu.dot_dimension_numbers<[1], [0], [0], [1], [0, 0, 1, 1], [], []>} : vector<2x128xbf16>, vector<128x512xbf16>, vector<2x512xf32> -> vector<2x512xf32>
    %219 = arith.addf %218, %5 : vector<2x512xf32>
    %c10 = arith.constant 10 : index
    %c0_39 = arith.constant 0 : index
    %220 = vector.load %arg0[%c10, %c0_39] : memref<16x512xf32, #tpu.memory_space<vmem>>, vector<2x512xf32>
    %221 = arith.truncf %197 : vector<2x128xf32> to vector<2x128xbf16>
    %cst_40 = arith.constant dense<0.000000e+00> : vector<2x512xf32>
    %222 = tpu.matmul %221, %0, %cst_40 {dimension_numbers = #tpu.dot_dimension_numbers<[1], [0], [0], [1], [0, 0, 1, 1], [], []>} : vector<2x128xbf16>, vector<128x512xbf16>, vector<2x512xf32> -> vector<2x512xf32>
    %223 = arith.addf %220, %222 : vector<2x512xf32>
    %224 = vector.extract_strided_slice %223 {offsets = [0, 0], sizes = [2, 384], strides = [1, 1]} : vector<2x512xf32> to vector<2x384xf32>
    %225 = arith.negf %224 : vector<2x384xf32>
    %226 = math.exp %225 : vector<2x384xf32>
    %cst_41 = arith.constant 1.000000e+00 : f32
    %227 = vector.broadcast %cst_41 : f32 to vector<2x384xf32>
    %228 = arith.addf %227, %226 : vector<2x384xf32>
    %229 = arith.divf %227, %228 : vector<2x384xf32>
    %230 = vector.extract_strided_slice %229 {offsets = [0, 0], sizes = [2, 128], strides = [1, 1]} : vector<2x384xf32> to vector<2x128xf32>
    %231 = vector.extract_strided_slice %229 {offsets = [0, 128], sizes = [2, 128], strides = [1, 1]} : vector<2x384xf32> to vector<2x128xf32>
    %232 = vector.extract_strided_slice %229 {offsets = [0, 256], sizes = [2, 128], strides = [1, 1]} : vector<2x384xf32> to vector<2x128xf32>
    %233 = vector.extract_strided_slice %223 {offsets = [0, 384], sizes = [2, 128], strides = [1, 1]} : vector<2x512xf32> to vector<2x128xf32>
    %234 = math.tanh %233 : vector<2x128xf32>
    %235 = arith.mulf %231, %195 : vector<2x128xf32>
    %236 = arith.mulf %230, %234 : vector<2x128xf32>
    %237 = arith.addf %235, %236 : vector<2x128xf32>
    %238 = math.tanh %237 : vector<2x128xf32>
    %239 = arith.mulf %232, %238 : vector<2x128xf32>
    %240 = arith.truncf %239 : vector<2x128xf32> to vector<2x128xbf16>
    %cst_42 = arith.constant dense<0.000000e+00> : vector<2x512xf32>
    %241 = tpu.matmul %240, %1, %cst_42 {dimension_numbers = #tpu.dot_dimension_numbers<[1], [0], [0], [1], [0, 0, 1, 1], [], []>} : vector<2x128xbf16>, vector<128x512xbf16>, vector<2x512xf32> -> vector<2x512xf32>
    %242 = arith.addf %219, %241 : vector<2x512xf32>
    %243 = vector.extract_strided_slice %242 {offsets = [0, 0], sizes = [2, 384], strides = [1, 1]} : vector<2x512xf32> to vector<2x384xf32>
    %244 = arith.negf %243 : vector<2x384xf32>
    %245 = math.exp %244 : vector<2x384xf32>
    %cst_43 = arith.constant 1.000000e+00 : f32
    %246 = vector.broadcast %cst_43 : f32 to vector<2x384xf32>
    %247 = arith.addf %246, %245 : vector<2x384xf32>
    %248 = arith.divf %246, %247 : vector<2x384xf32>
    %249 = vector.extract_strided_slice %248 {offsets = [0, 0], sizes = [2, 128], strides = [1, 1]} : vector<2x384xf32> to vector<2x128xf32>
    %250 = vector.extract_strided_slice %248 {offsets = [0, 128], sizes = [2, 128], strides = [1, 1]} : vector<2x384xf32> to vector<2x128xf32>
    %251 = vector.extract_strided_slice %248 {offsets = [0, 256], sizes = [2, 128], strides = [1, 1]} : vector<2x384xf32> to vector<2x128xf32>
    %252 = vector.extract_strided_slice %242 {offsets = [0, 384], sizes = [2, 128], strides = [1, 1]} : vector<2x512xf32> to vector<2x128xf32>
    %253 = math.tanh %252 : vector<2x128xf32>
    %254 = arith.mulf %250, %214 : vector<2x128xf32>
    %255 = arith.mulf %249, %253 : vector<2x128xf32>
    %256 = arith.addf %254, %255 : vector<2x128xf32>
    %257 = math.tanh %256 : vector<2x128xf32>
    %258 = arith.mulf %251, %257 : vector<2x128xf32>
    %259 = arith.truncf %258 : vector<2x128xf32> to vector<2x128xbf16>
    %cst_44 = arith.constant dense<0.000000e+00> : vector<2x512xf32>
    %260 = tpu.matmul %259, %2, %cst_44 {dimension_numbers = #tpu.dot_dimension_numbers<[1], [0], [0], [1], [0, 0, 1, 1], [], []>} : vector<2x128xbf16>, vector<128x512xbf16>, vector<2x512xf32> -> vector<2x512xf32>
    %261 = arith.addf %260, %5 : vector<2x512xf32>
    %c12 = arith.constant 12 : index
    %c0_45 = arith.constant 0 : index
    %262 = vector.load %arg0[%c12, %c0_45] : memref<16x512xf32, #tpu.memory_space<vmem>>, vector<2x512xf32>
    %263 = arith.truncf %239 : vector<2x128xf32> to vector<2x128xbf16>
    %cst_46 = arith.constant dense<0.000000e+00> : vector<2x512xf32>
    %264 = tpu.matmul %263, %0, %cst_46 {dimension_numbers = #tpu.dot_dimension_numbers<[1], [0], [0], [1], [0, 0, 1, 1], [], []>} : vector<2x128xbf16>, vector<128x512xbf16>, vector<2x512xf32> -> vector<2x512xf32>
    %265 = arith.addf %262, %264 : vector<2x512xf32>
    %266 = vector.extract_strided_slice %265 {offsets = [0, 0], sizes = [2, 384], strides = [1, 1]} : vector<2x512xf32> to vector<2x384xf32>
    %267 = arith.negf %266 : vector<2x384xf32>
    %268 = math.exp %267 : vector<2x384xf32>
    %cst_47 = arith.constant 1.000000e+00 : f32
    %269 = vector.broadcast %cst_47 : f32 to vector<2x384xf32>
    %270 = arith.addf %269, %268 : vector<2x384xf32>
    %271 = arith.divf %269, %270 : vector<2x384xf32>
    %272 = vector.extract_strided_slice %271 {offsets = [0, 0], sizes = [2, 128], strides = [1, 1]} : vector<2x384xf32> to vector<2x128xf32>
    %273 = vector.extract_strided_slice %271 {offsets = [0, 128], sizes = [2, 128], strides = [1, 1]} : vector<2x384xf32> to vector<2x128xf32>
    %274 = vector.extract_strided_slice %271 {offsets = [0, 256], sizes = [2, 128], strides = [1, 1]} : vector<2x384xf32> to vector<2x128xf32>
    %275 = vector.extract_strided_slice %265 {offsets = [0, 384], sizes = [2, 128], strides = [1, 1]} : vector<2x512xf32> to vector<2x128xf32>
    %276 = math.tanh %275 : vector<2x128xf32>
    %277 = arith.mulf %273, %237 : vector<2x128xf32>
    %278 = arith.mulf %272, %276 : vector<2x128xf32>
    %279 = arith.addf %277, %278 : vector<2x128xf32>
    %280 = math.tanh %279 : vector<2x128xf32>
    %281 = arith.mulf %274, %280 : vector<2x128xf32>
    %282 = arith.truncf %281 : vector<2x128xf32> to vector<2x128xbf16>
    %cst_48 = arith.constant dense<0.000000e+00> : vector<2x512xf32>
    %283 = tpu.matmul %282, %1, %cst_48 {dimension_numbers = #tpu.dot_dimension_numbers<[1], [0], [0], [1], [0, 0, 1, 1], [], []>} : vector<2x128xbf16>, vector<128x512xbf16>, vector<2x512xf32> -> vector<2x512xf32>
    %284 = arith.addf %261, %283 : vector<2x512xf32>
    %285 = vector.extract_strided_slice %284 {offsets = [0, 0], sizes = [2, 384], strides = [1, 1]} : vector<2x512xf32> to vector<2x384xf32>
    %286 = arith.negf %285 : vector<2x384xf32>
    %287 = math.exp %286 : vector<2x384xf32>
    %cst_49 = arith.constant 1.000000e+00 : f32
    %288 = vector.broadcast %cst_49 : f32 to vector<2x384xf32>
    %289 = arith.addf %288, %287 : vector<2x384xf32>
    %290 = arith.divf %288, %289 : vector<2x384xf32>
    %291 = vector.extract_strided_slice %290 {offsets = [0, 0], sizes = [2, 128], strides = [1, 1]} : vector<2x384xf32> to vector<2x128xf32>
    %292 = vector.extract_strided_slice %290 {offsets = [0, 128], sizes = [2, 128], strides = [1, 1]} : vector<2x384xf32> to vector<2x128xf32>
    %293 = vector.extract_strided_slice %290 {offsets = [0, 256], sizes = [2, 128], strides = [1, 1]} : vector<2x384xf32> to vector<2x128xf32>
    %294 = vector.extract_strided_slice %284 {offsets = [0, 384], sizes = [2, 128], strides = [1, 1]} : vector<2x512xf32> to vector<2x128xf32>
    %295 = math.tanh %294 : vector<2x128xf32>
    %296 = arith.mulf %292, %256 : vector<2x128xf32>
    %297 = arith.mulf %291, %295 : vector<2x128xf32>
    %298 = arith.addf %296, %297 : vector<2x128xf32>
    %299 = math.tanh %298 : vector<2x128xf32>
    %300 = arith.mulf %293, %299 : vector<2x128xf32>
    %301 = arith.truncf %300 : vector<2x128xf32> to vector<2x128xbf16>
    %cst_50 = arith.constant dense<0.000000e+00> : vector<2x512xf32>
    %302 = tpu.matmul %301, %2, %cst_50 {dimension_numbers = #tpu.dot_dimension_numbers<[1], [0], [0], [1], [0, 0, 1, 1], [], []>} : vector<2x128xbf16>, vector<128x512xbf16>, vector<2x512xf32> -> vector<2x512xf32>
    %303 = arith.addf %302, %5 : vector<2x512xf32>
    %c14 = arith.constant 14 : index
    %c0_51 = arith.constant 0 : index
    %304 = vector.load %arg0[%c14, %c0_51] : memref<16x512xf32, #tpu.memory_space<vmem>>, vector<2x512xf32>
    %305 = arith.truncf %281 : vector<2x128xf32> to vector<2x128xbf16>
    %cst_52 = arith.constant dense<0.000000e+00> : vector<2x512xf32>
    %306 = tpu.matmul %305, %0, %cst_52 {dimension_numbers = #tpu.dot_dimension_numbers<[1], [0], [0], [1], [0, 0, 1, 1], [], []>} : vector<2x128xbf16>, vector<128x512xbf16>, vector<2x512xf32> -> vector<2x512xf32>
    %307 = arith.addf %304, %306 : vector<2x512xf32>
    %308 = vector.extract_strided_slice %307 {offsets = [0, 0], sizes = [2, 384], strides = [1, 1]} : vector<2x512xf32> to vector<2x384xf32>
    %309 = arith.negf %308 : vector<2x384xf32>
    %310 = math.exp %309 : vector<2x384xf32>
    %cst_53 = arith.constant 1.000000e+00 : f32
    %311 = vector.broadcast %cst_53 : f32 to vector<2x384xf32>
    %312 = arith.addf %311, %310 : vector<2x384xf32>
    %313 = arith.divf %311, %312 : vector<2x384xf32>
    %314 = vector.extract_strided_slice %313 {offsets = [0, 0], sizes = [2, 128], strides = [1, 1]} : vector<2x384xf32> to vector<2x128xf32>
    %315 = vector.extract_strided_slice %313 {offsets = [0, 128], sizes = [2, 128], strides = [1, 1]} : vector<2x384xf32> to vector<2x128xf32>
    %316 = vector.extract_strided_slice %313 {offsets = [0, 256], sizes = [2, 128], strides = [1, 1]} : vector<2x384xf32> to vector<2x128xf32>
    %317 = vector.extract_strided_slice %307 {offsets = [0, 384], sizes = [2, 128], strides = [1, 1]} : vector<2x512xf32> to vector<2x128xf32>
    %318 = math.tanh %317 : vector<2x128xf32>
    %319 = arith.mulf %315, %279 : vector<2x128xf32>
    %320 = arith.mulf %314, %318 : vector<2x128xf32>
    %321 = arith.addf %319, %320 : vector<2x128xf32>
    %322 = math.tanh %321 : vector<2x128xf32>
    %323 = arith.mulf %316, %322 : vector<2x128xf32>
    %324 = arith.truncf %323 : vector<2x128xf32> to vector<2x128xbf16>
    %cst_54 = arith.constant dense<0.000000e+00> : vector<2x512xf32>
    %325 = tpu.matmul %324, %1, %cst_54 {dimension_numbers = #tpu.dot_dimension_numbers<[1], [0], [0], [1], [0, 0, 1, 1], [], []>} : vector<2x128xbf16>, vector<128x512xbf16>, vector<2x512xf32> -> vector<2x512xf32>
    %326 = arith.addf %303, %325 : vector<2x512xf32>
    %327 = vector.extract_strided_slice %326 {offsets = [0, 0], sizes = [2, 384], strides = [1, 1]} : vector<2x512xf32> to vector<2x384xf32>
    %328 = arith.negf %327 : vector<2x384xf32>
    %329 = math.exp %328 : vector<2x384xf32>
    %cst_55 = arith.constant 1.000000e+00 : f32
    %330 = vector.broadcast %cst_55 : f32 to vector<2x384xf32>
    %331 = arith.addf %330, %329 : vector<2x384xf32>
    %332 = arith.divf %330, %331 : vector<2x384xf32>
    %333 = vector.extract_strided_slice %332 {offsets = [0, 0], sizes = [2, 128], strides = [1, 1]} : vector<2x384xf32> to vector<2x128xf32>
    %334 = vector.extract_strided_slice %332 {offsets = [0, 128], sizes = [2, 128], strides = [1, 1]} : vector<2x384xf32> to vector<2x128xf32>
    %335 = vector.extract_strided_slice %332 {offsets = [0, 256], sizes = [2, 128], strides = [1, 1]} : vector<2x384xf32> to vector<2x128xf32>
    %336 = vector.extract_strided_slice %326 {offsets = [0, 384], sizes = [2, 128], strides = [1, 1]} : vector<2x512xf32> to vector<2x128xf32>
    %337 = math.tanh %336 : vector<2x128xf32>
    %338 = arith.mulf %334, %298 : vector<2x128xf32>
    %339 = arith.mulf %333, %337 : vector<2x128xf32>
    %340 = arith.addf %338, %339 : vector<2x128xf32>
    %341 = math.tanh %340 : vector<2x128xf32>
    %342 = arith.mulf %335, %341 : vector<2x128xf32>
    %343 = arith.truncf %342 : vector<2x128xf32> to vector<2x128xbf16>
    %c0_56 = arith.constant 0 : index
    %c0_57 = arith.constant 0 : index
    %344 = vector.load %arg5[%c0_56, %c0_57] : memref<128x1xbf16, #tpu.memory_space<vmem>>, vector<128x1xbf16>
    %cst_58 = arith.constant dense<0.000000e+00> : vector<2x1xf32>
    %345 = tpu.matmul %343, %344, %cst_58 {dimension_numbers = #tpu.dot_dimension_numbers<[1], [0], [0], [1], [0, 0, 1, 1], [], []>} : vector<2x128xbf16>, vector<128x1xbf16>, vector<2x1xf32> -> vector<2x1xf32>
    %c0_59 = arith.constant 0 : index
    %c0_60 = arith.constant 0 : index
    %346 = vector.load %arg6[%c0_59, %c0_60] : memref<1x1xf32, #tpu.memory_space<vmem>>, vector<1x1xf32>
    %347 = vector.broadcast %346 : vector<1x1xf32> to vector<2x1xf32>
    %348 = arith.addf %345, %347 : vector<2x1xf32>
    %c0_61 = arith.constant 0 : index
    %c0_62 = arith.constant 0 : index
    %349 = vector.load %arg7[%c0_61, %c0_62] : memref<2x1xf32, #tpu.memory_space<vmem>>, vector<2x1xf32>
    tpu.vector_store %arg7[%c0_61, %c0_62], %348 {strides = array<i32>} : memref<2x1xf32, #tpu.memory_space<vmem>>, vector<2x1xf32>,
    return
  }
}

</mosaic_0001>

<bundles_post_ra>
// kernel: tpu_custom_call.1
= control target key start
LH: loop header
LB: loop body
LE: loop exit
PB: predicated region body
PF: predicated region fallthrough
CT: control target
= control target key end

     0   :  { %s5573_s0 = inlined_call_operand.vmem [shape: f32[16,512], index: 0, kind: input, shape index: {}]   ;;  %s5574_s1 = inlined_call_operand.hbm [shape: bf16[128,512], index: 1, kind: input, shape index: {}]   ;;  %s5575_s2 = inlined_call_operand.hbm [shape: bf16[128,512], index: 2, kind: input, shape index: {}]   ;;  %s5576_s3 = inlined_call_operand.hbm [shape: bf16[128,512], index: 3, kind: input, shape index: {}]   ;;  %s5577_s4 = inlined_call_operand.vmem [shape: f32[1,512], index: 4, kind: input, shape index: {}]   ;;  %s5578_s5 = inlined_call_operand.vmem [shape: bf16[128,1], index: 5, kind: input, shape index: {}]   ;;  %s5579_s6 = inlined_call_operand.<no memory space> [shape: f32[1,1], index: 6, kind: input, shape index: {}]   ;;  %s5580_s7 = inlined_call_operand.vmem [shape: f32[2,1], index: 7, kind: output, shape index: {}]  }
   0x1   :  { %v12_v0 = vstv %s5579_s6 }
   0x2   :  { %13 = vst [vmem:[#allocation2] sm:$0x1] %v12_v0 }
   0x3   :  { %14 = vsyncpa [#allocation4], 0 }
   0x4   :  { %15 = vsyncpa [#allocation6], 0  ;;  %s35_s28 = sshll.u32 %s5575_s2, 4  ;;  %s4137_s29 = smov [#allocation5]   ;;  %s36_s28 = int_to_ptr.hbm [resolvable:$true] %s35_s28 }
   0x5   :  { %s37_s30 = sshll.u32 %s4137_s29, 4  ;;  %s22_s10 = sshll.u32 %s5574_s1, 4  ;;  %s38_s30 = int_to_ptr.vmem [resolvable:$true] %s37_s30  ;;  %s23_s10 = int_to_ptr.hbm [resolvable:$true] %s22_s10 }
   0x6   :  { %s4138_s11 = smov 256   ;;  %s4139_s12 = smov 16  }
   0x7   :  { %43 = dma.hbm_to_vmem [thread:$0]  %s36_s28, 4096, %s38_s30, [#allocation6], %s4138_s11, %s4138_s11, %s4139_s12  }
   0x8   :  { %s4140_s6 = smov [#allocation3]   ;;  %s48_s16 = sshll.u32 %s5576_s3, 4  ;;  %s49_s16 = int_to_ptr.hbm [resolvable:$true] %s48_s16 }
   0x9   :  { %s24_s13 = sshll.u32 %s4140_s6, 4  ;;  %s4141_s2 = smov [#allocation7]   ;;  %s25_s13 = int_to_ptr.vmem [resolvable:$true] %s24_s13 }
   0xa   :  { %30 = dma.hbm_to_vmem [thread:$0]  %s23_s10, 4096, %s25_s13, [#allocation4], %s4138_s11, %s4138_s11, %s4139_s12  }
   0xb   :  { %s50_s17 = sshll.u32 %s4141_s2, 4  ;;  %s51_s17 = int_to_ptr.vmem [resolvable:$true] %s50_s17 }
   0xc   :  { %56 = dma.hbm_to_vmem [thread:$0]  %s49_s16, 4096, %s51_s17, [#allocation6], %s4138_s11, %s4138_s11, %s4139_s12  }
   0xd   :  { %4133 = dma.done.wait [#allocation4], 4096  }
   0xe   :  { %4134 = vsyncadd [#allocation4], 4294963200 }
   0xf   :  { %4135 = dma.done.wait [#allocation6], 8192  }
  0x10   :  { %4136 = vsyncadd [#allocation6], 4294959104  ;;  %v3344_v1 = vld [vmem:[#allocation7 + $0xe0] sm:$0xf]  ;;  %v3788_v2 = vld [vmem:[#allocation7 + $0xec] sm:$0xf0] }
  0x11   :  { %v3786_v3 = vld [vmem:[#allocation7 + $0xe4] sm:$0xf]  ;;  %v4195_v4 = vor.u32 %v3788_v2, %v3344_v1  ;;  %v3346_v5 = vld [vmem:[#allocation7 + $0xf0] sm:$0xf0]  ;;  %v3352_v6 = vld [vmem:[#allocation7 + $0xe8] sm:$0xf] }
  0x12   :  { %v3789_v7 = vld [vmem:[#allocation7 + $0xf4] sm:$0xf0]  ;;  %v4197_v8 = vor.u32 %v3786_v3, %v3346_v5  ;;  %v3328_v10 = vld [vmem:[#allocation7 + $0xc0] sm:$0xf]  ;;  %v3784_v11 = vld [vmem:[#allocation7 + $0xcc] sm:$0xf0] }
  0x13   :  { %5789 = vst [vmem:[#allocation10_spill] sm:$0xff] %v4195_v4  ;;  %v4199_v9 = vor.u32 %v3789_v7, %v3352_v6  ;;  %v3782_v12 = vld [vmem:[#allocation7 + $0xc4] sm:$0xf]  ;;  %342 = vmatpush.bf16.msra.mxu0 %v4195_v4  ;;  %v4202_v13 = vor.u32 %v3784_v11, %v3328_v10  ;;  %v3330_v14 = vld [vmem:[#allocation7 + $0xd0] sm:$0xf0] }
  0x14   :  { %5790 = vst [vmem:[#allocation11_spill] sm:$0xff] %v4197_v8  ;;  %v3336_v15 = vld [vmem:[#allocation7 + $0xc8] sm:$0xf]  ;;  %v3785_v16 = vld [vmem:[#allocation7 + $0xd4] sm:$0xf0]  ;;  %355 = vmatpush.bf16.msra.mxu1 %v4197_v8  ;;  %v4206_v17 = vor.u32 %v3782_v12, %v3330_v14 }
  0x15   :  { %5791 = vst [vmem:[#allocation12_spill] sm:$0xff] %v4199_v9  ;;  %368 = vmatpush.bf16.msra.mxu2 %v4199_v9  ;;  %v4208_v18 = vor.u32 %v3785_v16, %v3336_v15  ;;  %v3787_v19 = vld [vmem:[#allocation7 + $0xec] sm:$0xf]  ;;  %v3354_v20 = vld [vmem:[#allocation7 + $0xf8] sm:$0xf0] }
  0x16   :  { %5792 = vst [vmem:[#allocation13_spill] sm:$0xff] %v4202_v13  ;;  %v3312_v21 = vld [vmem:[#allocation7 + $0xa0] sm:$0xf]  ;;  %v4210_v22 = vor.u32 %v3787_v19, %v3354_v20  ;;  %v3780_v23 = vld [vmem:[#allocation7 + $0xac] sm:$0xf0] }
  0x17   :  { %5793 = vst [vmem:[#allocation14_spill] sm:$0xff] %v4206_v17  ;;  %v3778_v24 = vld [vmem:[#allocation7 + $0xa4] sm:$0xf]  ;;  %v3314_v25 = vld [vmem:[#allocation7 + $0xb0] sm:$0xf0]  ;;  %343 = vmatpush.bf16.msra.mxu0 %v4202_v13  ;;  %v4214_v29 = vor.u32 %v3780_v23, %v3312_v21 }
  0x18   :  { %5794 = vst [vmem:[#allocation15_spill] sm:$0xff] %v4208_v18  ;;  %v3320_v26 = vld [vmem:[#allocation7 + $0xa8] sm:$0xf]  ;;  %v3781_v27 = vld [vmem:[#allocation7 + $0xb4] sm:$0xf0]  ;;  %381 = vmatpush.bf16.msra.mxu3 %v4210_v22  ;;  %356 = vmatpush.bf16.msra.mxu1 %v4206_v17  ;;  %v4218_v33 = vor.u32 %v3778_v24, %v3314_v25 }
  0x19   :  { %5795 = vst [vmem:[#allocation16_spill] sm:$0xff] %v4210_v22  ;;  %v3783_v28 = vld [vmem:[#allocation7 + $0xcc] sm:$0xf]  ;;  %v3338_v30 = vld [vmem:[#allocation7 + $0xd8] sm:$0xf0]  ;;  %369 = vmatpush.bf16.msra.mxu2 %v4208_v18  ;;  %v4220_v34 = vor.u32 %v3781_v27, %v3320_v26 }
  0x1a   :  { %5796 = vst [vmem:[#allocation17_spill] sm:$0xff] %v4214_v29  ;;  %v3296_v31 = vld [vmem:[#allocation7 + $0x80] sm:$0xf]  ;;  %v3776_v32 = vld [vmem:[#allocation7 + $0x8c] sm:$0xf0]  ;;  %v4222_v35 = vor.u32 %v3783_v28, %v3338_v30 }
  0x1b   :  { %5797 = vst [vmem:[#allocation18_spill] sm:$0xff] %v4218_v33  ;;  %v3774_v36 = vld [vmem:[#allocation7 + $0x84] sm:$0xf]  ;;  %v3298_v37 = vld [vmem:[#allocation7 + $0x90] sm:$0xf0]  ;;  %344 = vmatpush.bf16.msra.mxu0 %v4214_v29  ;;  %v4226_v42 = vor.u32 %v3776_v32, %v3296_v31 }
  0x1c   :  { %5798 = vst [vmem:[#allocation19_spill] sm:$0xff] %v4220_v34  ;;  %v3304_v38 = vld [vmem:[#allocation7 + $0x88] sm:$0xf]  ;;  %v3777_v39 = vld [vmem:[#allocation7 + $0x94] sm:$0xf0]  ;;  %382 = vmatpush.bf16.msra.mxu3 %v4222_v35  ;;  %357 = vmatpush.bf16.msra.mxu1 %v4218_v33  ;;  %v4232_v46 = vor.u32 %v3774_v36, %v3298_v37 }
  0x1d   :  { %5799 = vst [vmem:[#allocation20_spill] sm:$0xff] %v4222_v35  ;;  %v3779_v40 = vld [vmem:[#allocation7 + $0xac] sm:$0xf]  ;;  %v3322_v41 = vld [vmem:[#allocation7 + $0xb8] sm:$0xf0]  ;;  %370 = vmatpush.bf16.msra.mxu2 %v4220_v34  ;;  %v4234_v47 = vor.u32 %v3777_v39, %v3304_v38 }
  0x1e   :  { %5800 = vst [vmem:[#allocation21_spill] sm:$0xff] %v4226_v42  ;;  %v4228_v43 = vor.u32 %v3779_v40, %v3322_v41  ;;  %v3280_v44 = vld [vmem:[#allocation7 + $0x60] sm:$0xf]  ;;  %v3772_v45 = vld [vmem:[#allocation7 + $0x6c] sm:$0xf0] }
  0x1f   :  { %5802 = vst [vmem:[#allocation23_spill] sm:$0xff] %v4232_v46  ;;  %v3770_v48 = vld [vmem:[#allocation7 + $0x64] sm:$0xf]  ;;  %v3775_v49 = vld [vmem:[#allocation7 + $0x8c] sm:$0xf]  ;;  %345 = vmatpush.bf16.msra.mxu0 %v4226_v42  ;;  %v4238_v54 = vor.u32 %v3772_v45, %v3280_v44 }
  0x20   :  { %5801 = vst [vmem:[#allocation22_spill] sm:$0xff] %v4228_v43  ;;  %v3306_v50 = vld [vmem:[#allocation7 + $0x98] sm:$0xf0]  ;;  %v3282_v51 = vld [vmem:[#allocation7 + $0x70] sm:$0xf0]  ;;  %383 = vmatpush.bf16.msra.mxu3 %v4228_v43  ;;  %358 = vmatpush.bf16.msra.mxu1 %v4232_v46 }
  0x21   :  { %5803 = vst [vmem:[#allocation24_spill] sm:$0xff] %v4234_v47  ;;  %v3288_v52 = vld [vmem:[#allocation7 + $0x68] sm:$0xf]  ;;  %v3773_v53 = vld [vmem:[#allocation7 + $0x74] sm:$0xf0]  ;;  %v4240_v55 = vor.u32 %v3775_v49, %v3306_v50  ;;  %371 = vmatpush.bf16.msra.mxu2 %v4234_v47  ;;  %v4244_v58 = vor.u32 %v3770_v48, %v3282_v51 }
  0x22   :  { %5804 = vst [vmem:[#allocation25_spill] sm:$0xff] %v4238_v54  ;;  %v3264_v56 = vld [vmem:[#allocation7 + $0x40] sm:$0xf]  ;;  %v3768_v57 = vld [vmem:[#allocation7 + $0x4c] sm:$0xf0]  ;;  %v4246_v59 = vor.u32 %v3773_v53, %v3288_v52 }
  0x23   :  { %5805 = vst [vmem:[#allocation26_spill] sm:$0xff] %v4240_v55  ;;  %v3766_v60 = vld [vmem:[#allocation7 + $0x44] sm:$0xf]  ;;  %v3771_v61 = vld [vmem:[#allocation7 + $0x6c] sm:$0xf]  ;;  %346 = vmatpush.bf16.msra.mxu0 %v4238_v54  ;;  %v4250_v2 = vor.u32 %v3768_v57, %v3264_v56 }
  0x24   :  { %5806 = vst [vmem:[#allocation27_spill] sm:$0xff] %v4244_v58  ;;  %v3290_v62 = vld [vmem:[#allocation7 + $0x78] sm:$0xf0]  ;;  %v3266_v63 = vld [vmem:[#allocation7 + $0x50] sm:$0xf0]  ;;  %384 = vmatpush.bf16.msra.mxu3 %v4240_v55  ;;  %359 = vmatpush.bf16.msra.mxu1 %v4244_v58 }
  0x25   :  { %5807 = vst [vmem:[#allocation28_spill] sm:$0xff] %v4246_v59  ;;  %v3272_v0 = vld [vmem:[#allocation7 + $0x48] sm:$0xf]  ;;  %v3769_v1 = vld [vmem:[#allocation7 + $0x54] sm:$0xf0]  ;;  %v4252_v3 = vor.u32 %v3771_v61, %v3290_v62  ;;  %372 = vmatpush.bf16.msra.mxu2 %v4246_v59  ;;  %v4256_v7 = vor.u32 %v3766_v60, %v3266_v63 }
  0x26   :  { %5808 = vst [vmem:[#allocation29_spill] sm:$0xff] %v4250_v2  ;;  %v3248_v5 = vld [vmem:[#allocation7 + $0x20] sm:$0xf]  ;;  %v3764_v6 = vld [vmem:[#allocation7 + $0x2c] sm:$0xf0]  ;;  %v4258_v10 = vor.u32 %v3769_v1, %v3272_v0 }
  0x27   :  { %5809 = vst [vmem:[#allocation30_spill] sm:$0xff] %v4252_v3  ;;  %v3762_v11 = vld [vmem:[#allocation7 + $0x24] sm:$0xf]  ;;  %v3767_v12 = vld [vmem:[#allocation7 + $0x4c] sm:$0xf]  ;;  %347 = vmatpush.bf16.msra.mxu0 %v4250_v2  ;;  %v4262_v20 = vor.u32 %v3764_v6, %v3248_v5 }
  0x28   :  { %5810 = vst [vmem:[#allocation31_spill] sm:$0xff] %v4256_v7  ;;  %v3274_v14 = vld [vmem:[#allocation7 + $0x58] sm:$0xf0]  ;;  %v3250_v15 = vld [vmem:[#allocation7 + $0x30] sm:$0xf0]  ;;  %385 = vmatpush.bf16.msra.mxu3 %v4252_v3  ;;  %360 = vmatpush.bf16.msra.mxu1 %v4256_v7 }
  0x29   :  { %5811 = vst [vmem:[#allocation32_spill] sm:$0xff] %v4258_v10  ;;  %v3256_v16 = vld [vmem:[#allocation7 + $0x28] sm:$0xf]  ;;  %v3765_v19 = vld [vmem:[#allocation7 + $0x34] sm:$0xf0]  ;;  %v4264_v21 = vor.u32 %v3767_v12, %v3274_v14  ;;  %373 = vmatpush.bf16.msra.mxu2 %v4258_v10  ;;  %v4268_v26 = vor.u32 %v3762_v11, %v3250_v15 }
  0x2a   :  { %5812 = vst [vmem:[#allocation33_spill] sm:$0xff] %v4262_v20  ;;  %v3232_v23 = vld [vmem:[#allocation7] sm:$0xf]  ;;  %v3760_v24 = vld [vmem:[#allocation7 + $0xc] sm:$0xf0]  ;;  %v4270_v27 = vor.u32 %v3765_v19, %v3256_v16 }
  0x2b   :  { %5813 = vst [vmem:[#allocation34_spill] sm:$0xff] %v4264_v21  ;;  %v3758_v25 = vld [vmem:[#allocation7 + $0x4] sm:$0xf]  ;;  %v3234_v28 = vld [vmem:[#allocation7 + $0x10] sm:$0xf0]  ;;  %348 = vmatpush.bf16.msra.mxu0 %v4262_v20  ;;  %v4274_v41 = vor.u32 %v3760_v24, %v3232_v23 }
  0x2c   :  { %5814 = vst [vmem:[#allocation35_spill] sm:$0xff] %v4268_v26  ;;  %v3763_v30 = vld [vmem:[#allocation7 + $0x2c] sm:$0xf]  ;;  %v3258_v31 = vld [vmem:[#allocation7 + $0x38] sm:$0xf0]  ;;  %386 = vmatpush.bf16.msra.mxu3 %v4264_v21  ;;  %361 = vmatpush.bf16.msra.mxu1 %v4268_v26  ;;  %v4280_v49 = vor.u32 %v3758_v25, %v3234_v28  ;;  %v5581_v25 = vmov 0  }
  0x2d   :  { %5815 = vst [vmem:[#allocation36_spill] sm:$0xff] %v4270_v27  ;;  %v3240_v32 = vld [vmem:[#allocation7 + $0x8] sm:$0xf]  ;;  %v3761_v36 = vld [vmem:[#allocation7 + $0x14] sm:$0xf0]  ;;  %v4276_v48 = vor.u32 %v3763_v30, %v3258_v31  ;;  %374 = vmatpush.bf16.msra.mxu2 %v4270_v27 }
  0x2e   :  { %v3472_v37 = vld [vmem:[#allocation3 + $0xe0] sm:$0xf]  ;;  %v3724_v38 = vld [vmem:[#allocation3 + $0xec] sm:$0xf0]  ;;  %v3722_v39 = vld [vmem:[#allocation3 + $0xe4] sm:$0xf]  ;;  %v4282_v50 = vor.u32 %v3761_v36, %v3240_v32 }
  0x2f   :  { %v3474_v40 = vld [vmem:[#allocation3 + $0xf0] sm:$0xf0]  ;;  %5816 = vst [vmem:[#allocation37_spill] sm:$0xff] %v4274_v41  ;;  %v3480_v44 = vld [vmem:[#allocation3 + $0xe8] sm:$0xf]  ;;  %v4284_v53 = vor.u32 %v3724_v38, %v3472_v37  ;;  %349 = vmatpush.bf16.msra.mxu0 %v4274_v41 }
  0x30   :  { %v3725_v45 = vld [vmem:[#allocation3 + $0xf4] sm:$0xf0]  ;;  %5817 = vst [vmem:[#allocation38_spill] sm:$0xff] %v4276_v48  ;;  %v3759_v51 = vld [vmem:[#allocation7 + $0xc] sm:$0xf]  ;;  %v4286_v56 = vor.u32 %v3722_v39, %v3474_v40  ;;  %387 = vmatpush.bf16.msra.mxu3 %v4276_v48  ;;  %362 = vmatpush.bf16.msra.mxu1 %v4280_v49 }
  0x31   :  { %5818 = vst [vmem:[#allocation39_spill] sm:$0xff] %v4280_v49  ;;  %v3242_v52 = vld [vmem:[#allocation7 + $0x18] sm:$0xf0]  ;;  %v3456_v57 = vld [vmem:[#allocation3 + $0xc0] sm:$0xf]  ;;  %v4288_v62 = vor.u32 %v3725_v45, %v3480_v44  ;;  %375 = vmatpush.bf16.msra.mxu2 %v4282_v50 }
  0x32   :  { %5819 = vst [vmem:[#allocation40_spill] sm:$0xff] %v4282_v50  ;;  %v3723_v60 = vld [vmem:[#allocation3 + $0xec] sm:$0xf]  ;;  %v3482_v61 = vld [vmem:[#allocation3 + $0xf8] sm:$0xf0]  ;;  %v4292_v11 = vor.u32 %v3759_v51, %v3242_v52  ;;  %350 = vmatmul.bf16.vlgmr.msra.gmra.mxu0 %v5581_v25 }
  0x33   :  { %v3720_v63 = vld [vmem:[#allocation3 + $0xcc] sm:$0xf0]  ;;  %v3718_v0 = vld [vmem:[#allocation3 + $0xc4] sm:$0xf]  ;;  %v3458_v1 = vld [vmem:[#allocation3 + $0xd0] sm:$0xf0]  ;;  %v4296_v12 = vor.u32 %v3723_v60, %v3482_v61  ;;  %558 = vmatpush.bf16.msrb.mxu0 %v4284_v53  ;;  %363 = vmatmul.bf16.vlgmr.msra.gmra.mxu1 %v5581_v25 }
  0x34   :  { %v3464_v5 = vld [vmem:[#allocation3 + $0xc8] sm:$0xf]  ;;  %v3721_v6 = vld [vmem:[#allocation3 + $0xd4] sm:$0xf0]  ;;  %5820 = vst [vmem:[#allocation41_spill] sm:$0xff] %v4292_v11  ;;  %571 = vmatpush.bf16.msrb.mxu1 %v4286_v56  ;;  %v4300_v14 = vor.u32 %v3720_v63, %v3456_v57  ;;  %v4302_v15 = vor.u32 %v3718_v0, %v3458_v1  ;;  %388 = vmatpush.bf16.msra.mxu3 %v4292_v11 }
  0x35   :  { %v3440_v16 = vld [vmem:[#allocation3 + $0xa0] sm:$0xf]  ;;  %v3719_v19 = vld [vmem:[#allocation3 + $0xcc] sm:$0xf]  ;;  %v3466_v23 = vld [vmem:[#allocation3 + $0xd8] sm:$0xf0]  ;;  %584 = vmatpush.bf16.msrb.mxu2 %v4288_v62  ;;  %v4305_v24 = vor.u32 %v3721_v6, %v3464_v5 }
  0x36   :  { %5821 = vst [vmem:[#allocation42_spill] sm:$0xff] %v4300_v14  ;;  %v3716_v28 = vld [vmem:[#allocation3 + $0xac] sm:$0xf0]  ;;  %v3714_v30 = vld [vmem:[#allocation3 + $0xa4] sm:$0xf]  ;;  %v4311_v37 = vor.u32 %v3719_v19, %v3466_v23  ;;  %376 = vmatmul.bf16.vlgmr.msra.gmra.mxu2 %v5581_v25 }
  0x37   :  { %5822 = vst [vmem:[#allocation43_spill] sm:$0xff] %v4302_v15  ;;  %v3442_v31 = vld [vmem:[#allocation3 + $0xb0] sm:$0xf0]  ;;  %v3448_v32 = vld [vmem:[#allocation3 + $0xa8] sm:$0xf]  ;;  %559 = vmatpush.bf16.msrb.mxu0 %v4300_v14  ;;  %v4316_v38 = vor.u32 %v3716_v28, %v3440_v16  ;;  %389 = vmatmul.bf16.vlgmr.msra.gmra.mxu3 %v5581_v25 }
  0x38   :  { %5823 = vst [vmem:[#allocation44_spill] sm:$0xff] %v4305_v24  ;;  %v3717_v36 = vld [vmem:[#allocation3 + $0xb4] sm:$0xf0]  ;;  %597 = vmatpush.bf16.msrb.mxu3 %v4296_v12  ;;  %572 = vmatpush.bf16.msrb.mxu1 %v4302_v15  ;;  %v4318_v39 = vor.u32 %v3714_v30, %v3442_v31  ;;  %v3424_v40 = vld [vmem:[#allocation3 + $0x80] sm:$0xf] }
  0x39   :  { %5824 = vst [vmem:[#allocation45_spill] sm:$0xff] %v4311_v37  ;;  %v3715_v44 = vld [vmem:[#allocation3 + $0xac] sm:$0xf]  ;;  %v3450_v45 = vld [vmem:[#allocation3 + $0xb8] sm:$0xf0]  ;;  %585 = vmatpush.bf16.msrb.mxu2 %v4305_v24  ;;  %v4321_v51 = vor.u32 %v3717_v36, %v3448_v32 }
  0x3a   :  { %5825 = vst [vmem:[#allocation46_spill] sm:$0xff] %v4316_v38  ;;  %v3712_v52 = vld [vmem:[#allocation3 + $0x8c] sm:$0xf0]  ;;  %v3710_v57 = vld [vmem:[#allocation3 + $0x84] sm:$0xf]  ;;  %v4325_v0 = vor.u32 %v3715_v44, %v3450_v45 }
  0x3b   :  { %5826 = vst [vmem:[#allocation47_spill] sm:$0xff] %v4318_v39  ;;  %v3426_v60 = vld [vmem:[#allocation3 + $0x90] sm:$0xf0]  ;;  %v3432_v61 = vld [vmem:[#allocation3 + $0x88] sm:$0xf]  ;;  %560 = vmatpush.bf16.msrb.mxu0 %v4316_v38  ;;  %v4329_v1 = vor.u32 %v3712_v52, %v3424_v40 }
  0x3c   :  { %5827 = vst [vmem:[#allocation48_spill] sm:$0xff] %v4321_v51  ;;  %v3713_v63 = vld [vmem:[#allocation3 + $0x94] sm:$0xf0]  ;;  %598 = vmatpush.bf16.msrb.mxu3 %v4311_v37  ;;  %573 = vmatpush.bf16.msrb.mxu1 %v4318_v39  ;;  %v4331_v5 = vor.u32 %v3710_v57, %v3426_v60  ;;  %v3408_v6 = vld [vmem:[#allocation3 + $0x60] sm:$0xf] }
  0x3d   :  { %5828 = vst [vmem:[#allocation49_spill] sm:$0xff] %v4325_v0  ;;  %v3711_v16 = vld [vmem:[#allocation3 + $0x8c] sm:$0xf]  ;;  %v3434_v19 = vld [vmem:[#allocation3 + $0x98] sm:$0xf0]  ;;  %586 = vmatpush.bf16.msrb.mxu2 %v4321_v51  ;;  %v4334_v23 = vor.u32 %v3713_v63, %v3432_v61 }
  0x3e   :  { %5829 = vst [vmem:[#allocation50_spill] sm:$0xff] %v4329_v1  ;;  %v3708_v28 = vld [vmem:[#allocation3 + $0x6c] sm:$0xf0]  ;;  %v3706_v30 = vld [vmem:[#allocation3 + $0x64] sm:$0xf]  ;;  %v4337_v44 = vor.u32 %v3711_v16, %v3434_v19 }
  0x3f   :  { %5830 = vst [vmem:[#allocation51_spill] sm:$0xff] %v4331_v5  ;;  %v3410_v31 = vld [vmem:[#allocation3 + $0x70] sm:$0xf0]  ;;  %v3416_v32 = vld [vmem:[#allocation3 + $0x68] sm:$0xf]  ;;  %561 = vmatpush.bf16.msrb.mxu0 %v4329_v1  ;;  %v4341_v40 = vor.u32 %v3708_v28, %v3408_v6 }
  0x40   :  { %5831 = vst [vmem:[#allocation52_spill] sm:$0xff] %v4334_v23  ;;  %v3709_v36 = vld [vmem:[#allocation3 + $0x74] sm:$0xf0]  ;;  %599 = vmatpush.bf16.msrb.mxu3 %v4325_v0  ;;  %574 = vmatpush.bf16.msrb.mxu1 %v4331_v5  ;;  %v4343_v45 = vor.u32 %v3706_v30, %v3410_v31  ;;  %v3392_v52 = vld [vmem:[#allocation3 + $0x40] sm:$0xf] }
  0x41   :  { %5832 = vst [vmem:[#allocation53_spill] sm:$0xff] %v4337_v44  ;;  %v3707_v57 = vld [vmem:[#allocation3 + $0x6c] sm:$0xf]  ;;  %v3418_v60 = vld [vmem:[#allocation3 + $0x78] sm:$0xf0]  ;;  %587 = vmatpush.bf16.msrb.mxu2 %v4334_v23  ;;  %v4346_v61 = vor.u32 %v3709_v36, %v3416_v32 }
  0x42   :  { %5833 = vst [vmem:[#allocation54_spill] sm:$0xff] %v4341_v40  ;;  %v3704_v63 = vld [vmem:[#allocation3 + $0x4c] sm:$0xf0]  ;;  %v3702_v25 = vld [vmem:[#allocation3 + $0x44] sm:$0xf]  ;;  %v4349_v1 = vor.u32 %v3707_v57, %v3418_v60 }
  0x43   :  { %5834 = vst [vmem:[#allocation55_spill] sm:$0xff] %v4343_v45  ;;  %v3394_v0 = vld [vmem:[#allocation3 + $0x50] sm:$0xf0]  ;;  %v3400_v16 = vld [vmem:[#allocation3 + $0x48] sm:$0xf]  ;;  %562 = vmatpush.bf16.msrb.mxu0 %v4341_v40  ;;  %v4353_v6 = vor.u32 %v3704_v63, %v3392_v52 }
  0x44   :  { %5835 = vst [vmem:[#allocation56_spill] sm:$0xff] %v4346_v61  ;;  %v3705_v19 = vld [vmem:[#allocation3 + $0x54] sm:$0xf0]  ;;  %600 = vmatpush.bf16.msrb.mxu3 %v4337_v44  ;;  %575 = vmatpush.bf16.msrb.mxu1 %v4343_v45  ;;  %v4355_v28 = vor.u32 %v3702_v25, %v3394_v0  ;;  %v3376_v30 = vld [vmem:[#allocation3 + $0x20] sm:$0xf] }
  0x45   :  { %5836 = vst [vmem:[#allocation57_spill] sm:$0xff] %v4349_v1  ;;  %v3703_v31 = vld [vmem:[#allocation3 + $0x4c] sm:$0xf]  ;;  %v3402_v32 = vld [vmem:[#allocation3 + $0x58] sm:$0xf0]  ;;  %588 = vmatpush.bf16.msrb.mxu2 %v4346_v61  ;;  %v4358_v36 = vor.u32 %v3705_v19, %v3400_v16 }
  0x46   :  { %5837 = vst [vmem:[#allocation58_spill] sm:$0xff] %v4353_v6  ;;  %v3700_v23 = vld [vmem:[#allocation3 + $0x2c] sm:$0xf0]  ;;  %v3698_v5 = vld [vmem:[#allocation3 + $0x24] sm:$0xf]  ;;  %v4361_v40 = vor.u32 %v3703_v31, %v3402_v32 }
  0x47   :  { %5838 = vst [vmem:[#allocation59_spill] sm:$0xff] %v4355_v28  ;;  %v3378_v44 = vld [vmem:[#allocation3 + $0x30] sm:$0xf0]  ;;  %v3384_v57 = vld [vmem:[#allocation3 + $0x28] sm:$0xf]  ;;  %563 = vmatpush.bf16.msrb.mxu0 %v4353_v6  ;;  %v4365_v25 = vor.u32 %v3700_v23, %v3376_v30 }
  0x48   :  { %5839 = vst [vmem:[#allocation60_spill] sm:$0xff] %v4358_v36  ;;  %v3701_v60 = vld [vmem:[#allocation3 + $0x34] sm:$0xf0]  ;;  %601 = vmatpush.bf16.msrb.mxu3 %v4349_v1  ;;  %576 = vmatpush.bf16.msrb.mxu1 %v4355_v28  ;;  %v4367_v0 = vor.u32 %v3698_v5, %v3378_v44  ;;  %v3360_v52 = vld [vmem:[#allocation3] sm:$0xf] }
  0x49   :  { %5840 = vst [vmem:[#allocation61_spill] sm:$0xff] %v4361_v40  ;;  %v3699_v63 = vld [vmem:[#allocation3 + $0x2c] sm:$0xf]  ;;  %v3386_v16 = vld [vmem:[#allocation3 + $0x38] sm:$0xf0]  ;;  %589 = vmatpush.bf16.msrb.mxu2 %v4358_v36  ;;  %v4370_v19 = vor.u32 %v3701_v60, %v3384_v57 }
  0x4a   :  { %5841 = vst [vmem:[#allocation62_spill] sm:$0xff] %v4365_v25  ;;  %v3696_v61 = vld [vmem:[#allocation3 + $0xc] sm:$0xf0]  ;;  %v3694_v45 = vld [vmem:[#allocation3 + $0x4] sm:$0xf]  ;;  %v4373_v6 = vor.u32 %v3699_v63, %v3386_v16 }
  0x4b   :  { %5842 = vst [vmem:[#allocation63_spill] sm:$0xff] %v4367_v0  ;;  %v3362_v1 = vld [vmem:[#allocation3 + $0x10] sm:$0xf0]  ;;  %v3368_v31 = vld [vmem:[#allocation3 + $0x8] sm:$0xf]  ;;  %564 = vmatpush.bf16.msrb.mxu0 %v4365_v25  ;;  %v4377_v5 = vor.u32 %v3696_v61, %v3360_v52  ;;  %v5849_v61 = vmov 0  }
  0x4c   :  { %5843 = vst [vmem:[#allocation64_spill] sm:$0xff] %v4370_v19  ;;  %v3697_v32 = vld [vmem:[#allocation3 + $0x14] sm:$0xf0]  ;;  %602 = vmatpush.bf16.msrb.mxu3 %v4361_v40  ;;  %577 = vmatpush.bf16.msrb.mxu1 %v4367_v0  ;;  %v4379_v23 = vor.u32 %v3694_v45, %v3362_v1  ;;  %v3695_v30 = vld [vmem:[#allocation3 + $0xc] sm:$0xf] }
  0x4d   :  { %5844 = vst [vmem:[#allocation65_spill] sm:$0xff] %v4373_v6  ;;  %590 = vmatpush.bf16.msrb.mxu2 %v4370_v19  ;;  %v4382_v44 = vor.u32 %v3697_v32, %v3368_v31  ;;  %v3370_v57 = vld [vmem:[#allocation3 + $0x18] sm:$0xf0]  ;;  %v3603_v32 = vld [vmem:[#allocation5 + $0xe0] sm:$0xf] }
  0x4e   :  { %5845 = vst [vmem:[#allocation66_spill] sm:$0xff] %v4377_v5  ;;  %v4387_v60 = vor.u32 %v3695_v30, %v3370_v57  ;;  %v3756_v30 = vld [vmem:[#allocation5 + $0xec] sm:$0xf0]  ;;  %v3754_v57 = vld [vmem:[#allocation5 + $0xe4] sm:$0xf] }
  0x4f   :  { %5846 = vst [vmem:[#allocation67_spill] sm:$0xff] %v4379_v23  ;;  %565 = vmatpush.bf16.msrb.mxu0 %v4377_v5  ;;  %v3611_v5 = vld [vmem:[#allocation5 + $0xe8] sm:$0xf] }
  0x50   :  { %5847 = vst [vmem:[#allocation68_spill] sm:$0xff] %v4382_v44  ;;  %603 = vmatpush.bf16.msrb.mxu3 %v4373_v6  ;;  %578 = vmatpush.bf16.msrb.mxu1 %v4379_v23  ;;  %v3605_v23 = vld [vmem:[#allocation5 + $0xf0] sm:$0xf0] }
  0x51   :  { %5848 = vst [vmem:[#allocation69_spill] sm:$0xff] %v4387_v60  ;;  %591 = vmatpush.bf16.msrb.mxu2 %v4382_v44  ;;  %v4403_v44 = vor.u32 %v3756_v30, %v3603_v32  ;;  %v4405_v6 = vor.u32 %v3754_v57, %v3605_v23  ;;  %v3587_v32 = vld [vmem:[#allocation5 + $0xc0] sm:$0xf]  ;;  %v3752_v30 = vld [vmem:[#allocation5 + $0xcc] sm:$0xf0] }
  0x52   :  { %566 = vmatmul.bf16.vlgmr.msrb.gmra.mxu0 %v5849_v61  ;;  %v4415_v23 = vor.u32 %v3752_v30, %v3587_v32  ;;  %v3753_v57 = vld [vmem:[#allocation5 + $0xd4] sm:$0xf0]  ;;  %v3571_v32 = vld [vmem:[#allocation5 + $0xa0] sm:$0xf]  ;;  %v3748_v30 = vld [vmem:[#allocation5 + $0xac] sm:$0xf0] }
  0x53   :  { %579 = vmatmul.bf16.vlgmr.msrb.gmra.mxu1 %v5849_v61  ;;  %5854 = vst [vmem:[#allocation74_spill] sm:$0xff] %v4403_v44  ;;  %838 = vmatpush.bf16.msra.mxu0 %v4403_v44 }
  0x54   :  { %592 = vmatmul.bf16.vlgmr.msrb.gmra.mxu2 %v5849_v61  ;;  %604 = vmatpush.bf16.msrb.mxu3 %v4387_v60  ;;  %v3757_v60 = vld [vmem:[#allocation5 + $0xf4] sm:$0xf0]  ;;  %5855 = vst [vmem:[#allocation75_spill] sm:$0xff] %v4405_v6 }
  0x55   :  { %851 = vmatpush.bf16.msra.mxu1 %v4405_v6  ;;  %5858 = vst [vmem:[#allocation78_spill] sm:$0xff] %v4415_v23  ;;  %v3747_v6 = vld [vmem:[#allocation5 + $0xac] sm:$0xf] }
  0x57   :  { %605 = vmatmul.bf16.vlgmr.msrb.gmra.mxu3 %v5849_v61  ;;  %v4407_v61 = vor.u32 %v3757_v60, %v3611_v5  ;;  %v3589_v5 = vld [vmem:[#allocation5 + $0xd0] sm:$0xf0]  ;;  %v3595_v60 = vld [vmem:[#allocation5 + $0xc8] sm:$0xf]  ;;  %839 = vmatpush.bf16.msra.mxu0 %v4415_v23  ;;  %v3581_v23 = vld [vmem:[#allocation5 + $0xb8] sm:$0xf0] }
  0x59   :  { %5856 = vst [vmem:[#allocation76_spill] sm:$0xff] %v4407_v61  ;;  %864 = vmatpush.bf16.msra.mxu2 %v4407_v61 }
  0xaf   :  { %v4395_v1 = vpop.f32.mrf.mxu0 }
  0xb0   :  { %5850 = vst [vmem:[#allocation70_spill] sm:$0xff] %v4395_v1  ;;  %v4397_v45 = vpop.f32.mrf.mxu1  ;;  %v3755_v1 = vld [vmem:[#allocation5 + $0xec] sm:$0xf] }
  0xb1   :  { %5851 = vst [vmem:[#allocation71_spill] sm:$0xff] %v4397_v45  ;;  %v3613_v45 = vld [vmem:[#allocation5 + $0xf8] sm:$0xf0] }
  0xb7   :  { %v353_v52 = vpop.f32.mrf.mxu0 }
  0xb8   :  { %v366_v16 = vpop.f32.mrf.mxu1  ;;  %v4410_v52 = vor.u32 %v3755_v1, %v3613_v45  ;;  %v4419_v1 = vor.u32 %v3753_v57, %v3595_v60  ;;  %v3751_v45 = vld [vmem:[#allocation5 + $0xcc] sm:$0xf]  ;;  %v3749_v57 = vld [vmem:[#allocation5 + $0xb4] sm:$0xf0] }
  0xb9   :  { %v4399_v63 = vpop.f32.mrf.mxu2 }
  0xba   :  { %5852 = vst [vmem:[#allocation72_spill] sm:$0xff] %v4399_v63  ;;  %v4401_v31 = vpop.f32.mrf.mxu3  ;;  %877 = vmatpush.bf16.msra.mxu3 %v4410_v52  ;;  %865 = vmatpush.bf16.msra.mxu2 %v4419_v1 }
  0xbb   :  { %5853 = vst [vmem:[#allocation73_spill] sm:$0xff] %v4401_v31  ;;  %v3750_v31 = vld [vmem:[#allocation5 + $0xc4] sm:$0xf] }
  0xbc   :  { %5857 = vst [vmem:[#allocation77_spill] sm:$0xff] %v4410_v52  ;;  %v4417_v19 = vor.u32 %v3750_v31, %v3589_v5  ;;  %v4427_v52 = vor.u32 %v3748_v30, %v3571_v32  ;;  %v3573_v31 = vld [vmem:[#allocation5 + $0xb0] sm:$0xf0]  ;;  %v3579_v5 = vld [vmem:[#allocation5 + $0xa8] sm:$0xf] }
  0xbd   :  { %5860 = vst [vmem:[#allocation80_spill] sm:$0xff] %v4419_v1  ;;  %v3555_v1 = vld [vmem:[#allocation5 + $0x80] sm:$0xf]  ;;  %v3742_v32 = vld [vmem:[#allocation5 + $0x84] sm:$0xf] }
  0xbe   :  { %5859 = vst [vmem:[#allocation79_spill] sm:$0xff] %v4417_v19  ;;  %852 = vmatpush.bf16.msra.mxu1 %v4417_v19  ;;  %840 = vmatpush.bf16.msra.mxu0 %v4427_v52  ;;  %v3745_v19 = vld [vmem:[#allocation5 + $0x94] sm:$0xf0] }
  0xbf   :  { %5862 = vst [vmem:[#allocation82_spill] sm:$0xff] %v4427_v52 }
  0xc1   :  { %v379_v16 = vpop.f32.mrf.mxu2 }
  0xc2   :  { %v392_v63 = vpop.f32.mrf.mxu3  ;;  %v3597_v16 = vld [vmem:[#allocation5 + $0xd8] sm:$0xf0] }
  0xc3   :  { %v4422_v61 = vor.u32 %v3751_v45, %v3597_v16  ;;  %v3746_v63 = vld [vmem:[#allocation5 + $0xa4] sm:$0xf]  ;;  %v4432_v45 = vor.u32 %v3749_v57, %v3579_v5  ;;  %v4434_v16 = vor.u32 %v3747_v6, %v3581_v23  ;;  %v3743_v6 = vld [vmem:[#allocation5 + $0x8c] sm:$0xf]  ;;  %v3565_v23 = vld [vmem:[#allocation5 + $0x98] sm:$0xf0] }
  0xc4   :  { %v4429_v60 = vor.u32 %v3746_v63, %v3573_v31  ;;  %v3557_v63 = vld [vmem:[#allocation5 + $0x90] sm:$0xf0]  ;;  %v3563_v31 = vld [vmem:[#allocation5 + $0x88] sm:$0xf]  ;;  %v394_v57 = vld [vmem:[%s5573_s0] sm:$0x3] }
  0xc5   :  { %5861 = vst [vmem:[#allocation81_spill] sm:$0xff] %v4422_v61  ;;  %878 = vmatpush.bf16.msra.mxu3 %v4422_v61  ;;  %v3744_v61 = vld [vmem:[#allocation5 + $0x8c] sm:$0xf0]  ;;  %866 = vmatpush.bf16.msra.mxu2 %v4432_v45  ;;  %v4441_v44 = vor.u32 %v3742_v32, %v3557_v63  ;;  %v4443_v5 = vor.u32 %v3745_v19, %v3563_v31  ;;  %v3738_v19 = vld [vmem:[#allocation5 + $0x64] sm:$0xf] }
  0xc6   :  { %5863 = vst [vmem:[#allocation83_spill] sm:$0xff] %v4429_v60  ;;  %853 = vmatpush.bf16.msra.mxu1 %v4429_v60  ;;  %v4439_v30 = vor.u32 %v3744_v61, %v3555_v1  ;;  %v4452_v61 = vor.u32 %v3743_v6, %v3565_v23  ;;  %v3539_v1 = vld [vmem:[#allocation5 + $0x60] sm:$0xf]  ;;  %v3740_v32 = vld [vmem:[#allocation5 + $0x6c] sm:$0xf0] }
  0xc7   :  { %5864 = vst [vmem:[#allocation84_spill] sm:$0xff] %v4432_v45  ;;  %v395_v45 = vld [vmem:[%s5573_s0 + $0x8] sm:$0x3]  ;;  %v4457_v63 = vor.u32 %v3740_v32, %v3539_v1  ;;  %v3541_v31 = vld [vmem:[#allocation5 + $0x70] sm:$0xf0] }
  0xc8   :  { %5865 = vst [vmem:[#allocation85_spill] sm:$0xff] %v4434_v16  ;;  %841 = vmatpush.bf16.msra.mxu0 %v4439_v30  ;;  %v3741_v60 = vld [vmem:[#allocation5 + $0x74] sm:$0xf0]  ;;  %v4459_v25 = vor.u32 %v3738_v19, %v3541_v31  ;;  %v3739_v23 = vld [vmem:[#allocation5 + $0x6c] sm:$0xf] }
  0xc9   :  { %879 = vmatpush.bf16.msra.mxu3 %v4434_v16  ;;  %5866 = vst [vmem:[#allocation86_spill] sm:$0xff] %v4439_v30  ;;  %867 = vmatpush.bf16.msra.mxu2 %v4443_v5  ;;  %v3547_v16 = vld [vmem:[#allocation5 + $0x68] sm:$0xf]  ;;  %v3523_v1 = vld [vmem:[#allocation5 + $0x40] sm:$0xf] }
  0xca   :  { %5867 = vst [vmem:[#allocation87_spill] sm:$0xff] %v4441_v44  ;;  %854 = vmatpush.bf16.msra.mxu1 %v4441_v44  ;;  %v4461_v6 = vor.u32 %v3741_v60, %v3547_v16  ;;  %v3549_v44 = vld [vmem:[#allocation5 + $0x78] sm:$0xf0]  ;;  %v3736_v32 = vld [vmem:[#allocation5 + $0x4c] sm:$0xf0] }
  0xcb   :  { %5868 = vst [vmem:[#allocation88_spill] sm:$0xff] %v4443_v5  ;;  %v4464_v5 = vor.u32 %v3739_v23, %v3549_v44  ;;  %v4469_v60 = vor.u32 %v3736_v32, %v3523_v1  ;;  %v3525_v16 = vld [vmem:[#allocation5 + $0x50] sm:$0xf0]  ;;  %v3735_v44 = vld [vmem:[#allocation5 + $0x4c] sm:$0xf] }
  0xcc   :  { %5869 = vst [vmem:[#allocation89_spill] sm:$0xff] %v4452_v61  ;;  %842 = vmatpush.bf16.msra.mxu0 %v4457_v63  ;;  %v3732_v31 = vld [vmem:[#allocation5 + $0x2c] sm:$0xf0]  ;;  %v3730_v23 = vld [vmem:[#allocation5 + $0x24] sm:$0xf] }
  0xcd   :  { %880 = vmatpush.bf16.msra.mxu3 %v4452_v61  ;;  %5870 = vst [vmem:[#allocation90_spill] sm:$0xff] %v4457_v63  ;;  %v3734_v61 = vld [vmem:[#allocation5 + $0x44] sm:$0xf]  ;;  %868 = vmatpush.bf16.msra.mxu2 %v4461_v6  ;;  %v3509_v32 = vld [vmem:[#allocation5 + $0x30] sm:$0xf0] }
  0xce   :  { %5871 = vst [vmem:[#allocation91_spill] sm:$0xff] %v4459_v25  ;;  %855 = vmatpush.bf16.msra.mxu1 %v4459_v25 }
  0xcf   :  { %v567_v52 = vpop.f32.mrf.mxu0  ;;  %5872 = vst [vmem:[#allocation92_spill] sm:$0xff] %v4461_v6 }
  0xd0   :  { %v580_v0 = vpop.f32.mrf.mxu1  ;;  %v610_v30 = vadd.f32 %v567_v52, %v394_v57  ;;  %5873 = vst [vmem:[#allocation93_spill] sm:$0xff] %v4464_v5  ;;  %v4471_v52 = vor.u32 %v3734_v61, %v3525_v16  ;;  %v396_v57 = vld [vmem:[%s5573_s0 + $0x10] sm:$0x3]  ;;  %843 = vmatpush.bf16.msra.mxu0 %v4469_v60  ;;  %v3507_v61 = vld [vmem:[#allocation5 + $0x20] sm:$0xf] }
  0xd1   :  { %v611_v40 = vadd.f32 %v580_v0, %v395_v45  ;;  %881 = vmatpush.bf16.msra.mxu3 %v4464_v5  ;;  %5874 = vst [vmem:[#allocation94_spill] sm:$0xff] %v4469_v60  ;;  %v3531_v0 = vld [vmem:[#allocation5 + $0x48] sm:$0xf]  ;;  %v3737_v45 = vld [vmem:[#allocation5 + $0x54] sm:$0xf0] }
  0xd2   :  { %v3486_v36 = vmul.f32 -1.442695, %v610_v30  ;;  %5875 = vst [vmem:[#allocation95_spill] sm:$0xff] %v4471_v52  ;;  %v3533_v30 = vld [vmem:[#allocation5 + $0x58] sm:$0xf0]  ;;  %856 = vmatpush.bf16.msra.mxu1 %v4471_v52 }
  0xd3   :  { %v3487_v28 = vmul.f32 -1.442695, %v611_v40  ;;  %v4477_v40 = vor.u32 %v3737_v45, %v3531_v0  ;;  %v4480_v19 = vor.u32 %v3735_v44, %v3533_v30  ;;  %v3515_v16 = vld [vmem:[#allocation5 + $0x28] sm:$0xf]  ;;  %v3733_v5 = vld [vmem:[#allocation5 + $0x34] sm:$0xf0] }
  0xd4   :  { %3805 = vpow2.f32 %v3486_v36  ;;  %v4483_v36 = vor.u32 %v3732_v31, %v3507_v61  ;;  %v4488_v44 = vor.u32 %v3733_v5, %v3515_v16  ;;  %v3731_v30 = vld [vmem:[#allocation5 + $0x2c] sm:$0xf]  ;;  %v3517_v52 = vld [vmem:[#allocation5 + $0x38] sm:$0xf0]  ;;  %v3493_v5 = vld [vmem:[#allocation5 + $0x10] sm:$0xf0] }
  0xd5   :  { %5876 = vst [vmem:[#allocation96_spill] sm:$0xff] %v4477_v40  ;;  %3807 = vpow2.f32 %v3487_v28  ;;  %869 = vmatpush.bf16.msra.mxu2 %v4477_v40  ;;  %882 = vmatpush.bf16.msra.mxu3 %v4480_v19  ;;  %v4486_v28 = vor.u32 %v3730_v23, %v3509_v32  ;;  %v4491_v6 = vor.u32 %v3731_v30, %v3517_v52  ;;  %v3491_v40 = vld [vmem:[#allocation5] sm:$0xf]  ;;  %v3726_v23 = vld [vmem:[#allocation5 + $0x4] sm:$0xf] }
  0xd6   :  { %5877 = vst [vmem:[#allocation97_spill] sm:$0xff] %v4480_v19  ;;  %844 = vmatpush.bf16.msra.mxu0 %v4483_v36  ;;  %v3499_v32 = vld [vmem:[#allocation5 + $0x8] sm:$0xf]  ;;  %v3729_v52 = vld [vmem:[#allocation5 + $0x14] sm:$0xf0] }
  0xd7   :  { %v593_v1 = vpop.f32.mrf.mxu2  ;;  %5878 = vst [vmem:[#allocation98_spill] sm:$0xff] %v4483_v36  ;;  %v569_v0 = vpop.f32.mrf.mxu0  ;;  %857 = vmatpush.bf16.msra.mxu1 %v4486_v28 }
  0xd8   :  { %v612_v60 = vadd.f32 %v593_v1, %v396_v57  ;;  %v582_v45 = vpop.f32.mrf.mxu1  ;;  %5879 = vst [vmem:[#allocation99_spill] sm:$0xff] %v4486_v28  ;;  %v3728_v57 = vld [vmem:[#allocation5 + $0xc] sm:$0xf0]  ;;  %v4505_v28 = vor.u32 %v3729_v52, %v3499_v32 }
  0xd9   :  { %5880 = vst [vmem:[#allocation100_spill] sm:$0xff] %v4488_v44  ;;  %870 = vmatpush.bf16.msra.mxu2 %v4488_v44  ;;  %v4495_v0 = vor.u32 %v3728_v57, %v3491_v40  ;;  %883 = vmatpush.bf16.msra.mxu3 %v4491_v6  ;;  %v3727_v40 = vld [vmem:[#allocation5 + $0xc] sm:$0xf]  ;;  %v3501_v57 = vld [vmem:[#allocation5 + $0x18] sm:$0xf0] }
  0xda   :  { %5881 = vst [vmem:[#allocation101_spill] sm:$0xff] %v4491_v6  ;;  %v3488_v61 = vmul.f32 -1.442695, %v612_v60  ;;  %v606_v31 = vpop.f32.mrf.mxu3  ;;  %v3806_v1 = vpop.eup %3805  ;;  %v4500_v60 = vor.u32 %v3726_v23, %v3493_v5  ;;  %v4516_v23 = vor.u32 %v3727_v40, %v3501_v57 }
  0xdb   :  { %5882 = vst [vmem:[#allocation102_spill] sm:$0xff] %v4495_v0  ;;  %v3808_v16 = vpop.eup %3807  ;;  %v4497_v45 = vadd.f32 1.0, %v3806_v1  ;;  %845 = vmatpush.bf16.msra.mxu0 %v4495_v0 }
  0xdc   :  { %3809 = vpow2.f32 %v3488_v61  ;;  %5883 = vst [vmem:[#allocation103_spill] sm:$0xff] %v4500_v60  ;;  %v4502_v30 = vadd.f32 1.0, %v3808_v16  ;;  %858 = vmatpush.bf16.msra.mxu1 %v4500_v60  ;;  %v397_v61 = vld [vmem:[%s5573_s0 + $0x18] sm:$0x3] }
  0xdd   :  { %5884 = vst [vmem:[#allocation104_spill] sm:$0xff] %v4505_v28  ;;  %3811 = vrcp.f32 %v4497_v45  ;;  %871 = vmatpush.bf16.msra.mxu2 %v4505_v28  ;;  %v613_v32 = vadd.f32 %v606_v31, %v397_v61  ;;  %884 = vmatpush.bf16.msra.mxu3 %v4516_v23  ;;  %vm631_vm2 = vweird.f32 %v4497_v45 }
  0xde   :  { %3813 = vrcp.f32 %v4502_v30  ;;  %5885 = vst [vmem:[#allocation105_spill] sm:$0xff] %v4516_v23  ;;  %vm646_vm3 = vweird.f32 %v4502_v30 }
  0xdf   :  { %958 = vmatpush.bf16.msrb.mxu0 %v4195_v4  ;;  %v595_v1 = vpop.f32.mrf.mxu2 }
  0xe0   :  { %971 = vmatpush.bf16.msrb.mxu1 %v4197_v8 }
  0xe1   :  { %984 = vmatpush.bf16.msrb.mxu2 %v4199_v9  ;;  %997 = vmatpush.bf16.msrb.mxu3 %v4210_v22 }
  0xe2   :  { %v3810_v5 = vpop.eup %3809  ;;  %v608_v16 = vpop.f32.mrf.mxu3 }
  0xe3   :  { %959 = vmatpush.bf16.msrb.mxu0 %v4202_v13  ;;  %v4521_v52 = vadd.f32 1.0, %v3810_v5  ;;  %v3812_v1 = vpop.eup %3811  ;;  %v637_v16 = vand.u32 2147483648, %v4497_v45  ;;  %v635_v13 = vand.u32 2147483647, %v4497_v45 }
  0xe4   :  { %972 = vmatpush.bf16.msrb.mxu1 %v4206_v17  ;;  %v3814_v40 = vpop.eup %3813  ;;  %v627_v57 = vmul.f32 %v3812_v1, %v4497_v45  ;;  %vm632_vm0 = vweird.f32 %v3812_v1 }
  0xe5   :  { %985 = vmatpush.bf16.msrb.mxu2 %v4208_v18  ;;  %3815 = vrcp.f32 %v4521_v52  ;;  %v642_v31 = vmul.f32 %v3814_v40, %v4502_v30  ;;  %998 = vmatpush.bf16.msrb.mxu3 %v4222_v35  ;;  %v652_v18 = vand.u32 2147483648, %v4502_v30  ;;  %vm647_vm1 = vweird.f32 %v3814_v40  ;;  %vm633_vm4 = vmor %vm631_vm2, %vm632_vm0 }
  0xe6   :  { %3817 = vtanh.f32 %v613_v32  ;;  %v628_v61 = vsub.f32 1.0, %v627_v57  ;;  %v650_v32 = vand.u32 2147483647, %v4502_v30  ;;  %vm636_vm5 = vcmp.eq.f32.partialorder %v635_v13, 8.507059e+37  ;;  %vm648_vm6 = vmor %vm646_vm3, %vm647_vm1 }
  0xe7   :  { %960 = vmatpush.bf16.msrb.mxu0 %v4214_v29  ;;  %v643_v5 = vsub.f32 1.0, %v642_v31  ;;  %vm661_vm9 = vweird.f32 %v4521_v52 }
  0xe8   :  { %973 = vmatpush.bf16.msrb.mxu1 %v4218_v33  ;;  %v629_v17 = vmul.f32 %v3812_v1, %v628_v61  ;;  %v653_v33 = vor.u32 1.1754944e-38, %v652_v18  ;;  %vm651_vm7 = vcmp.eq.f32.partialorder %v650_v32, 8.507059e+37  ;;  %v5887_v32 = vld [vmem:[#allocation50_spill] sm:$0xff] }
  0xe9   :  { %986 = vmatpush.bf16.msrb.mxu2 %v4220_v34  ;;  %v644_v22 = vmul.f32 %v3814_v40, %v643_v5  ;;  %999 = vmatpush.bf16.msrb.mxu3 %v4228_v43  ;;  %v638_v5 = vor.u32 1.1754944e-38, %v637_v16 }
  0xea   :  { %v630_v29 = vadd.f32 %v3812_v1, %v629_v17 }
  0xeb   :  { %961 = vmatpush.bf16.msrb.mxu0 %v4226_v42  ;;  %v3816_v57 = vpop.eup %3815  ;;  %v645_v34 = vadd.f32 %v3814_v40, %v644_v22 }
  0xec   :  { %974 = vmatpush.bf16.msrb.mxu1 %v4232_v46  ;;  %v3818_v31 = vpop.eup %3817  ;;  %v657_v61 = vmul.f32 %v3816_v57, %v4521_v52  ;;  %v634_v42 = vsel %vm633_vm4, %v3812_v1, %v630_v29  ;;  %vm662_vm8 = vweird.f32 %v3816_v57  ;;  %v667_v29 = vand.u32 2147483648, %v4521_v52 }
  0xed   :  { %987 = vmatpush.bf16.msrb.mxu2 %v4234_v47  ;;  %v639_v45 = vsel %vm636_vm5, %v638_v5, %v634_v42  ;;  %v649_v43 = vsel %vm648_vm6, %v3814_v40, %v645_v34  ;;  %1000 = vmatpush.bf16.msrb.mxu3 %v4240_v55  ;;  %vm663_vm10 = vmor %vm661_vm9, %vm662_vm8  ;;  %v5886_v40 = vld [vmem:[#allocation49_spill] sm:$0xff]  ;;  %v5891_v5 = vld [vmem:[#allocation54_spill] sm:$0xff] }
  0xee   :  { %v658_v17 = vsub.f32 1.0, %v657_v61  ;;  %v654_v46 = vsel %vm651_vm7, %v653_v33, %v649_v43  ;;  %v673_v30 = vmul.f32 %v3818_v31, %v639_v45  ;;  %v665_v33 = vand.u32 2147483647, %v4521_v52  ;;  %v5889_v31 = vld [vmem:[#allocation52_spill] sm:$0xff]  ;;  %v5890_v61 = vld [vmem:[#allocation53_spill] sm:$0xff] }
  0xef   :  { %962 = vmatpush.bf16.msrb.mxu0 %v4238_v54  ;;  %v672_v16 = vmul.f32 0.0, %v654_v46  ;;  %v668_v42 = vor.u32 1.1754944e-38, %v667_v29  ;;  %v5893_v45 = vld [vmem:[#allocation56_spill] sm:$0xff]  ;;  %v5898_v29 = vld [vmem:[#allocation61_spill] sm:$0xff] }
  0xf0   :  { %975 = vmatpush.bf16.msrb.mxu1 %v4244_v58  ;;  %v659_v22 = vmul.f32 %v3816_v57, %v658_v17  ;;  %vm666_vm11 = vcmp.eq.f32.partialorder %v665_v33, 8.507059e+37  ;;  %v5892_v17 = vld [vmem:[#allocation55_spill] sm:$0xff]  ;;  %v5899_v33 = vld [vmem:[#allocation62_spill] sm:$0xff] }
  0xf1   :  { %988 = vmatpush.bf16.msrb.mxu2 %v4246_v59  ;;  %v4549_v18 = vadd.f32 %v673_v30, %v672_v16  ;;  %1001 = vmatpush.bf16.msrb.mxu3 %v4252_v3  ;;  %v5894_v30 = vld [vmem:[#allocation57_spill] sm:$0xff]  ;;  %v5896_v16 = vld [vmem:[#allocation59_spill] sm:$0xff] }
  0xf2   :  { %v660_v13 = vadd.f32 %v3816_v57, %v659_v22  ;;  %v5895_v22 = vld [vmem:[#allocation58_spill] sm:$0xff] }
  0xf3   :  { %963 = vmatpush.bf16.msrb.mxu0 %v4250_v2  ;;  %3819 = vtanh.f32 %v4549_v18 }
  0xf4   :  { %976 = vmatpush.bf16.msrb.mxu1 %v4256_v7  ;;  %v664_v34 = vsel %vm663_vm10, %v3816_v57, %v660_v13  ;;  %v5888_v57 = vld [vmem:[#allocation51_spill] sm:$0xff]  ;;  %v5897_v13 = vld [vmem:[#allocation60_spill] sm:$0xff] }
  0xf5   :  { %989 = vmatpush.bf16.msrb.mxu2 %v4258_v10  ;;  %1002 = vmatpush.bf16.msrb.mxu3 %v4264_v21  ;;  %v669_v46 = vsel %vm666_vm11, %v668_v42, %v664_v34  ;;  %v5900_v34 = vld [vmem:[#allocation63_spill] sm:$0xff]  ;;  %v5901_v42 = vld [vmem:[#allocation64_spill] sm:$0xff] }
  0xf7   :  { %964 = vmatpush.bf16.msrb.mxu0 %v4262_v20 }
  0xf8   :  { %977 = vmatpush.bf16.msrb.mxu1 %v4268_v26 }
  0xf9   :  { %990 = vmatpush.bf16.msrb.mxu2 %v4270_v27  ;;  %v3820_v43 = vpop.eup %3819  ;;  %1003 = vmatpush.bf16.msrb.mxu3 %v4276_v48 }
  0xfa   :  { %v676_v1 = vmul.f32 %v3820_v43, %v669_v46  ;;  %v5902_v43 = vld [vmem:[#allocation65_spill] sm:$0xff]  ;;  %v5903_v46 = vld [vmem:[#allocation66_spill] sm:$0xff] }
  0xfb   :  { %965 = vmatpush.bf16.msrb.mxu0 %v4274_v41 }
  0xfc   :  { %978 = vmatpush.bf16.msrb.mxu1 %v4280_v49  ;;  %v4567_v52 = vpack.c.bf16 %v676_v1, %v676_v1  ;;  %v5904_v1 = vld [vmem:[#allocation67_spill] sm:$0xff] }
  0xfd   :  { %991 = vmatpush.bf16.msrb.mxu2 %v4282_v50  ;;  %1004 = vmatpush.bf16.msrb.mxu3 %v4292_v11 }
  0xfe   :  { %846 = vmatmul.bf16.vlgmr.msra.gmra.mxu0 %v4567_v52  ;;  %859 = vmatmul.bf16.vlgmr.msra.gmra.mxu1 %v4567_v52 }
  0xff   :  { %872 = vmatmul.bf16.vlgmr.msra.gmra.mxu2 %v4567_v52  ;;  %885 = vmatmul.bf16.vlgmr.msra.gmra.mxu3 %v4567_v52 }
 0x100   :  { %1014 = vmatpush.bf16.msra.mxu0 %v4284_v53  ;;  %1027 = vmatpush.bf16.msra.mxu1 %v4286_v56 }
 0x101   :  { %1040 = vmatpush.bf16.msra.mxu2 %v4288_v62  ;;  %1053 = vmatpush.bf16.msra.mxu3 %v4296_v12 }
 0x104   :  { %1015 = vmatpush.bf16.msra.mxu0 %v4300_v14  ;;  %1028 = vmatpush.bf16.msra.mxu1 %v4302_v15 }
 0x105   :  { %1041 = vmatpush.bf16.msra.mxu2 %v4305_v24  ;;  %1054 = vmatpush.bf16.msra.mxu3 %v4311_v37 }
 0x108   :  { %1016 = vmatpush.bf16.msra.mxu0 %v4316_v38  ;;  %1029 = vmatpush.bf16.msra.mxu1 %v4318_v39 }
 0x109   :  { %1042 = vmatpush.bf16.msra.mxu2 %v4321_v51  ;;  %1055 = vmatpush.bf16.msra.mxu3 %v5886_v40 }
 0x10c   :  { %1017 = vmatpush.bf16.msra.mxu0 %v5887_v32  ;;  %1030 = vmatpush.bf16.msra.mxu1 %v5888_v57 }
 0x10d   :  { %1043 = vmatpush.bf16.msra.mxu2 %v5889_v31  ;;  %1056 = vmatpush.bf16.msra.mxu3 %v5890_v61  ;;  %v5912_v61 = vld [vmem:[#allocation72_spill] sm:$0xff] }
 0x110   :  { %1018 = vmatpush.bf16.msra.mxu0 %v5891_v5  ;;  %1031 = vmatpush.bf16.msra.mxu1 %v5892_v17 }
 0x111   :  { %1044 = vmatpush.bf16.msra.mxu2 %v5893_v45  ;;  %1057 = vmatpush.bf16.msra.mxu3 %v5894_v30  ;;  %v5905_v30 = vld [vmem:[#allocation68_spill] sm:$0xff] }
 0x114   :  { %1019 = vmatpush.bf16.msra.mxu0 %v5895_v22  ;;  %1032 = vmatpush.bf16.msra.mxu1 %v5896_v16  ;;  %v5906_v22 = vld [vmem:[#allocation69_spill] sm:$0xff] }
 0x115   :  { %1045 = vmatpush.bf16.msra.mxu2 %v5897_v13  ;;  %1058 = vmatpush.bf16.msra.mxu3 %v5898_v29  ;;  %v172_v29 = vld [vmem:[%s5577_s4] sm:$0xf] }
 0x116   :  { %v4609_v13 = vperm.slane %v172_v29, 0  ;;  %v4617_v17 = vperm.slane %v172_v29, 2 }
 0x118   :  { %1020 = vmatpush.bf16.msra.mxu0 %v5899_v33  ;;  %1033 = vmatpush.bf16.msra.mxu1 %v5900_v34  ;;  %5907 = vst [vmem:[#allocation106_spill] sm:$0xff] %v4609_v13  ;;  %v4611_v33 = vperm.slane %v172_v29, 1  ;;  %v378_v31 = vadd.f32 %v5912_v61, %v4617_v17  ;;  %v5914_v61 = vld [vmem:[#allocation73_spill] sm:$0xff] }
 0x119   :  { %1046 = vmatpush.bf16.msra.mxu2 %v5901_v42  ;;  %1059 = vmatpush.bf16.msra.mxu3 %v5902_v43  ;;  %v5909_v42 = vld [vmem:[#allocation70_spill] sm:$0xff]  ;;  %v5910_v43 = vld [vmem:[#allocation71_spill] sm:$0xff] }
 0x11a   :  { %5908 = vst [vmem:[#allocation107_spill] sm:$0xff] %v4611_v33  ;;  %v352_v34 = vadd.f32 %v5909_v42, %v4609_v13 }
 0x11b   :  { %5911 = vst [vmem:[#allocation70_spill] sm:$0xff] %v4617_v17 }
 0x11c   :  { %1021 = vmatpush.bf16.msra.mxu0 %v5903_v46  ;;  %1034 = vmatpush.bf16.msra.mxu1 %v5904_v1  ;;  %v365_v46 = vadd.f32 %v5910_v43, %v4611_v33 }
 0x11d   :  { %1047 = vmatpush.bf16.msra.mxu2 %v5905_v30  ;;  %1060 = vmatpush.bf16.msra.mxu3 %v5906_v22 }
 0x17b   :  { %v847_v16 = vpop.f32.mrf.mxu0  ;;  %v860_v1 = vpop.f32.mrf.mxu1 }
 0x17c   :  { %v890_v45 = vadd.f32 %v847_v16, %v352_v34  ;;  %v891_v30 = vadd.f32 %v860_v1, %v365_v46  ;;  %v4621_v34 = vperm.slane %v172_v29, 3 }
 0x17e   :  { %v3617_v22 = vmul.f32 -1.442695, %v890_v45  ;;  %v3618_v5 = vmul.f32 -1.442695, %v891_v30  ;;  %5913 = vst [vmem:[#allocation71_spill] sm:$0xff] %v4621_v34 }
 0x180   :  { %3821 = vpow2.f32 %v3617_v22 }
 0x181   :  { %3823 = vpow2.f32 %v3618_v5  ;;  %v391_v5 = vadd.f32 %v5914_v61, %v4621_v34 }
 0x182   :  { %v873_v57 = vpop.f32.mrf.mxu2  ;;  %v886_v32 = vpop.f32.mrf.mxu3 }
 0x183   :  { %v892_v40 = vadd.f32 %v873_v57, %v378_v31  ;;  %v849_v42 = vpop.f32.mrf.mxu0  ;;  %v862_v13 = vpop.f32.mrf.mxu1  ;;  %v893_v31 = vadd.f32 %v886_v32, %v391_v5 }
 0x185   :  { %v3619_v51 = vmul.f32 -1.442695, %v892_v40 }
 0x186   :  { %v3822_v43 = vpop.eup %3821 }
 0x187   :  { %v3824_v33 = vpop.eup %3823  ;;  %v903_v39 = vadd.f32 1.0, %v3822_v43  ;;  %3825 = vpow2.f32 %v3619_v51 }
 0x188   :  { %v904_v16 = vadd.f32 1.0, %v3824_v33 }
 0x189   :  { %3827 = vrcp.f32 %v903_v39  ;;  %v917_v33 = vand.u32 2147483648, %v903_v39  ;;  %vm911_vm14 = vweird.f32 %v903_v39 }
 0x18a   :  { %3829 = vrcp.f32 %v904_v16  ;;  %v875_v45 = vpop.f32.mrf.mxu2  ;;  %v888_v30 = vpop.f32.mrf.mxu3  ;;  %v932_v29 = vand.u32 2147483648, %v904_v16  ;;  %v930_v17 = vand.u32 2147483647, %v904_v16  ;;  %vm926_vm15 = vweird.f32 %v904_v16 }
 0x18b   :  { %v915_v45 = vand.u32 2147483647, %v903_v39 }
 0x18c   :  { %v933_v34 = vor.u32 1.1754944e-38, %v932_v29  ;;  %vm931_vm3 = vcmp.eq.f32.partialorder %v930_v17, 8.507059e+37 }
 0x18d   :  { %v3826_v22 = vpop.eup %3825  ;;  %vm916_vm1 = vcmp.eq.f32.partialorder %v915_v45, 8.507059e+37 }
 0x18e   :  { %v905_v46 = vadd.f32 1.0, %v3826_v22  ;;  %v918_v22 = vor.u32 1.1754944e-38, %v917_v33 }
 0x18f   :  { %v3828_v57 = vpop.eup %3827 }
 0x190   :  { %v3830_v13 = vpop.eup %3829  ;;  %v907_v40 = vmul.f32 %v3828_v57, %v903_v39  ;;  %3831 = vrcp.f32 %v905_v46  ;;  %vm912_vm12 = vweird.f32 %v3828_v57  ;;  %vm941_vm5 = vweird.f32 %v905_v46 }
 0x191   :  { %v922_v1 = vmul.f32 %v3830_v13, %v904_v16  ;;  %3833 = vtanh.f32 %v893_v31  ;;  %vm927_vm13 = vweird.f32 %v3830_v13  ;;  %vm913_vm0 = vmor %vm911_vm14, %vm912_vm12  ;;  %v947_v16 = vand.u32 2147483648, %v905_v46 }
 0x192   :  { %v908_v42 = vsub.f32 1.0, %v907_v40  ;;  %vm928_vm2 = vmor %vm926_vm15, %vm927_vm13 }
 0x193   :  { %v923_v51 = vsub.f32 1.0, %v922_v1  ;;  %v948_v29 = vor.u32 1.1754944e-38, %v947_v16  ;;  %v5932_v16 = vld [vmem:[#allocation93_spill] sm:$0xff] }
 0x194   :  { %v909_v43 = vmul.f32 %v3828_v57, %v908_v42 }
 0x195   :  { %v924_v30 = vmul.f32 %v3830_v13, %v923_v51 }
 0x196   :  { %v3832_v38 = vpop.eup %3831  ;;  %v910_v61 = vadd.f32 %v3828_v57, %v909_v43 }
 0x197   :  { %v937_v32 = vmul.f32 %v3832_v38, %v905_v46  ;;  %v925_v5 = vadd.f32 %v3830_v13, %v924_v30  ;;  %v3834_v31 = vpop.eup %3833  ;;  %vm942_vm4 = vweird.f32 %v3832_v38  ;;  %v5921_v30 = vld [vmem:[#allocation80_spill] sm:$0xff] }
 0x198   :  { %v914_v40 = vsel %vm913_vm0, %v3828_v57, %v910_v61  ;;  %v945_v57 = vand.u32 2147483647, %v905_v46  ;;  %vm943_vm6 = vmor %vm941_vm5, %vm942_vm4  ;;  %v5919_v46 = vld [vmem:[#allocation78_spill] sm:$0xff]  ;;  %v5922_v61 = vld [vmem:[#allocation81_spill] sm:$0xff] }
 0x199   :  { %v938_v1 = vsub.f32 1.0, %v937_v32  ;;  %v919_v42 = vsel %vm916_vm1, %v918_v22, %v914_v40  ;;  %v929_v37 = vsel %vm928_vm2, %v3830_v13, %v925_v5  ;;  %v5923_v32 = vld [vmem:[#allocation82_spill] sm:$0xff]  ;;  %v5924_v22 = vld [vmem:[#allocation83_spill] sm:$0xff]  ;;  %v5925_v5 = vld [vmem:[#allocation84_spill] sm:$0xff] }
 0x19a   :  { %v934_v51 = vsel %vm931_vm3, %v933_v34, %v929_v37  ;;  %v953_v24 = vmul.f32 %v3834_v31, %v919_v42  ;;  %vm946_vm7 = vcmp.eq.f32.partialorder %v945_v57, 8.507059e+37  ;;  %v5918_v34 = vld [vmem:[#allocation77_spill] sm:$0xff]  ;;  %v5927_v31 = vld [vmem:[#allocation86_spill] sm:$0xff]  ;;  %v5929_v42 = vld [vmem:[#allocation88_spill] sm:$0xff] }
 0x19b   :  { %v952_v15 = vmul.f32 0.0, %v934_v51  ;;  %v939_v14 = vmul.f32 %v3832_v38, %v938_v1  ;;  %v5926_v40 = vld [vmem:[#allocation85_spill] sm:$0xff]  ;;  %v5928_v1 = vld [vmem:[#allocation87_spill] sm:$0xff]  ;;  %v5933_v57 = vld [vmem:[#allocation94_spill] sm:$0xff] }
 0x19c   :  { %v5930_v51 = vld [vmem:[#allocation89_spill] sm:$0xff] }
 0x19d   :  { %v4625_v43 = vadd.f32 %v953_v24, %v952_v15  ;;  %v940_v39 = vadd.f32 %v3832_v38, %v939_v14  ;;  %v5915_v15 = vld [vmem:[#allocation74_spill] sm:$0xff]  ;;  %v5916_v14 = vld [vmem:[#allocation75_spill] sm:$0xff]  ;;  %v5917_v24 = vld [vmem:[#allocation76_spill] sm:$0xff] }
 0x19f   :  { %3835 = vtanh.f32 %v4625_v43  ;;  %v944_v33 = vsel %vm943_vm6, %v3832_v38, %v940_v39  ;;  %v5920_v38 = vld [vmem:[#allocation79_spill] sm:$0xff]  ;;  %v5931_v39 = vld [vmem:[#allocation92_spill] sm:$0xff] }
 0x1a0   :  { %v949_v13 = vsel %vm946_vm7, %v948_v29, %v944_v33  ;;  %v5934_v33 = vld [vmem:[#allocation95_spill] sm:$0xff]  ;;  %v5935_v29 = vld [vmem:[#allocation96_spill] sm:$0xff] }
 0x1a5   :  { %v3836_v45 = vpop.eup %3835 }
 0x1a6   :  { %v956_v17 = vmul.f32 %v3836_v45, %v949_v13  ;;  %v5936_v45 = vld [vmem:[#allocation99_spill] sm:$0xff]  ;;  %v5938_v13 = vld [vmem:[#allocation13_spill] sm:$0xff] }
 0x1a8   :  { %v957_v37 = vpack.c.bf16 %v956_v17, %v956_v17  ;;  %v5939_v17 = vld [vmem:[#allocation14_spill] sm:$0xff] }
 0x1aa   :  { %966 = vmatmul.bf16.vlgmr.msrb.gmra.mxu0 %v957_v37  ;;  %979 = vmatmul.bf16.vlgmr.msrb.gmra.mxu1 %v957_v37 }
 0x1ab   :  { %992 = vmatmul.bf16.vlgmr.msrb.gmra.mxu2 %v957_v37  ;;  %1005 = vmatmul.bf16.vlgmr.msrb.gmra.mxu3 %v957_v37  ;;  %v5940_v37 = vld [vmem:[#allocation15_spill] sm:$0xff] }
 0x1ac   :  { %1152 = vmatpush.bf16.msrb.mxu0 %v5915_v15  ;;  %1165 = vmatpush.bf16.msrb.mxu1 %v5916_v14 }
 0x1ad   :  { %1178 = vmatpush.bf16.msrb.mxu2 %v5917_v24  ;;  %1191 = vmatpush.bf16.msrb.mxu3 %v5918_v34 }
 0x1b0   :  { %1153 = vmatpush.bf16.msrb.mxu0 %v5919_v46  ;;  %1166 = vmatpush.bf16.msrb.mxu1 %v5920_v38 }
 0x1b1   :  { %1179 = vmatpush.bf16.msrb.mxu2 %v5921_v30  ;;  %1192 = vmatpush.bf16.msrb.mxu3 %v5922_v61 }
 0x1b4   :  { %1154 = vmatpush.bf16.msrb.mxu0 %v5923_v32  ;;  %1167 = vmatpush.bf16.msrb.mxu1 %v5924_v22 }
 0x1b5   :  { %1180 = vmatpush.bf16.msrb.mxu2 %v5925_v5  ;;  %1193 = vmatpush.bf16.msrb.mxu3 %v5926_v40 }
 0x1b8   :  { %1155 = vmatpush.bf16.msrb.mxu0 %v5927_v31  ;;  %1168 = vmatpush.bf16.msrb.mxu1 %v5928_v1 }
 0x1b9   :  { %1181 = vmatpush.bf16.msrb.mxu2 %v5929_v42  ;;  %1194 = vmatpush.bf16.msrb.mxu3 %v5930_v51 }
 0x1ba   :  { %1022 = vmatmul.bf16.vlgmr.msra.gmra.mxu0 %v4567_v52  ;;  %1035 = vmatmul.bf16.vlgmr.msra.gmra.mxu1 %v4567_v52 }
 0x1bb   :  { %1048 = vmatmul.bf16.vlgmr.msra.gmra.mxu2 %v4567_v52  ;;  %1061 = vmatmul.bf16.vlgmr.msra.gmra.mxu3 %v4567_v52  ;;  %v5937_v52 = vld [vmem:[#allocation16_spill] sm:$0xff] }
 0x1bc   :  { %1156 = vmatpush.bf16.msrb.mxu0 %v4457_v63  ;;  %1169 = vmatpush.bf16.msrb.mxu1 %v4459_v25 }
 0x1bd   :  { %1182 = vmatpush.bf16.msrb.mxu2 %v5931_v39  ;;  %1195 = vmatpush.bf16.msrb.mxu3 %v5932_v16 }
 0x1c0   :  { %1157 = vmatpush.bf16.msrb.mxu0 %v5933_v57  ;;  %1170 = vmatpush.bf16.msrb.mxu1 %v5934_v33 }
 0x1c1   :  { %1183 = vmatpush.bf16.msrb.mxu2 %v5935_v29  ;;  %1196 = vmatpush.bf16.msrb.mxu3 %v4480_v19 }
 0x1c4   :  { %1158 = vmatpush.bf16.msrb.mxu0 %v4483_v36  ;;  %1171 = vmatpush.bf16.msrb.mxu1 %v5936_v45 }
 0x1c5   :  { %1184 = vmatpush.bf16.msrb.mxu2 %v4488_v44  ;;  %1197 = vmatpush.bf16.msrb.mxu3 %v4491_v6 }
 0x1c8   :  { %1159 = vmatpush.bf16.msrb.mxu0 %v4495_v0  ;;  %1172 = vmatpush.bf16.msrb.mxu1 %v4500_v60  ;;  %v5941_v60 = vld [vmem:[#allocation17_spill] sm:$0xff] }
 0x1c9   :  { %1185 = vmatpush.bf16.msrb.mxu2 %v4505_v28  ;;  %1198 = vmatpush.bf16.msrb.mxu3 %v4516_v23  ;;  %v5942_v28 = vld [vmem:[#allocation18_spill] sm:$0xff]  ;;  %v5943_v23 = vld [vmem:[#allocation19_spill] sm:$0xff] }
 0x1cc   :  { %1272 = vmatpush.bf16.msra.mxu0 %v4195_v4  ;;  %1285 = vmatpush.bf16.msra.mxu1 %v4197_v8  ;;  %v5944_v4 = vld [vmem:[#allocation22_spill] sm:$0xff]  ;;  %v5945_v8 = vld [vmem:[#allocation21_spill] sm:$0xff] }
 0x1cd   :  { %1298 = vmatpush.bf16.msra.mxu2 %v4199_v9  ;;  %1311 = vmatpush.bf16.msra.mxu3 %v5937_v52  ;;  %v5946_v9 = vld [vmem:[#allocation23_spill] sm:$0xff] }
 0x1d0   :  { %1273 = vmatpush.bf16.msra.mxu0 %v5938_v13  ;;  %1286 = vmatpush.bf16.msra.mxu1 %v5939_v17 }
 0x1d1   :  { %1299 = vmatpush.bf16.msra.mxu2 %v5940_v37  ;;  %1312 = vmatpush.bf16.msra.mxu3 %v4222_v35 }
 0x1d4   :  { %1274 = vmatpush.bf16.msra.mxu0 %v5941_v60  ;;  %1287 = vmatpush.bf16.msra.mxu1 %v5942_v28 }
 0x1d5   :  { %1300 = vmatpush.bf16.msra.mxu2 %v5943_v23  ;;  %1313 = vmatpush.bf16.msra.mxu3 %v5944_v4 }
 0x1d8   :  { %1275 = vmatpush.bf16.msra.mxu0 %v5945_v8  ;;  %1288 = vmatpush.bf16.msra.mxu1 %v5946_v9 }
 0x1d9   :  { %1301 = vmatpush.bf16.msra.mxu2 %v4234_v47  ;;  %1314 = vmatpush.bf16.msra.mxu3 %v4240_v55 }
 0x1dc   :  { %1276 = vmatpush.bf16.msra.mxu0 %v4238_v54  ;;  %1289 = vmatpush.bf16.msra.mxu1 %v4244_v58 }
 0x1dd   :  { %1302 = vmatpush.bf16.msra.mxu2 %v4246_v59  ;;  %1315 = vmatpush.bf16.msra.mxu3 %v4252_v3 }
 0x1e0   :  { %1277 = vmatpush.bf16.msra.mxu0 %v4250_v2  ;;  %1290 = vmatpush.bf16.msra.mxu1 %v4256_v7 }
 0x1e1   :  { %1303 = vmatpush.bf16.msra.mxu2 %v4258_v10  ;;  %1316 = vmatpush.bf16.msra.mxu3 %v4264_v21 }
 0x1e4   :  { %1278 = vmatpush.bf16.msra.mxu0 %v4262_v20  ;;  %1291 = vmatpush.bf16.msra.mxu1 %v4268_v26 }
 0x1e5   :  { %1304 = vmatpush.bf16.msra.mxu2 %v4270_v27  ;;  %1317 = vmatpush.bf16.msra.mxu3 %v4276_v48 }
 0x1e8   :  { %1279 = vmatpush.bf16.msra.mxu0 %v4274_v41  ;;  %1292 = vmatpush.bf16.msra.mxu1 %v4280_v49  ;;  %v1010_v49 = vld [vmem:[%s5573_s0] sm:$0xc] }
 0x1e9   :  { %1305 = vmatpush.bf16.msra.mxu2 %v4282_v50  ;;  %1318 = vmatpush.bf16.msra.mxu3 %v4292_v11  ;;  %v1011_v11 = vld [vmem:[%s5573_s0 + $0x8] sm:$0xc] }
 0x227   :  { %v4696_v7 = vpop.f32.mrf.mxu0  ;;  %v4698_v10 = vpop.f32.mrf.mxu1 }
 0x22e   :  { %v4700_v21 = vpop.f32.mrf.mxu2  ;;  %v4702_v20 = vpop.f32.mrf.mxu3 }
 0x22f   :  { %v969_v26 = vpop.f32.mrf.mxu0  ;;  %v982_v27 = vpop.f32.mrf.mxu1 }
 0x236   :  { %v995_v2 = vpop.f32.mrf.mxu2  ;;  %v1008_v48 = vpop.f32.mrf.mxu3 }
 0x237   :  { %v1023_v41 = vpop.f32.mrf.mxu0  ;;  %v1036_v50 = vpop.f32.mrf.mxu1  ;;  %v1012_v2 = vld [vmem:[%s5573_s0 + $0x10] sm:$0xc] }
 0x238   :  { %v1070_v3 = vrot.slane %v1023_v41, 6  ;;  %v1071_v59 = vrot.slane %v1036_v50, 6 }
 0x23a   :  { %v1078_v58 = vadd.f32 %v1070_v3, %v1010_v49  ;;  %v1079_v54 = vadd.f32 %v1071_v59, %v1011_v11  ;;  %v1013_v3 = vld [vmem:[%s5573_s0 + $0x18] sm:$0xc] }
 0x23c   :  { %v3620_v55 = vmul.f32 -1.442695, %v1078_v58  ;;  %v3621_v47 = vmul.f32 -1.442695, %v1079_v54 }
 0x23e   :  { %3837 = vpow2.f32 %v3620_v55  ;;  %v1049_v26 = vpop.f32.mrf.mxu2  ;;  %v1062_v27 = vpop.f32.mrf.mxu3 }
 0x23f   :  { %3839 = vpow2.f32 %v3621_v47  ;;  %v1072_v48 = vrot.slane %v1049_v26, 6  ;;  %v1025_v9 = vpop.f32.mrf.mxu0  ;;  %v1038_v8 = vpop.f32.mrf.mxu1  ;;  %v1073_v55 = vrot.slane %v1062_v27, 6 }
 0x241   :  { %v1080_v4 = vadd.f32 %v1072_v48, %v1012_v2  ;;  %v1081_v8 = vadd.f32 %v1073_v55, %v1013_v3 }
 0x243   :  { %v3622_v23 = vmul.f32 -1.442695, %v1080_v4 }
 0x244   :  { %v3838_v28 = vpop.eup %3837 }
 0x245   :  { %v3840_v41 = vpop.eup %3839  ;;  %v1091_v50 = vadd.f32 1.0, %v3838_v28  ;;  %3841 = vpow2.f32 %v3622_v23 }
 0x246   :  { %v1092_v59 = vadd.f32 1.0, %v3840_v41  ;;  %v1051_v58 = vpop.f32.mrf.mxu2  ;;  %v1064_v54 = vpop.f32.mrf.mxu3 }
 0x247   :  { %3843 = vrcp.f32 %v1091_v50  ;;  %v1105_v26 = vand.u32 2147483648, %v1091_v50  ;;  %v1103_v27 = vand.u32 2147483647, %v1091_v50  ;;  %vm1099_vm10 = vweird.f32 %v1091_v50 }
 0x248   :  { %3845 = vrcp.f32 %v1092_v59  ;;  %v1120_v48 = vand.u32 2147483648, %v1092_v59  ;;  %v1118_v54 = vand.u32 2147483647, %v1092_v59  ;;  %vm1114_vm11 = vweird.f32 %v1092_v59 }
 0x249   :  { %v1106_v3 = vor.u32 1.1754944e-38, %v1105_v26  ;;  %vm1104_vm14 = vcmp.eq.f32.partialorder %v1103_v27, 8.507059e+37 }
 0x24a   :  { %vm1119_vm15 = vcmp.eq.f32.partialorder %v1118_v54, 8.507059e+37  ;;  %v5953_v54 = vld [vmem:[#allocation48_spill] sm:$0xff] }
 0x24b   :  { %v3842_v47 = vpop.eup %3841 }
 0x24c   :  { %v1093_v49 = vadd.f32 1.0, %v3842_v47 }
 0x24d   :  { %v3844_v9 = vpop.eup %3843 }
 0x24e   :  { %v3846_v11 = vpop.eup %3845  ;;  %v1095_v4 = vmul.f32 %v3844_v9, %v1091_v50  ;;  %3847 = vrcp.f32 %v1093_v49  ;;  %vm1100_vm8 = vweird.f32 %v3844_v9  ;;  %v1135_v26 = vand.u32 2147483648, %v1093_v49 }
 0x24f   :  { %v1110_v2 = vmul.f32 %v3846_v11, %v1092_v59  ;;  %3849 = vtanh.f32 %v1081_v8  ;;  %vm1115_vm9 = vweird.f32 %v3846_v11  ;;  %vm1101_vm12 = vmor %vm1099_vm10, %vm1100_vm8  ;;  %vm1129_vm1 = vweird.f32 %v1093_v49 }
 0x250   :  { %v1096_v28 = vsub.f32 1.0, %v1095_v4  ;;  %v1141_v4 = vrot.slane %v4549_v18, 6  ;;  %vm1116_vm13 = vmor %vm1114_vm11, %vm1115_vm9  ;;  %v1133_v18 = vand.u32 2147483647, %v1093_v49 }
 0x251   :  { %v1111_v23 = vsub.f32 1.0, %v1110_v2  ;;  %v1121_v2 = vor.u32 1.1754944e-38, %v1120_v48 }
 0x252   :  { %v1097_v41 = vmul.f32 %v3844_v9, %v1096_v28  ;;  %vm1134_vm3 = vcmp.eq.f32.partialorder %v1133_v18, 8.507059e+37  ;;  %v5965_v18 = vld [vmem:[#allocation60_spill] sm:$0xff] }
 0x253   :  { %v1112_v58 = vmul.f32 %v3846_v11, %v1111_v23 }
 0x254   :  { %v3848_v60 = vpop.eup %3847  ;;  %v1098_v35 = vadd.f32 %v3844_v9, %v1097_v41 }
 0x255   :  { %v1125_v55 = vmul.f32 %v3848_v60, %v1093_v49  ;;  %v1113_v47 = vadd.f32 %v3846_v11, %v1112_v58  ;;  %v3850_v28 = vpop.eup %3849  ;;  %vm1130_vm0 = vweird.f32 %v3848_v60  ;;  %v5952_v49 = vld [vmem:[#allocation47_spill] sm:$0xff] }
 0x256   :  { %v1102_v8 = vsel %vm1101_vm12, %v3844_v9, %v1098_v35  ;;  %vm1131_vm2 = vmor %vm1129_vm1, %vm1130_vm0  ;;  %v1136_v9 = vor.u32 1.1754944e-38, %v1135_v26  ;;  %v5964_v26 = vld [vmem:[#allocation59_spill] sm:$0xff] }
 0x257   :  { %v1126_v37 = vsub.f32 1.0, %v1125_v55  ;;  %v1107_v17 = vsel %vm1104_vm14, %v1106_v3, %v1102_v8  ;;  %v1117_v23 = vsel %vm1116_vm13, %v3846_v11, %v1113_v47  ;;  %v5954_v55 = vld [vmem:[#allocation49_spill] sm:$0xff]  ;;  %v5955_v3 = vld [vmem:[#allocation50_spill] sm:$0xff]  ;;  %v5956_v47 = vld [vmem:[#allocation51_spill] sm:$0xff] }
 0x258   :  { %v1122_v13 = vsel %vm1119_vm15, %v1121_v2, %v1117_v23  ;;  %v1144_v52 = vmul.f32 %v3850_v28, %v1107_v17  ;;  %v5958_v2 = vld [vmem:[#allocation53_spill] sm:$0xff]  ;;  %v5959_v8 = vld [vmem:[#allocation54_spill] sm:$0xff]  ;;  %v5960_v28 = vld [vmem:[#allocation55_spill] sm:$0xff] }
 0x259   :  { %v1127_v41 = vmul.f32 %v3848_v60, %v1126_v37  ;;  %v1143_v50 = vmul.f32 %v1141_v4, %v1122_v13  ;;  %v5950_v13 = vld [vmem:[#allocation45_spill] sm:$0xff]  ;;  %v5951_v37 = vld [vmem:[#allocation46_spill] sm:$0xff]  ;;  %v5957_v4 = vld [vmem:[#allocation52_spill] sm:$0xff] }
 0x25a   :  { %v5961_v23 = vld [vmem:[#allocation56_spill] sm:$0xff] }
 0x25b   :  { %v4717_v59 = vadd.f32 %v1144_v52, %v1143_v50  ;;  %v1128_v0 = vadd.f32 %v3848_v60, %v1127_v41  ;;  %v5949_v52 = vld [vmem:[#allocation44_spill] sm:$0xff]  ;;  %v5962_v41 = vld [vmem:[#allocation57_spill] sm:$0xff]  ;;  %v5963_v50 = vld [vmem:[#allocation58_spill] sm:$0xff] }
 0x25d   :  { %3851 = vtanh.f32 %v4717_v59  ;;  %v1132_v35 = vsel %vm1131_vm2, %v3848_v60, %v1128_v0  ;;  %v5947_v0 = vld [vmem:[#allocation42_spill] sm:$0xff]  ;;  %v5948_v60 = vld [vmem:[#allocation43_spill] sm:$0xff] }
 0x25e   :  { %v1137_v11 = vsel %vm1134_vm3, %v1136_v9, %v1132_v35  ;;  %v5966_v35 = vld [vmem:[#allocation61_spill] sm:$0xff]  ;;  %v5967_v9 = vld [vmem:[#allocation62_spill] sm:$0xff] }
 0x263   :  { %v3852_v48 = vpop.eup %3851 }
 0x264   :  { %v1147_v27 = vmul.f32 %v3852_v48, %v1137_v11  ;;  %v5968_v48 = vld [vmem:[#allocation63_spill] sm:$0xff]  ;;  %v5969_v11 = vld [vmem:[#allocation64_spill] sm:$0xff] }
 0x266   :  { %v1148_v58 = vpack.c.bf16 %v1147_v27, %v1147_v27  ;;  %v5970_v27 = vld [vmem:[#allocation65_spill] sm:$0xff] }
 0x268   :  { %v4720_v17 = vrot.slane %v1148_v58, 1  ;;  %v5971_v58 = vld [vmem:[#allocation66_spill] sm:$0xff] }
 0x26a   :  { %1160 = vmatmul.bf16.vlgmr.msrb.gmra.mxu0 %v4720_v17  ;;  %1173 = vmatmul.bf16.vlgmr.msrb.gmra.mxu1 %v4720_v17 }
 0x26b   :  { %1186 = vmatmul.bf16.vlgmr.msrb.gmra.mxu2 %v4720_v17  ;;  %1199 = vmatmul.bf16.vlgmr.msrb.gmra.mxu3 %v4720_v17 }
 0x26c   :  { %1328 = vmatpush.bf16.msrb.mxu0 %v4284_v53  ;;  %1341 = vmatpush.bf16.msrb.mxu1 %v4286_v56 }
 0x26d   :  { %1354 = vmatpush.bf16.msrb.mxu2 %v4288_v62  ;;  %1367 = vmatpush.bf16.msrb.mxu3 %v4296_v12 }
 0x270   :  { %1329 = vmatpush.bf16.msrb.mxu0 %v5947_v0  ;;  %1342 = vmatpush.bf16.msrb.mxu1 %v5948_v60 }
 0x271   :  { %1355 = vmatpush.bf16.msrb.mxu2 %v5949_v52  ;;  %1368 = vmatpush.bf16.msrb.mxu3 %v5950_v13 }
 0x274   :  { %1330 = vmatpush.bf16.msrb.mxu0 %v5951_v37  ;;  %1343 = vmatpush.bf16.msrb.mxu1 %v5952_v49 }
 0x275   :  { %1356 = vmatpush.bf16.msrb.mxu2 %v5953_v54  ;;  %1369 = vmatpush.bf16.msrb.mxu3 %v5954_v55 }
 0x278   :  { %1331 = vmatpush.bf16.msrb.mxu0 %v5955_v3  ;;  %1344 = vmatpush.bf16.msrb.mxu1 %v5956_v47 }
 0x279   :  { %1357 = vmatpush.bf16.msrb.mxu2 %v5957_v4  ;;  %1370 = vmatpush.bf16.msrb.mxu3 %v5958_v2 }
 0x27c   :  { %1332 = vmatpush.bf16.msrb.mxu0 %v5959_v8  ;;  %1345 = vmatpush.bf16.msrb.mxu1 %v5960_v28 }
 0x27d   :  { %1358 = vmatpush.bf16.msrb.mxu2 %v5961_v23  ;;  %1371 = vmatpush.bf16.msrb.mxu3 %v5962_v41  ;;  %v5972_v23 = vld [vmem:[#allocation67_spill] sm:$0xff]  ;;  %v5973_v41 = vld [vmem:[#allocation68_spill] sm:$0xff] }
 0x280   :  { %1333 = vmatpush.bf16.msrb.mxu0 %v5963_v50  ;;  %1346 = vmatpush.bf16.msrb.mxu1 %v5964_v26  ;;  %v5974_v50 = vld [vmem:[#allocation69_spill] sm:$0xff]  ;;  %v5975_v26 = vld [vmem:[#allocation106_spill] sm:$0xff] }
 0x281   :  { %1359 = vmatpush.bf16.msrb.mxu2 %v5965_v18  ;;  %1372 = vmatpush.bf16.msrb.mxu3 %v5966_v35  ;;  %v968_v18 = vadd.f32 %v4696_v7, %v5975_v26  ;;  %v5976_v35 = vld [vmem:[#allocation107_spill] sm:$0xff] }
 0x284   :  { %1334 = vmatpush.bf16.msrb.mxu0 %v5967_v9  ;;  %1347 = vmatpush.bf16.msrb.mxu1 %v5968_v48  ;;  %v981_v9 = vadd.f32 %v4698_v10, %v5976_v35 }
 0x285   :  { %1360 = vmatpush.bf16.msrb.mxu2 %v5969_v11  ;;  %1373 = vmatpush.bf16.msrb.mxu3 %v5970_v27 }
 0x288   :  { %1335 = vmatpush.bf16.msrb.mxu0 %v5971_v58  ;;  %1348 = vmatpush.bf16.msrb.mxu1 %v5972_v23  ;;  %v5977_v58 = vld [vmem:[#allocation70_spill] sm:$0xff] }
 0x289   :  { %1361 = vmatpush.bf16.msrb.mxu2 %v5973_v41  ;;  %1374 = vmatpush.bf16.msrb.mxu3 %v5974_v50  ;;  %v994_v23 = vadd.f32 %v4700_v21, %v5977_v58 }
 0x2e7   :  { %v1161_v28 = vpop.f32.mrf.mxu0  ;;  %v1174_v48 = vpop.f32.mrf.mxu1 }
 0x2e8   :  { %v1204_v8 = vadd.f32 %v1161_v28, %v968_v18  ;;  %v1205_v11 = vadd.f32 %v1174_v48, %v981_v9  ;;  %v5978_v18 = vld [vmem:[#allocation71_spill] sm:$0xff] }
 0x2e9   :  { %v1007_v21 = vadd.f32 %v4702_v20, %v5978_v18 }
 0x2ea   :  { %v3623_v2 = vmul.f32 -1.442695, %v1204_v8  ;;  %v3624_v27 = vmul.f32 -1.442695, %v1205_v11 }
 0x2ec   :  { %3853 = vpow2.f32 %v3623_v2 }
 0x2ed   :  { %3855 = vpow2.f32 %v3624_v27 }
 0x2ee   :  { %v1187_v41 = vpop.f32.mrf.mxu2  ;;  %v1200_v4 = vpop.f32.mrf.mxu3 }
 0x2ef   :  { %v1206_v50 = vadd.f32 %v1187_v41, %v994_v23  ;;  %v1163_v47 = vpop.f32.mrf.mxu0  ;;  %v1176_v3 = vpop.f32.mrf.mxu1  ;;  %v1207_v11 = vadd.f32 %v1200_v4, %v1007_v21 }
 0x2f1   :  { %v3625_v7 = vmul.f32 -1.442695, %v1206_v50 }
 0x2f2   :  { %v3854_v26 = vpop.eup %3853 }
 0x2f3   :  { %v3856_v55 = vpop.eup %3855  ;;  %v1217_v10 = vadd.f32 1.0, %v3854_v26  ;;  %3857 = vpow2.f32 %v3625_v7 }
 0x2f4   :  { %v1218_v35 = vadd.f32 1.0, %v3856_v55 }
 0x2f5   :  { %3859 = vrcp.f32 %v1217_v10  ;;  %v1231_v26 = vand.u32 2147483648, %v1217_v10  ;;  %v1229_v7 = vand.u32 2147483647, %v1217_v10  ;;  %vm1225_vm6 = vweird.f32 %v1217_v10 }
 0x2f6   :  { %3861 = vrcp.f32 %v1218_v35  ;;  %v1189_v8 = vpop.f32.mrf.mxu2  ;;  %v1202_v28 = vpop.f32.mrf.mxu3  ;;  %v1246_v55 = vand.u32 2147483648, %v1218_v35  ;;  %vm1240_vm7 = vweird.f32 %v1218_v35 }
 0x2f7   :  { %v1244_v28 = vand.u32 2147483647, %v1218_v35  ;;  %vm1230_vm10 = vcmp.eq.f32.partialorder %v1229_v7, 8.507059e+37 }
 0x2f9   :  { %v3858_v2 = vpop.eup %3857  ;;  %vm1245_vm11 = vcmp.eq.f32.partialorder %v1244_v28, 8.507059e+37 }
 0x2fa   :  { %v1219_v9 = vadd.f32 1.0, %v3858_v2  ;;  %v1232_v2 = vor.u32 1.1754944e-38, %v1231_v26 }
 0x2fb   :  { %v3860_v48 = vpop.eup %3859 }
 0x2fc   :  { %v3862_v23 = vpop.eup %3861  ;;  %v1221_v47 = vmul.f32 %v3860_v48, %v1217_v10  ;;  %3863 = vrcp.f32 %v1219_v9  ;;  %vm1226_vm4 = vweird.f32 %v3860_v48  ;;  %v1261_v26 = vand.u32 2147483648, %v1219_v9 }
 0x2fd   :  { %v1236_v3 = vmul.f32 %v3862_v23, %v1218_v35  ;;  %3865 = vtanh.f32 %v1207_v11  ;;  %vm1241_vm5 = vweird.f32 %v3862_v23  ;;  %vm1227_vm8 = vmor %vm1225_vm6, %vm1226_vm4  ;;  %vm1255_vm13 = vweird.f32 %v1219_v9 }
 0x2fe   :  { %v1222_v41 = vsub.f32 1.0, %v1221_v47  ;;  %vm1242_vm9 = vmor %vm1240_vm7, %vm1241_vm5  ;;  %v1247_v47 = vor.u32 1.1754944e-38, %v1246_v55  ;;  %v1262_v7 = vor.u32 1.1754944e-38, %v1261_v26  ;;  %v5997_v26 = vld [vmem:[#allocation24_spill] sm:$0xff] }
 0x2ff   :  { %v1237_v50 = vsub.f32 1.0, %v1236_v3 }
 0x300   :  { %v1223_v27 = vmul.f32 %v3860_v48, %v1222_v41 }
 0x301   :  { %v1238_v8 = vmul.f32 %v3862_v23, %v1237_v50 }
 0x302   :  { %v3864_v58 = vpop.eup %3863  ;;  %v1224_v20 = vadd.f32 %v3860_v48, %v1223_v27 }
 0x303   :  { %v1251_v4 = vmul.f32 %v3864_v58, %v1219_v9  ;;  %v1239_v21 = vadd.f32 %v3862_v23, %v1238_v8  ;;  %v3866_v11 = vpop.eup %3865  ;;  %vm1256_vm12 = vweird.f32 %v3864_v58 }
 0x304   :  { %v1228_v3 = vsel %vm1227_vm8, %v3860_v48, %v1224_v20  ;;  %v1259_v48 = vand.u32 2147483647, %v1219_v9  ;;  %vm1257_vm14 = vmor %vm1255_vm13, %vm1256_vm12  ;;  %v5985_v9 = vld [vmem:[#allocation12_spill] sm:$0xff] }
 0x305   :  { %v1252_v18 = vsub.f32 1.0, %v1251_v4  ;;  %v1233_v41 = vsel %vm1230_vm10, %v1232_v2, %v1228_v3  ;;  %v1243_v54 = vsel %vm1242_vm9, %v3862_v23, %v1239_v21  ;;  %v5986_v20 = vld [vmem:[#allocation16_spill] sm:$0xff]  ;;  %v5987_v4 = vld [vmem:[#allocation13_spill] sm:$0xff]  ;;  %v5988_v2 = vld [vmem:[#allocation14_spill] sm:$0xff] }
 0x306   :  { %v1248_v50 = vsel %vm1245_vm11, %v1247_v47, %v1243_v54  ;;  %v1267_v49 = vmul.f32 %v3866_v11, %v1233_v41  ;;  %vm1260_vm15 = vcmp.eq.f32.partialorder %v1259_v48, 8.507059e+37  ;;  %v5989_v21 = vld [vmem:[#allocation15_spill] sm:$0xff]  ;;  %v5990_v47 = vld [vmem:[#allocation20_spill] sm:$0xff]  ;;  %v5991_v3 = vld [vmem:[#allocation17_spill] sm:$0xff] }
 0x307   :  { %v1266_v37 = vmul.f32 %v1248_v50, %v4625_v43  ;;  %v1253_v27 = vmul.f32 %v3864_v58, %v1252_v18  ;;  %v5979_v43 = vld [vmem:[#allocation102_spill] sm:$0xff]  ;;  %v5984_v18 = vld [vmem:[#allocation11_spill] sm:$0xff] }
 0x308   :  { %v5992_v11 = vld [vmem:[#allocation18_spill] sm:$0xff]  ;;  %v5993_v41 = vld [vmem:[#allocation19_spill] sm:$0xff] }
 0x309   :  { %v4767_v10 = vadd.f32 %v1267_v49, %v1266_v37  ;;  %v1254_v35 = vadd.f32 %v3864_v58, %v1253_v27  ;;  %v5981_v37 = vld [vmem:[#allocation104_spill] sm:$0xff]  ;;  %v5982_v49 = vld [vmem:[#allocation105_spill] sm:$0xff]  ;;  %v5994_v50 = vld [vmem:[#allocation22_spill] sm:$0xff] }
 0x30a   :  { %v5995_v27 = vld [vmem:[#allocation21_spill] sm:$0xff]  ;;  %v5998_v48 = vld [vmem:[#allocation26_spill] sm:$0xff] }
 0x30b   :  { %3867 = vtanh.f32 %v4767_v10  ;;  %v1258_v55 = vsel %vm1257_vm14, %v3864_v58, %v1254_v35  ;;  %v5983_v58 = vld [vmem:[#allocation10_spill] sm:$0xff]  ;;  %v5996_v35 = vld [vmem:[#allocation23_spill] sm:$0xff] }
 0x30c   :  { %v1263_v8 = vsel %vm1260_vm15, %v1262_v7, %v1258_v55  ;;  %v5999_v55 = vld [vmem:[#allocation25_spill] sm:$0xff]  ;;  %v6000_v7 = vld [vmem:[#allocation27_spill] sm:$0xff] }
 0x311   :  { %v3868_v23 = vpop.eup %3867 }
 0x312   :  { %v1270_v54 = vmul.f32 %v3868_v23, %v1263_v8  ;;  %v6001_v23 = vld [vmem:[#allocation28_spill] sm:$0xff]  ;;  %v6002_v8 = vld [vmem:[#allocation30_spill] sm:$0xff] }
 0x314   :  { %v1271_v28 = vpack.c.bf16 %v1270_v54, %v1270_v54  ;;  %v6003_v54 = vld [vmem:[#allocation29_spill] sm:$0xff] }
 0x316   :  { %1280 = vmatmul.bf16.vlgmr.msra.gmra.mxu0 %v1271_v28  ;;  %1293 = vmatmul.bf16.vlgmr.msra.gmra.mxu1 %v1271_v28 }
 0x317   :  { %1306 = vmatmul.bf16.vlgmr.msra.gmra.mxu2 %v1271_v28  ;;  %1319 = vmatmul.bf16.vlgmr.msra.gmra.mxu3 %v1271_v28  ;;  %v6004_v28 = vld [vmem:[#allocation31_spill] sm:$0xff] }
 0x318   :  { %1466 = vmatpush.bf16.msra.mxu0 %v5915_v15  ;;  %1479 = vmatpush.bf16.msra.mxu1 %v5916_v14 }
 0x319   :  { %1492 = vmatpush.bf16.msra.mxu2 %v5917_v24  ;;  %1505 = vmatpush.bf16.msra.mxu3 %v5918_v34 }
 0x31c   :  { %1467 = vmatpush.bf16.msra.mxu0 %v5919_v46  ;;  %1480 = vmatpush.bf16.msra.mxu1 %v5920_v38 }
 0x31d   :  { %1493 = vmatpush.bf16.msra.mxu2 %v5921_v30  ;;  %1506 = vmatpush.bf16.msra.mxu3 %v5922_v61 }
 0x320   :  { %1468 = vmatpush.bf16.msra.mxu0 %v5923_v32  ;;  %1481 = vmatpush.bf16.msra.mxu1 %v5924_v22 }
 0x321   :  { %1494 = vmatpush.bf16.msra.mxu2 %v5925_v5  ;;  %1507 = vmatpush.bf16.msra.mxu3 %v5926_v40 }
 0x324   :  { %1469 = vmatpush.bf16.msra.mxu0 %v5927_v31  ;;  %1482 = vmatpush.bf16.msra.mxu1 %v5928_v1 }
 0x325   :  { %1495 = vmatpush.bf16.msra.mxu2 %v5929_v42  ;;  %1508 = vmatpush.bf16.msra.mxu3 %v5930_v51 }
 0x326   :  { %1336 = vmatmul.bf16.vlgmr.msrb.gmra.mxu0 %v4720_v17  ;;  %1349 = vmatmul.bf16.vlgmr.msrb.gmra.mxu1 %v4720_v17 }
 0x327   :  { %1362 = vmatmul.bf16.vlgmr.msrb.gmra.mxu2 %v4720_v17  ;;  %1375 = vmatmul.bf16.vlgmr.msrb.gmra.mxu3 %v4720_v17  ;;  %v5980_v17 = vld [vmem:[#allocation103_spill] sm:$0xff] }
 0x328   :  { %1470 = vmatpush.bf16.msra.mxu0 %v4457_v63  ;;  %1483 = vmatpush.bf16.msra.mxu1 %v4459_v25 }
 0x329   :  { %1496 = vmatpush.bf16.msra.mxu2 %v5931_v39  ;;  %1509 = vmatpush.bf16.msra.mxu3 %v5932_v16 }
 0x32c   :  { %1471 = vmatpush.bf16.msra.mxu0 %v5933_v57  ;;  %1484 = vmatpush.bf16.msra.mxu1 %v5934_v33 }
 0x32d   :  { %1497 = vmatpush.bf16.msra.mxu2 %v5935_v29  ;;  %1510 = vmatpush.bf16.msra.mxu3 %v4480_v19 }
 0x330   :  { %1472 = vmatpush.bf16.msra.mxu0 %v4483_v36  ;;  %1485 = vmatpush.bf16.msra.mxu1 %v5936_v45 }
 0x331   :  { %1498 = vmatpush.bf16.msra.mxu2 %v4488_v44  ;;  %1511 = vmatpush.bf16.msra.mxu3 %v4491_v6 }
 0x334   :  { %1473 = vmatpush.bf16.msra.mxu0 %v5979_v43  ;;  %1486 = vmatpush.bf16.msra.mxu1 %v5980_v17 }
 0x335   :  { %1499 = vmatpush.bf16.msra.mxu2 %v5981_v37  ;;  %1512 = vmatpush.bf16.msra.mxu3 %v5982_v49 }
 0x338   :  { %1586 = vmatpush.bf16.msrb.mxu0 %v5983_v58  ;;  %1599 = vmatpush.bf16.msrb.mxu1 %v5984_v18 }
 0x339   :  { %1612 = vmatpush.bf16.msrb.mxu2 %v5985_v9  ;;  %1625 = vmatpush.bf16.msrb.mxu3 %v5986_v20 }
 0x33c   :  { %1587 = vmatpush.bf16.msrb.mxu0 %v5987_v4  ;;  %1600 = vmatpush.bf16.msrb.mxu1 %v5988_v2 }
 0x33d   :  { %1613 = vmatpush.bf16.msrb.mxu2 %v5989_v21  ;;  %1626 = vmatpush.bf16.msrb.mxu3 %v5990_v47 }
 0x340   :  { %1588 = vmatpush.bf16.msrb.mxu0 %v5991_v3  ;;  %1601 = vmatpush.bf16.msrb.mxu1 %v5992_v11 }
 0x341   :  { %1614 = vmatpush.bf16.msrb.mxu2 %v5993_v41  ;;  %1627 = vmatpush.bf16.msrb.mxu3 %v5994_v50  ;;  %v6005_v50 = vld [vmem:[#allocation32_spill] sm:$0xff] }
 0x344   :  { %1589 = vmatpush.bf16.msrb.mxu0 %v5995_v27  ;;  %1602 = vmatpush.bf16.msrb.mxu1 %v5996_v35  ;;  %v6006_v27 = vld [vmem:[#allocation34_spill] sm:$0xff]  ;;  %v6007_v35 = vld [vmem:[#allocation33_spill] sm:$0xff] }
 0x345   :  { %1615 = vmatpush.bf16.msrb.mxu2 %v5997_v26  ;;  %1628 = vmatpush.bf16.msrb.mxu3 %v5998_v48  ;;  %v6008_v26 = vld [vmem:[#allocation35_spill] sm:$0xff]  ;;  %v6009_v48 = vld [vmem:[#allocation36_spill] sm:$0xff] }
 0x348   :  { %1590 = vmatpush.bf16.msrb.mxu0 %v5999_v55  ;;  %1603 = vmatpush.bf16.msrb.mxu1 %v6000_v7  ;;  %v6010_v55 = vld [vmem:[#allocation38_spill] sm:$0xff]  ;;  %v6011_v7 = vld [vmem:[#allocation37_spill] sm:$0xff] }
 0x349   :  { %1616 = vmatpush.bf16.msrb.mxu2 %v6001_v23  ;;  %1629 = vmatpush.bf16.msrb.mxu3 %v6002_v8  ;;  %v6012_v23 = vld [vmem:[#allocation39_spill] sm:$0xff]  ;;  %v6013_v8 = vld [vmem:[#allocation40_spill] sm:$0xff] }
 0x34c   :  { %1591 = vmatpush.bf16.msrb.mxu0 %v6003_v54  ;;  %1604 = vmatpush.bf16.msrb.mxu1 %v6004_v28  ;;  %v6014_v54 = vld [vmem:[#allocation41_spill] sm:$0xff] }
 0x34d   :  { %1617 = vmatpush.bf16.msrb.mxu2 %v6005_v50  ;;  %1630 = vmatpush.bf16.msrb.mxu3 %v6006_v27 }
 0x350   :  { %1592 = vmatpush.bf16.msrb.mxu0 %v6007_v35  ;;  %1605 = vmatpush.bf16.msrb.mxu1 %v6008_v26 }
 0x351   :  { %1618 = vmatpush.bf16.msrb.mxu2 %v6009_v48  ;;  %1631 = vmatpush.bf16.msrb.mxu3 %v6010_v55 }
 0x354   :  { %1593 = vmatpush.bf16.msrb.mxu0 %v6011_v7  ;;  %1606 = vmatpush.bf16.msrb.mxu1 %v6012_v23  ;;  %v1324_v23 = vld [vmem:[%s5573_s0] sm:$0x30] }
 0x355   :  { %1619 = vmatpush.bf16.msrb.mxu2 %v6013_v8  ;;  %1632 = vmatpush.bf16.msrb.mxu3 %v6014_v54  ;;  %v1325_v54 = vld [vmem:[%s5573_s0 + $0x8] sm:$0x30] }
 0x393   :  { %v4838_v28 = vpop.f32.mrf.mxu0  ;;  %v4840_v50 = vpop.f32.mrf.mxu1 }
 0x39a   :  { %v4842_v27 = vpop.f32.mrf.mxu2  ;;  %v4844_v35 = vpop.f32.mrf.mxu3 }
 0x39b   :  { %v1283_v26 = vpop.f32.mrf.mxu0  ;;  %v1296_v48 = vpop.f32.mrf.mxu1 }
 0x3a2   :  { %v1309_v41 = vpop.f32.mrf.mxu2  ;;  %v1322_v55 = vpop.f32.mrf.mxu3 }
 0x3a3   :  { %v1337_v7 = vpop.f32.mrf.mxu0  ;;  %v1350_v8 = vpop.f32.mrf.mxu1  ;;  %v1326_v41 = vld [vmem:[%s5573_s0 + $0x10] sm:$0x30] }
 0x3a4   :  { %v1384_v11 = vrot.slane %v1337_v7, 4  ;;  %v1385_v3 = vrot.slane %v1350_v8, 4 }
 0x3a6   :  { %v1392_v47 = vadd.f32 %v1384_v11, %v1324_v23  ;;  %v1393_v21 = vadd.f32 %v1385_v3, %v1325_v54  ;;  %v1327_v11 = vld [vmem:[%s5573_s0 + $0x18] sm:$0x30] }
 0x3a8   :  { %v3626_v2 = vmul.f32 -1.442695, %v1392_v47  ;;  %v3627_v4 = vmul.f32 -1.442695, %v1393_v21 }
 0x3aa   :  { %3869 = vpow2.f32 %v3626_v2  ;;  %v1363_v26 = vpop.f32.mrf.mxu2  ;;  %v1376_v48 = vpop.f32.mrf.mxu3 }
 0x3ab   :  { %3871 = vpow2.f32 %v3627_v4  ;;  %v1386_v55 = vrot.slane %v1363_v26, 4  ;;  %v1339_v20 = vpop.f32.mrf.mxu0  ;;  %v1352_v9 = vpop.f32.mrf.mxu1  ;;  %v1387_v2 = vrot.slane %v1376_v48, 4 }
 0x3ad   :  { %v1394_v18 = vadd.f32 %v1386_v55, %v1326_v41  ;;  %v1395_v9 = vadd.f32 %v1387_v2, %v1327_v11 }
 0x3af   :  { %v3628_v58 = vmul.f32 -1.442695, %v1394_v18 }
 0x3b0   :  { %v3870_v49 = vpop.eup %3869 }
 0x3b1   :  { %v3872_v7 = vpop.eup %3871  ;;  %v1405_v8 = vadd.f32 1.0, %v3870_v49  ;;  %3873 = vpow2.f32 %v3628_v58 }
 0x3b2   :  { %v1406_v3 = vadd.f32 1.0, %v3872_v7  ;;  %v1365_v47 = vpop.f32.mrf.mxu2  ;;  %v1378_v21 = vpop.f32.mrf.mxu3 }
 0x3b3   :  { %3875 = vrcp.f32 %v1405_v8  ;;  %v1419_v26 = vand.u32 2147483648, %v1405_v8  ;;  %v1417_v48 = vand.u32 2147483647, %v1405_v8  ;;  %vm1413_vm2 = vweird.f32 %v1405_v8 }
 0x3b4   :  { %3877 = vrcp.f32 %v1406_v3  ;;  %v1434_v55 = vand.u32 2147483648, %v1406_v3  ;;  %v1432_v21 = vand.u32 2147483647, %v1406_v3  ;;  %vm1428_vm3 = vweird.f32 %v1406_v3 }
 0x3b5   :  { %v1420_v11 = vor.u32 1.1754944e-38, %v1419_v26  ;;  %vm1418_vm6 = vcmp.eq.f32.partialorder %v1417_v48, 8.507059e+37 }
 0x3b6   :  { %vm1433_vm7 = vcmp.eq.f32.partialorder %v1432_v21, 8.507059e+37  ;;  %v6021_v21 = vld [vmem:[#allocation52_spill] sm:$0xff] }
 0x3b7   :  { %v3874_v4 = vpop.eup %3873 }
 0x3b8   :  { %v1407_v23 = vadd.f32 1.0, %v3874_v4 }
 0x3b9   :  { %v3876_v20 = vpop.eup %3875 }
 0x3ba   :  { %v3878_v54 = vpop.eup %3877  ;;  %v1409_v18 = vmul.f32 %v3876_v20, %v1405_v8  ;;  %3879 = vrcp.f32 %v1407_v23  ;;  %vm1414_vm0 = vweird.f32 %v3876_v20  ;;  %v1449_v26 = vand.u32 2147483648, %v1407_v23 }
 0x3bb   :  { %v1424_v41 = vmul.f32 %v3878_v54, %v1406_v3  ;;  %3881 = vtanh.f32 %v1395_v9  ;;  %vm1429_vm1 = vweird.f32 %v3878_v54  ;;  %vm1415_vm4 = vmor %vm1413_vm2, %vm1414_vm0  ;;  %vm1443_vm9 = vweird.f32 %v1407_v23 }
 0x3bc   :  { %v1410_v49 = vsub.f32 1.0, %v1409_v18  ;;  %v1455_v18 = vrot.slane %v4717_v59, 6  ;;  %vm1430_vm5 = vmor %vm1428_vm3, %vm1429_vm1  ;;  %v1447_v59 = vand.u32 2147483647, %v1407_v23 }
 0x3bd   :  { %v1425_v58 = vsub.f32 1.0, %v1424_v41  ;;  %v1435_v41 = vor.u32 1.1754944e-38, %v1434_v55 }
 0x3be   :  { %v1411_v7 = vmul.f32 %v3876_v20, %v1410_v49  ;;  %vm1448_vm11 = vcmp.eq.f32.partialorder %v1447_v59, 8.507059e+37  ;;  %v6033_v59 = vld [vmem:[#allocation64_spill] sm:$0xff] }
 0x3bf   :  { %v1426_v47 = vmul.f32 %v3878_v54, %v1425_v58 }
 0x3c0   :  { %v3880_v37 = vpop.eup %3879  ;;  %v1412_v17 = vadd.f32 %v3876_v20, %v1411_v7 }
 0x3c1   :  { %v1439_v2 = vmul.f32 %v3880_v37, %v1407_v23  ;;  %v1427_v4 = vadd.f32 %v3878_v54, %v1426_v47  ;;  %v3882_v49 = vpop.eup %3881  ;;  %vm1444_vm8 = vweird.f32 %v3880_v37  ;;  %v6020_v23 = vld [vmem:[#allocation51_spill] sm:$0xff] }
 0x3c2   :  { %v1416_v9 = vsel %vm1415_vm4, %v3876_v20, %v1412_v17  ;;  %vm1445_vm10 = vmor %vm1443_vm9, %vm1444_vm8  ;;  %v1450_v20 = vor.u32 1.1754944e-38, %v1449_v26  ;;  %v6032_v26 = vld [vmem:[#allocation63_spill] sm:$0xff] }
 0x3c3   :  { %v1440_v43 = vsub.f32 1.0, %v1439_v2  ;;  %v1421_v6 = vsel %vm1418_vm6, %v1420_v11, %v1416_v9  ;;  %v1431_v58 = vsel %vm1430_vm5, %v3878_v54, %v1427_v4  ;;  %v6022_v2 = vld [vmem:[#allocation53_spill] sm:$0xff]  ;;  %v6023_v11 = vld [vmem:[#allocation54_spill] sm:$0xff]  ;;  %v6024_v4 = vld [vmem:[#allocation55_spill] sm:$0xff] }
 0x3c4   :  { %v1436_v44 = vsel %vm1433_vm7, %v1435_v41, %v1431_v58  ;;  %v1458_v45 = vmul.f32 %v3882_v49, %v1421_v6  ;;  %v6026_v41 = vld [vmem:[#allocation57_spill] sm:$0xff]  ;;  %v6027_v9 = vld [vmem:[#allocation58_spill] sm:$0xff]  ;;  %v6028_v49 = vld [vmem:[#allocation59_spill] sm:$0xff] }
 0x3c5   :  { %v1441_v7 = vmul.f32 %v3880_v37, %v1440_v43  ;;  %v1457_v8 = vmul.f32 %v1455_v18, %v1436_v44  ;;  %v6016_v44 = vld [vmem:[#allocation47_spill] sm:$0xff]  ;;  %v6018_v43 = vld [vmem:[#allocation49_spill] sm:$0xff]  ;;  %v6025_v18 = vld [vmem:[#allocation56_spill] sm:$0xff] }
 0x3c6   :  { %v6029_v58 = vld [vmem:[#allocation60_spill] sm:$0xff] }
 0x3c7   :  { %v4859_v3 = vadd.f32 %v1458_v45, %v1457_v8  ;;  %v1442_v36 = vadd.f32 %v3880_v37, %v1441_v7  ;;  %v6017_v45 = vld [vmem:[#allocation48_spill] sm:$0xff]  ;;  %v6030_v7 = vld [vmem:[#allocation61_spill] sm:$0xff]  ;;  %v6031_v8 = vld [vmem:[#allocation62_spill] sm:$0xff] }
 0x3c9   :  { %3883 = vtanh.f32 %v4859_v3  ;;  %v1446_v17 = vsel %vm1445_vm10, %v3880_v37, %v1442_v36  ;;  %v6015_v36 = vld [vmem:[#allocation46_spill] sm:$0xff] }
 0x3ca   :  { %v1451_v54 = vsel %vm1448_vm11, %v1450_v20, %v1446_v17  ;;  %v6019_v37 = vld [vmem:[#allocation50_spill] sm:$0xff]  ;;  %v6034_v17 = vld [vmem:[#allocation65_spill] sm:$0xff] }
 0x3cb   :  { %v6035_v20 = vld [vmem:[#allocation66_spill] sm:$0xff] }
 0x3cf   :  { %v3884_v55 = vpop.eup %3883 }
 0x3d0   :  { %v1461_v48 = vmul.f32 %v3884_v55, %v1451_v54  ;;  %v6036_v55 = vld [vmem:[#allocation67_spill] sm:$0xff]  ;;  %v6037_v54 = vld [vmem:[#allocation68_spill] sm:$0xff] }
 0x3d2   :  { %v1462_v47 = vpack.c.bf16 %v1461_v48, %v1461_v48  ;;  %v6038_v48 = vld [vmem:[#allocation69_spill] sm:$0xff] }
 0x3d4   :  { %v4862_v6 = vrot.slane %v1462_v47, 2  ;;  %v6039_v47 = vld [vmem:[#allocation106_spill] sm:$0xff] }
 0x3d6   :  { %1474 = vmatmul.bf16.vlgmr.msra.gmra.mxu0 %v4862_v6  ;;  %1487 = vmatmul.bf16.vlgmr.msra.gmra.mxu1 %v4862_v6 }
 0x3d7   :  { %1500 = vmatmul.bf16.vlgmr.msra.gmra.mxu2 %v4862_v6  ;;  %1513 = vmatmul.bf16.vlgmr.msra.gmra.mxu3 %v4862_v6 }
 0x3d8   :  { %1642 = vmatpush.bf16.msra.mxu0 %v4284_v53  ;;  %1655 = vmatpush.bf16.msra.mxu1 %v4286_v56 }
 0x3d9   :  { %1668 = vmatpush.bf16.msra.mxu2 %v4288_v62  ;;  %1681 = vmatpush.bf16.msra.mxu3 %v4296_v12 }
 0x3dc   :  { %1643 = vmatpush.bf16.msra.mxu0 %v5947_v0  ;;  %1656 = vmatpush.bf16.msra.mxu1 %v5948_v60 }
 0x3dd   :  { %1669 = vmatpush.bf16.msra.mxu2 %v5949_v52  ;;  %1682 = vmatpush.bf16.msra.mxu3 %v5950_v13 }
 0x3e0   :  { %1644 = vmatpush.bf16.msra.mxu0 %v6015_v36  ;;  %1657 = vmatpush.bf16.msra.mxu1 %v6016_v44 }
 0x3e1   :  { %1670 = vmatpush.bf16.msra.mxu2 %v6017_v45  ;;  %1683 = vmatpush.bf16.msra.mxu3 %v6018_v43 }
 0x3e4   :  { %1645 = vmatpush.bf16.msra.mxu0 %v6019_v37  ;;  %1658 = vmatpush.bf16.msra.mxu1 %v6020_v23 }
 0x3e5   :  { %1671 = vmatpush.bf16.msra.mxu2 %v6021_v21  ;;  %1684 = vmatpush.bf16.msra.mxu3 %v6022_v2 }
 0x3e8   :  { %1646 = vmatpush.bf16.msra.mxu0 %v6023_v11  ;;  %1659 = vmatpush.bf16.msra.mxu1 %v6024_v4 }
 0x3e9   :  { %1672 = vmatpush.bf16.msra.mxu2 %v6025_v18  ;;  %1685 = vmatpush.bf16.msra.mxu3 %v6026_v41 }
 0x3ec   :  { %1647 = vmatpush.bf16.msra.mxu0 %v6027_v9  ;;  %1660 = vmatpush.bf16.msra.mxu1 %v6028_v49 }
 0x3ed   :  { %1673 = vmatpush.bf16.msra.mxu2 %v6029_v58  ;;  %1686 = vmatpush.bf16.msra.mxu3 %v6030_v7  ;;  %v1282_v58 = vadd.f32 %v4838_v28, %v6039_v47  ;;  %v6040_v7 = vld [vmem:[#allocation107_spill] sm:$0xff] }
 0x3f0   :  { %1648 = vmatpush.bf16.msra.mxu0 %v6031_v8  ;;  %1661 = vmatpush.bf16.msra.mxu1 %v6032_v26  ;;  %v1295_v8 = vadd.f32 %v4840_v50, %v6040_v7 }
 0x3f1   :  { %1674 = vmatpush.bf16.msra.mxu2 %v6033_v59  ;;  %1687 = vmatpush.bf16.msra.mxu3 %v6034_v17 }
 0x3f4   :  { %1649 = vmatpush.bf16.msra.mxu0 %v6035_v20  ;;  %1662 = vmatpush.bf16.msra.mxu1 %v6036_v55  ;;  %v6041_v20 = vld [vmem:[#allocation70_spill] sm:$0xff] }
 0x3f5   :  { %1675 = vmatpush.bf16.msra.mxu2 %v6037_v54  ;;  %1688 = vmatpush.bf16.msra.mxu3 %v6038_v48  ;;  %v1308_v55 = vadd.f32 %v4842_v27, %v6041_v20 }
 0x453   :  { %v1475_v49 = vpop.f32.mrf.mxu0  ;;  %v1488_v26 = vpop.f32.mrf.mxu1 }
 0x454   :  { %v1518_v9 = vadd.f32 %v1475_v49, %v1282_v58  ;;  %v1519_v59 = vadd.f32 %v1488_v26, %v1295_v8  ;;  %v6042_v58 = vld [vmem:[#allocation71_spill] sm:$0xff] }
 0x455   :  { %v1321_v27 = vadd.f32 %v4844_v35, %v6042_v58 }
 0x456   :  { %v3629_v41 = vmul.f32 -1.442695, %v1518_v9  ;;  %v3630_v17 = vmul.f32 -1.442695, %v1519_v59 }
 0x458   :  { %3885 = vpow2.f32 %v3629_v41 }
 0x459   :  { %3887 = vpow2.f32 %v3630_v17 }
 0x45a   :  { %v1501_v54 = vpop.f32.mrf.mxu2  ;;  %v1514_v18 = vpop.f32.mrf.mxu3 }
 0x45b   :  { %v1520_v48 = vadd.f32 %v1501_v54, %v1308_v55  ;;  %v1477_v4 = vpop.f32.mrf.mxu0  ;;  %v1490_v11 = vpop.f32.mrf.mxu1  ;;  %v1521_v59 = vadd.f32 %v1514_v18, %v1321_v27 }
 0x45d   :  { %v3631_v28 = vmul.f32 -1.442695, %v1520_v48 }
 0x45e   :  { %v3886_v47 = vpop.eup %3885 }
 0x45f   :  { %v3888_v2 = vpop.eup %3887  ;;  %v1531_v50 = vadd.f32 1.0, %v3886_v47  ;;  %3889 = vpow2.f32 %v3631_v28 }
 0x460   :  { %v1532_v7 = vadd.f32 1.0, %v3888_v2 }
 0x461   :  { %3891 = vrcp.f32 %v1531_v50  ;;  %v1545_v48 = vand.u32 2147483648, %v1531_v50  ;;  %v1543_v28 = vand.u32 2147483647, %v1531_v50  ;;  %vm1539_vm14 = vweird.f32 %v1531_v50 }
 0x462   :  { %3893 = vrcp.f32 %v1532_v7  ;;  %v1503_v9 = vpop.f32.mrf.mxu2  ;;  %v1516_v49 = vpop.f32.mrf.mxu3  ;;  %v1560_v2 = vand.u32 2147483648, %v1532_v7  ;;  %vm1554_vm15 = vweird.f32 %v1532_v7 }
 0x463   :  { %v1558_v49 = vand.u32 2147483647, %v1532_v7  ;;  %vm1544_vm2 = vcmp.eq.f32.partialorder %v1543_v28, 8.507059e+37 }
 0x465   :  { %v3890_v41 = vpop.eup %3889  ;;  %vm1559_vm3 = vcmp.eq.f32.partialorder %v1558_v49, 8.507059e+37 }
 0x466   :  { %v1533_v8 = vadd.f32 1.0, %v3890_v41  ;;  %v1546_v41 = vor.u32 1.1754944e-38, %v1545_v48 }
 0x467   :  { %v3892_v26 = vpop.eup %3891 }
 0x468   :  { %v3894_v17 = vpop.eup %3893  ;;  %v1535_v4 = vmul.f32 %v3892_v26, %v1531_v50  ;;  %3895 = vrcp.f32 %v1533_v8  ;;  %vm1540_vm12 = vweird.f32 %v3892_v26  ;;  %v1575_v48 = vand.u32 2147483648, %v1533_v8 }
 0x469   :  { %v1550_v11 = vmul.f32 %v3894_v17, %v1532_v7  ;;  %3897 = vtanh.f32 %v1521_v59  ;;  %vm1555_vm13 = vweird.f32 %v3894_v17  ;;  %vm1541_vm0 = vmor %vm1539_vm14, %vm1540_vm12  ;;  %vm1569_vm5 = vweird.f32 %v1533_v8 }
 0x46a   :  { %v1536_v55 = vsub.f32 1.0, %v1535_v4  ;;  %vm1556_vm1 = vmor %vm1554_vm15, %vm1555_vm13  ;;  %v1561_v4 = vor.u32 1.1754944e-38, %v1560_v2  ;;  %v1576_v28 = vor.u32 1.1754944e-38, %v1575_v48  ;;  %v6061_v48 = vld [vmem:[#allocation19_spill] sm:$0xff] }
 0x46b   :  { %v1551_v54 = vsub.f32 1.0, %v1550_v11 }
 0x46c   :  { %v1537_v47 = vmul.f32 %v3892_v26, %v1536_v55 }
 0x46d   :  { %v1552_v9 = vmul.f32 %v3894_v17, %v1551_v54 }
 0x46e   :  { %v3896_v20 = vpop.eup %3895  ;;  %v1538_v35 = vadd.f32 %v3892_v26, %v1537_v47 }
 0x46f   :  { %v1565_v18 = vmul.f32 %v3896_v20, %v1533_v8  ;;  %v1553_v27 = vadd.f32 %v3894_v17, %v1552_v9  ;;  %v3898_v59 = vpop.eup %3897  ;;  %vm1570_vm4 = vweird.f32 %v3896_v20 }
 0x470   :  { %v1542_v11 = vsel %vm1541_vm0, %v3892_v26, %v1538_v35  ;;  %v1573_v26 = vand.u32 2147483647, %v1533_v8  ;;  %vm1571_vm6 = vmor %vm1569_vm5, %vm1570_vm4  ;;  %v6049_v8 = vld [vmem:[#allocation104_spill] sm:$0xff]  ;;  %v6050_v35 = vld [vmem:[#allocation105_spill] sm:$0xff] }
 0x471   :  { %v1566_v58 = vsub.f32 1.0, %v1565_v18  ;;  %v1547_v55 = vsel %vm1544_vm2, %v1546_v41, %v1542_v11  ;;  %v1557_v21 = vsel %vm1556_vm1, %v3894_v17, %v1553_v27  ;;  %v6051_v18 = vld [vmem:[#allocation10_spill] sm:$0xff]  ;;  %v6052_v41 = vld [vmem:[#allocation11_spill] sm:$0xff]  ;;  %v6053_v27 = vld [vmem:[#allocation12_spill] sm:$0xff] }
 0x472   :  { %v1562_v54 = vsel %vm1559_vm3, %v1561_v4, %v1557_v21  ;;  %v1581_v23 = vmul.f32 %v3898_v59, %v1547_v55  ;;  %vm1574_vm7 = vcmp.eq.f32.partialorder %v1573_v26, 8.507059e+37  ;;  %v6054_v4 = vld [vmem:[#allocation16_spill] sm:$0xff]  ;;  %v6055_v11 = vld [vmem:[#allocation13_spill] sm:$0xff]  ;;  %v6056_v59 = vld [vmem:[#allocation14_spill] sm:$0xff] }
 0x473   :  { %v1580_v37 = vmul.f32 %v1562_v54, %v4767_v10  ;;  %v1567_v47 = vmul.f32 %v3896_v20, %v1566_v58  ;;  %v6043_v10 = vld [vmem:[#allocation98_spill] sm:$0xff]  ;;  %v6048_v58 = vld [vmem:[#allocation103_spill] sm:$0xff]  ;;  %v6058_v54 = vld [vmem:[#allocation20_spill] sm:$0xff] }
 0x474   :  { %v6057_v55 = vld [vmem:[#allocation15_spill] sm:$0xff]  ;;  %v6062_v26 = vld [vmem:[#allocation22_spill] sm:$0xff] }
 0x475   :  { %v4909_v50 = vadd.f32 %v1581_v23, %v1580_v37  ;;  %v1568_v7 = vadd.f32 %v3896_v20, %v1567_v47  ;;  %v6044_v37 = vld [vmem:[#allocation99_spill] sm:$0xff]  ;;  %v6046_v23 = vld [vmem:[#allocation101_spill] sm:$0xff] }
 0x476   :  { %v6059_v47 = vld [vmem:[#allocation17_spill] sm:$0xff] }
 0x477   :  { %3899 = vtanh.f32 %v4909_v50  ;;  %v1572_v2 = vsel %vm1571_vm6, %v3896_v20, %v1568_v7  ;;  %v6047_v20 = vld [vmem:[#allocation102_spill] sm:$0xff] }
 0x478   :  { %v1577_v9 = vsel %vm1574_vm7, %v1576_v28, %v1572_v2  ;;  %v6060_v7 = vld [vmem:[#allocation18_spill] sm:$0xff]  ;;  %v6063_v2 = vld [vmem:[#allocation21_spill] sm:$0xff]  ;;  %v6064_v28 = vld [vmem:[#allocation23_spill] sm:$0xff] }
 0x47d   :  { %v3900_v17 = vpop.eup %3899 }
 0x47e   :  { %v1584_v21 = vmul.f32 %v3900_v17, %v1577_v9  ;;  %v6065_v17 = vld [vmem:[#allocation24_spill] sm:$0xff]  ;;  %v6066_v9 = vld [vmem:[#allocation26_spill] sm:$0xff] }
 0x480   :  { %v1585_v49 = vpack.c.bf16 %v1584_v21, %v1584_v21  ;;  %v6067_v21 = vld [vmem:[#allocation25_spill] sm:$0xff] }
 0x482   :  { %1594 = vmatmul.bf16.vlgmr.msrb.gmra.mxu0 %v1585_v49  ;;  %1607 = vmatmul.bf16.vlgmr.msrb.gmra.mxu1 %v1585_v49 }
 0x483   :  { %1620 = vmatmul.bf16.vlgmr.msrb.gmra.mxu2 %v1585_v49  ;;  %1633 = vmatmul.bf16.vlgmr.msrb.gmra.mxu3 %v1585_v49  ;;  %v6068_v49 = vld [vmem:[#allocation27_spill] sm:$0xff] }
 0x484   :  { %1780 = vmatpush.bf16.msrb.mxu0 %v5915_v15  ;;  %1793 = vmatpush.bf16.msrb.mxu1 %v5916_v14 }
 0x485   :  { %1806 = vmatpush.bf16.msrb.mxu2 %v5917_v24  ;;  %1819 = vmatpush.bf16.msrb.mxu3 %v5918_v34 }
 0x488   :  { %1781 = vmatpush.bf16.msrb.mxu0 %v5919_v46  ;;  %1794 = vmatpush.bf16.msrb.mxu1 %v5920_v38 }
 0x489   :  { %1807 = vmatpush.bf16.msrb.mxu2 %v5921_v30  ;;  %1820 = vmatpush.bf16.msrb.mxu3 %v5922_v61 }
 0x48c   :  { %1782 = vmatpush.bf16.msrb.mxu0 %v5923_v32  ;;  %1795 = vmatpush.bf16.msrb.mxu1 %v5924_v22 }
 0x48d   :  { %1808 = vmatpush.bf16.msrb.mxu2 %v5925_v5  ;;  %1821 = vmatpush.bf16.msrb.mxu3 %v5926_v40 }
 0x490   :  { %1783 = vmatpush.bf16.msrb.mxu0 %v5927_v31  ;;  %1796 = vmatpush.bf16.msrb.mxu1 %v5928_v1 }
 0x491   :  { %1809 = vmatpush.bf16.msrb.mxu2 %v5929_v42  ;;  %1822 = vmatpush.bf16.msrb.mxu3 %v5930_v51 }
 0x492   :  { %1650 = vmatmul.bf16.vlgmr.msra.gmra.mxu0 %v4862_v6  ;;  %1663 = vmatmul.bf16.vlgmr.msra.gmra.mxu1 %v4862_v6 }
 0x493   :  { %1676 = vmatmul.bf16.vlgmr.msra.gmra.mxu2 %v4862_v6  ;;  %1689 = vmatmul.bf16.vlgmr.msra.gmra.mxu3 %v4862_v6  ;;  %v6045_v6 = vld [vmem:[#allocation100_spill] sm:$0xff] }
 0x494   :  { %1784 = vmatpush.bf16.msrb.mxu0 %v4457_v63  ;;  %1797 = vmatpush.bf16.msrb.mxu1 %v4459_v25 }
 0x495   :  { %1810 = vmatpush.bf16.msrb.mxu2 %v5931_v39  ;;  %1823 = vmatpush.bf16.msrb.mxu3 %v5932_v16 }
 0x498   :  { %1785 = vmatpush.bf16.msrb.mxu0 %v5933_v57  ;;  %1798 = vmatpush.bf16.msrb.mxu1 %v5934_v33 }
 0x499   :  { %1811 = vmatpush.bf16.msrb.mxu2 %v5935_v29  ;;  %1824 = vmatpush.bf16.msrb.mxu3 %v4480_v19 }
 0x49c   :  { %1786 = vmatpush.bf16.msrb.mxu0 %v6043_v10  ;;  %1799 = vmatpush.bf16.msrb.mxu1 %v6044_v37 }
 0x49d   :  { %1812 = vmatpush.bf16.msrb.mxu2 %v6045_v6  ;;  %1825 = vmatpush.bf16.msrb.mxu3 %v6046_v23 }
 0x4a0   :  { %1787 = vmatpush.bf16.msrb.mxu0 %v6047_v20  ;;  %1800 = vmatpush.bf16.msrb.mxu1 %v6048_v58 }
 0x4a1   :  { %1813 = vmatpush.bf16.msrb.mxu2 %v6049_v8  ;;  %1826 = vmatpush.bf16.msrb.mxu3 %v6050_v35 }
 0x4a4   :  { %1900 = vmatpush.bf16.msra.mxu0 %v6051_v18  ;;  %1913 = vmatpush.bf16.msra.mxu1 %v6052_v41 }
 0x4a5   :  { %1926 = vmatpush.bf16.msra.mxu2 %v6053_v27  ;;  %1939 = vmatpush.bf16.msra.mxu3 %v6054_v4 }
 0x4a8   :  { %1901 = vmatpush.bf16.msra.mxu0 %v6055_v11  ;;  %1914 = vmatpush.bf16.msra.mxu1 %v6056_v59 }
 0x4a9   :  { %1927 = vmatpush.bf16.msra.mxu2 %v6057_v55  ;;  %1940 = vmatpush.bf16.msra.mxu3 %v6058_v54  ;;  %v6069_v54 = vld [vmem:[#allocation28_spill] sm:$0xff] }
 0x4ac   :  { %1902 = vmatpush.bf16.msra.mxu0 %v6059_v47  ;;  %1915 = vmatpush.bf16.msra.mxu1 %v6060_v7  ;;  %v6070_v47 = vld [vmem:[#allocation30_spill] sm:$0xff]  ;;  %v6071_v7 = vld [vmem:[#allocation29_spill] sm:$0xff] }
 0x4ad   :  { %1928 = vmatpush.bf16.msra.mxu2 %v6061_v48  ;;  %1941 = vmatpush.bf16.msra.mxu3 %v6062_v26  ;;  %v6072_v48 = vld [vmem:[#allocation31_spill] sm:$0xff]  ;;  %v6073_v26 = vld [vmem:[#allocation32_spill] sm:$0xff] }
 0x4b0   :  { %1903 = vmatpush.bf16.msra.mxu0 %v6063_v2  ;;  %1916 = vmatpush.bf16.msra.mxu1 %v6064_v28  ;;  %v6074_v2 = vld [vmem:[#allocation34_spill] sm:$0xff]  ;;  %v6075_v28 = vld [vmem:[#allocation33_spill] sm:$0xff] }
 0x4b1   :  { %1929 = vmatpush.bf16.msra.mxu2 %v6065_v17  ;;  %1942 = vmatpush.bf16.msra.mxu3 %v6066_v9  ;;  %v6076_v17 = vld [vmem:[#allocation35_spill] sm:$0xff]  ;;  %v6077_v9 = vld [vmem:[#allocation36_spill] sm:$0xff] }
 0x4b4   :  { %1904 = vmatpush.bf16.msra.mxu0 %v6067_v21  ;;  %1917 = vmatpush.bf16.msra.mxu1 %v6068_v49  ;;  %v6078_v21 = vld [vmem:[#allocation38_spill] sm:$0xff]  ;;  %v6079_v49 = vld [vmem:[#allocation37_spill] sm:$0xff] }
 0x4b5   :  { %1930 = vmatpush.bf16.msra.mxu2 %v6069_v54  ;;  %1943 = vmatpush.bf16.msra.mxu3 %v6070_v47  ;;  %v6080_v54 = vld [vmem:[#allocation39_spill] sm:$0xff]  ;;  %v6081_v47 = vld [vmem:[#allocation40_spill] sm:$0xff] }
 0x4b8   :  { %1905 = vmatpush.bf16.msra.mxu0 %v6071_v7  ;;  %1918 = vmatpush.bf16.msra.mxu1 %v6072_v48  ;;  %v6082_v7 = vld [vmem:[#allocation41_spill] sm:$0xff] }
 0x4b9   :  { %1931 = vmatpush.bf16.msra.mxu2 %v6073_v26  ;;  %1944 = vmatpush.bf16.msra.mxu3 %v6074_v2 }
 0x4bc   :  { %1906 = vmatpush.bf16.msra.mxu0 %v6075_v28  ;;  %1919 = vmatpush.bf16.msra.mxu1 %v6076_v17 }
 0x4bd   :  { %1932 = vmatpush.bf16.msra.mxu2 %v6077_v9  ;;  %1945 = vmatpush.bf16.msra.mxu3 %v6078_v21 }
 0x4c0   :  { %1907 = vmatpush.bf16.msra.mxu0 %v6079_v49  ;;  %1920 = vmatpush.bf16.msra.mxu1 %v6080_v54  ;;  %v1638_v54 = vld [vmem:[%s5573_s0] sm:$0xc0] }
 0x4c1   :  { %1933 = vmatpush.bf16.msra.mxu2 %v6081_v47  ;;  %1946 = vmatpush.bf16.msra.mxu3 %v6082_v7  ;;  %v1639_v7 = vld [vmem:[%s5573_s0 + $0x8] sm:$0xc0] }
 0x4ff   :  { %v4980_v48 = vpop.f32.mrf.mxu0  ;;  %v4982_v26 = vpop.f32.mrf.mxu1 }
 0x506   :  { %v4984_v2 = vpop.f32.mrf.mxu2  ;;  %v4986_v28 = vpop.f32.mrf.mxu3 }
 0x507   :  { %v1597_v17 = vpop.f32.mrf.mxu0  ;;  %v1610_v9 = vpop.f32.mrf.mxu1 }
 0x50e   :  { %v1623_v55 = vpop.f32.mrf.mxu2  ;;  %v1636_v21 = vpop.f32.mrf.mxu3 }
 0x50f   :  { %v1651_v49 = vpop.f32.mrf.mxu0  ;;  %v1664_v47 = vpop.f32.mrf.mxu1  ;;  %v1640_v55 = vld [vmem:[%s5573_s0 + $0x10] sm:$0xc0] }
 0x510   :  { %v1698_v59 = vrot.slane %v1651_v49, 2  ;;  %v1699_v11 = vrot.slane %v1664_v47, 2 }
 0x512   :  { %v1706_v4 = vadd.f32 %v1698_v59, %v1638_v54  ;;  %v1707_v27 = vadd.f32 %v1699_v11, %v1639_v7  ;;  %v1641_v59 = vld [vmem:[%s5573_s0 + $0x18] sm:$0xc0] }
 0x514   :  { %v3632_v41 = vmul.f32 -1.442695, %v1706_v4  ;;  %v3633_v18 = vmul.f32 -1.442695, %v1707_v27 }
 0x516   :  { %3901 = vpow2.f32 %v3632_v41  ;;  %v1677_v17 = vpop.f32.mrf.mxu2  ;;  %v1690_v9 = vpop.f32.mrf.mxu3 }
 0x517   :  { %3903 = vpow2.f32 %v3633_v18  ;;  %v1700_v21 = vrot.slane %v1677_v17, 2  ;;  %v1653_v35 = vpop.f32.mrf.mxu0  ;;  %v1666_v8 = vpop.f32.mrf.mxu1  ;;  %v1701_v41 = vrot.slane %v1690_v9, 2 }
 0x519   :  { %v1708_v58 = vadd.f32 %v1700_v21, %v1640_v55  ;;  %v1709_v8 = vadd.f32 %v1701_v41, %v1641_v59 }
 0x51b   :  { %v3634_v20 = vmul.f32 -1.442695, %v1708_v58 }
 0x51c   :  { %v3902_v23 = vpop.eup %3901 }
 0x51d   :  { %v3904_v49 = vpop.eup %3903  ;;  %v1719_v47 = vadd.f32 1.0, %v3902_v23  ;;  %3905 = vpow2.f32 %v3634_v20 }
 0x51e   :  { %v1720_v11 = vadd.f32 1.0, %v3904_v49  ;;  %v1679_v4 = vpop.f32.mrf.mxu2  ;;  %v1692_v27 = vpop.f32.mrf.mxu3 }
 0x51f   :  { %3907 = vrcp.f32 %v1719_v47  ;;  %v1733_v17 = vand.u32 2147483648, %v1719_v47  ;;  %v1731_v9 = vand.u32 2147483647, %v1719_v47  ;;  %vm1727_vm10 = vweird.f32 %v1719_v47 }
 0x520   :  { %3909 = vrcp.f32 %v1720_v11  ;;  %v1748_v21 = vand.u32 2147483648, %v1720_v11  ;;  %v1746_v27 = vand.u32 2147483647, %v1720_v11  ;;  %vm1742_vm11 = vweird.f32 %v1720_v11 }
 0x521   :  { %v1734_v59 = vor.u32 1.1754944e-38, %v1733_v17  ;;  %vm1732_vm14 = vcmp.eq.f32.partialorder %v1731_v9, 8.507059e+37 }
 0x522   :  { %vm1747_vm15 = vcmp.eq.f32.partialorder %v1746_v27, 8.507059e+37  ;;  %v6089_v27 = vld [vmem:[#allocation56_spill] sm:$0xff] }
 0x523   :  { %v3906_v18 = vpop.eup %3905 }
 0x524   :  { %v1721_v54 = vadd.f32 1.0, %v3906_v18 }
 0x525   :  { %v3908_v35 = vpop.eup %3907 }
 0x526   :  { %v3910_v7 = vpop.eup %3909  ;;  %v1723_v58 = vmul.f32 %v3908_v35, %v1719_v47  ;;  %3911 = vrcp.f32 %v1721_v54  ;;  %vm1728_vm8 = vweird.f32 %v3908_v35  ;;  %v1763_v17 = vand.u32 2147483648, %v1721_v54 }
 0x527   :  { %v1738_v55 = vmul.f32 %v3910_v7, %v1720_v11  ;;  %3913 = vtanh.f32 %v1709_v8  ;;  %vm1743_vm9 = vweird.f32 %v3910_v7  ;;  %vm1729_vm12 = vmor %vm1727_vm10, %vm1728_vm8  ;;  %vm1757_vm1 = vweird.f32 %v1721_v54 }
 0x528   :  { %v1724_v23 = vsub.f32 1.0, %v1723_v58  ;;  %v1769_v58 = vrot.slane %v4859_v3, 6  ;;  %vm1744_vm13 = vmor %vm1742_vm11, %vm1743_vm9  ;;  %v1761_v3 = vand.u32 2147483647, %v1721_v54 }
 0x529   :  { %v1739_v20 = vsub.f32 1.0, %v1738_v55  ;;  %v1749_v55 = vor.u32 1.1754944e-38, %v1748_v21 }
 0x52a   :  { %v1725_v49 = vmul.f32 %v3908_v35, %v1724_v23  ;;  %vm1762_vm3 = vcmp.eq.f32.partialorder %v1761_v3, 8.507059e+37  ;;  %v6101_v3 = vld [vmem:[#allocation68_spill] sm:$0xff] }
 0x52b   :  { %v1740_v4 = vmul.f32 %v3910_v7, %v1739_v20 }
 0x52c   :  { %v3912_v6 = vpop.eup %3911  ;;  %v1726_v37 = vadd.f32 %v3908_v35, %v1725_v49 }
 0x52d   :  { %v1753_v41 = vmul.f32 %v3912_v6, %v1721_v54  ;;  %v1741_v18 = vadd.f32 %v3910_v7, %v1740_v4  ;;  %v3914_v23 = vpop.eup %3913  ;;  %vm1758_vm0 = vweird.f32 %v3912_v6  ;;  %v6088_v54 = vld [vmem:[#allocation55_spill] sm:$0xff] }
 0x52e   :  { %v1730_v8 = vsel %vm1729_vm12, %v3908_v35, %v1726_v37  ;;  %vm1759_vm2 = vmor %vm1757_vm1, %vm1758_vm0  ;;  %v1764_v35 = vor.u32 1.1754944e-38, %v1763_v17  ;;  %v6100_v17 = vld [vmem:[#allocation67_spill] sm:$0xff] }
 0x52f   :  { %v1754_v10 = vsub.f32 1.0, %v1753_v41  ;;  %v1735_v19 = vsel %vm1732_vm14, %v1734_v59, %v1730_v8  ;;  %v1745_v20 = vsel %vm1744_vm13, %v3910_v7, %v1741_v18  ;;  %v6090_v41 = vld [vmem:[#allocation57_spill] sm:$0xff]  ;;  %v6091_v59 = vld [vmem:[#allocation58_spill] sm:$0xff]  ;;  %v6092_v18 = vld [vmem:[#allocation59_spill] sm:$0xff] }
 0x530   :  { %v1750_v29 = vsel %vm1747_vm15, %v1749_v55, %v1745_v20  ;;  %v1772_v33 = vmul.f32 %v3914_v23, %v1735_v19  ;;  %v6094_v55 = vld [vmem:[#allocation61_spill] sm:$0xff]  ;;  %v6095_v8 = vld [vmem:[#allocation62_spill] sm:$0xff]  ;;  %v6096_v23 = vld [vmem:[#allocation63_spill] sm:$0xff] }
 0x531   :  { %v1755_v49 = vmul.f32 %v3912_v6, %v1754_v10  ;;  %v1771_v47 = vmul.f32 %v1769_v58, %v1750_v29  ;;  %v6085_v29 = vld [vmem:[#allocation52_spill] sm:$0xff]  ;;  %v6086_v10 = vld [vmem:[#allocation53_spill] sm:$0xff] }
 0x532   :  { %v6093_v58 = vld [vmem:[#allocation60_spill] sm:$0xff] }
 0x533   :  { %v5001_v11 = vadd.f32 %v1772_v33, %v1771_v47  ;;  %v1756_v57 = vadd.f32 %v3912_v6, %v1755_v49  ;;  %v6084_v33 = vld [vmem:[#allocation51_spill] sm:$0xff]  ;;  %v6097_v20 = vld [vmem:[#allocation64_spill] sm:$0xff]  ;;  %v6098_v49 = vld [vmem:[#allocation65_spill] sm:$0xff] }
 0x534   :  { %v6099_v47 = vld [vmem:[#allocation66_spill] sm:$0xff] }
 0x535   :  { %3915 = vtanh.f32 %v5001_v11  ;;  %v1760_v37 = vsel %vm1759_vm2, %v3912_v6, %v1756_v57  ;;  %v6083_v57 = vld [vmem:[#allocation50_spill] sm:$0xff] }
 0x536   :  { %v1765_v7 = vsel %vm1762_vm3, %v1764_v35, %v1760_v37  ;;  %v6087_v6 = vld [vmem:[#allocation54_spill] sm:$0xff]  ;;  %v6102_v37 = vld [vmem:[#allocation69_spill] sm:$0xff] }
 0x537   :  { %v6103_v35 = vld [vmem:[#allocation106_spill] sm:$0xff] }
 0x53b   :  { %v3916_v21 = vpop.eup %3915 }
 0x53c   :  { %v1775_v9 = vmul.f32 %v3916_v21, %v1765_v7  ;;  %v1596_v21 = vadd.f32 %v4980_v48, %v6103_v35  ;;  %v6104_v7 = vld [vmem:[#allocation107_spill] sm:$0xff] }
 0x53e   :  { %v1776_v4 = vpack.c.bf16 %v1775_v9, %v1775_v9  ;;  %v1609_v9 = vadd.f32 %v4982_v26, %v6104_v7 }
 0x540   :  { %v5004_v19 = vrot.slane %v1776_v4, 3 }
 0x542   :  { %1788 = vmatmul.bf16.vlgmr.msrb.gmra.mxu0 %v5004_v19  ;;  %1801 = vmatmul.bf16.vlgmr.msrb.gmra.mxu1 %v5004_v19 }
 0x543   :  { %1814 = vmatmul.bf16.vlgmr.msrb.gmra.mxu2 %v5004_v19  ;;  %1827 = vmatmul.bf16.vlgmr.msrb.gmra.mxu3 %v5004_v19 }
 0x544   :  { %1956 = vmatpush.bf16.msrb.mxu0 %v4284_v53  ;;  %1969 = vmatpush.bf16.msrb.mxu1 %v4286_v56 }
 0x545   :  { %1982 = vmatpush.bf16.msrb.mxu2 %v4288_v62  ;;  %1995 = vmatpush.bf16.msrb.mxu3 %v4296_v12 }
 0x548   :  { %1957 = vmatpush.bf16.msrb.mxu0 %v5947_v0  ;;  %1970 = vmatpush.bf16.msrb.mxu1 %v5948_v60 }
 0x549   :  { %1983 = vmatpush.bf16.msrb.mxu2 %v5949_v52  ;;  %1996 = vmatpush.bf16.msrb.mxu3 %v5950_v13 }
 0x54c   :  { %1958 = vmatpush.bf16.msrb.mxu0 %v6015_v36  ;;  %1971 = vmatpush.bf16.msrb.mxu1 %v6016_v44 }
 0x54d   :  { %1984 = vmatpush.bf16.msrb.mxu2 %v6017_v45  ;;  %1997 = vmatpush.bf16.msrb.mxu3 %v6018_v43 }
 0x550   :  { %1959 = vmatpush.bf16.msrb.mxu0 %v6083_v57  ;;  %1972 = vmatpush.bf16.msrb.mxu1 %v6084_v33 }
 0x551   :  { %1985 = vmatpush.bf16.msrb.mxu2 %v6085_v29  ;;  %1998 = vmatpush.bf16.msrb.mxu3 %v6086_v10 }
 0x554   :  { %1960 = vmatpush.bf16.msrb.mxu0 %v6087_v6  ;;  %1973 = vmatpush.bf16.msrb.mxu1 %v6088_v54 }
 0x555   :  { %1986 = vmatpush.bf16.msrb.mxu2 %v6089_v27  ;;  %1999 = vmatpush.bf16.msrb.mxu3 %v6090_v41 }
 0x558   :  { %1961 = vmatpush.bf16.msrb.mxu0 %v6091_v59  ;;  %1974 = vmatpush.bf16.msrb.mxu1 %v6092_v18 }
 0x559   :  { %1987 = vmatpush.bf16.msrb.mxu2 %v6093_v58  ;;  %2000 = vmatpush.bf16.msrb.mxu3 %v6094_v55 }
 0x55c   :  { %1962 = vmatpush.bf16.msrb.mxu0 %v6095_v8  ;;  %1975 = vmatpush.bf16.msrb.mxu1 %v6096_v23 }
 0x55d   :  { %1988 = vmatpush.bf16.msrb.mxu2 %v6097_v20  ;;  %2001 = vmatpush.bf16.msrb.mxu3 %v6098_v49 }
 0x560   :  { %1963 = vmatpush.bf16.msrb.mxu0 %v6099_v47  ;;  %1976 = vmatpush.bf16.msrb.mxu1 %v6100_v17  ;;  %v6105_v47 = vld [vmem:[#allocation70_spill] sm:$0xff] }
 0x561   :  { %1989 = vmatpush.bf16.msrb.mxu2 %v6101_v3  ;;  %2002 = vmatpush.bf16.msrb.mxu3 %v6102_v37  ;;  %v1622_v17 = vadd.f32 %v4984_v2, %v6105_v47 }
 0x5bf   :  { %v1789_v4 = vpop.f32.mrf.mxu0  ;;  %v1802_v23 = vpop.f32.mrf.mxu1 }
 0x5c0   :  { %v1832_v8 = vadd.f32 %v1789_v4, %v1596_v21  ;;  %v1833_v20 = vadd.f32 %v1802_v23, %v1609_v9 }
 0x5c2   :  { %v3635_v55 = vmul.f32 -1.442695, %v1832_v8  ;;  %v3636_v49 = vmul.f32 -1.442695, %v1833_v20  ;;  %v6106_v20 = vld [vmem:[#allocation71_spill] sm:$0xff] }
 0x5c3   :  { %v1635_v2 = vadd.f32 %v4986_v28, %v6106_v20 }
 0x5c4   :  { %3917 = vpow2.f32 %v3635_v55 }
 0x5c5   :  { %3919 = vpow2.f32 %v3636_v49 }
 0x5c6   :  { %v1815_v3 = vpop.f32.mrf.mxu2  ;;  %v1828_v58 = vpop.f32.mrf.mxu3 }
 0x5c7   :  { %v1834_v37 = vadd.f32 %v1815_v3, %v1622_v17  ;;  %v1791_v18 = vpop.f32.mrf.mxu0  ;;  %v1804_v59 = vpop.f32.mrf.mxu1  ;;  %v1835_v9 = vadd.f32 %v1828_v58, %v1635_v2 }
 0x5c9   :  { %v3637_v48 = vmul.f32 -1.442695, %v1834_v37 }
 0x5ca   :  { %v3918_v35 = vpop.eup %3917 }
 0x5cb   :  { %v3920_v41 = vpop.eup %3919  ;;  %v1845_v26 = vadd.f32 1.0, %v3918_v35  ;;  %3921 = vpow2.f32 %v3637_v48 }
 0x5cc   :  { %v1846_v7 = vadd.f32 1.0, %v3920_v41 }
 0x5cd   :  { %3923 = vrcp.f32 %v1845_v26  ;;  %v1859_v35 = vand.u32 2147483648, %v1845_v26  ;;  %v1857_v48 = vand.u32 2147483647, %v1845_v26  ;;  %vm1853_vm6 = vweird.f32 %v1845_v26 }
 0x5ce   :  { %3925 = vrcp.f32 %v1846_v7  ;;  %v1817_v8 = vpop.f32.mrf.mxu2  ;;  %v1830_v23 = vpop.f32.mrf.mxu3  ;;  %v1874_v41 = vand.u32 2147483648, %v1846_v7  ;;  %vm1868_vm7 = vweird.f32 %v1846_v7 }
 0x5cf   :  { %v1872_v23 = vand.u32 2147483647, %v1846_v7  ;;  %vm1858_vm10 = vcmp.eq.f32.partialorder %v1857_v48, 8.507059e+37 }
 0x5d1   :  { %v3922_v55 = vpop.eup %3921  ;;  %vm1873_vm11 = vcmp.eq.f32.partialorder %v1872_v23, 8.507059e+37 }
 0x5d2   :  { %v1847_v49 = vadd.f32 1.0, %v3922_v55  ;;  %v1860_v55 = vor.u32 1.1754944e-38, %v1859_v35 }
 0x5d3   :  { %v3924_v21 = vpop.eup %3923 }
 0x5d4   :  { %v3926_v17 = vpop.eup %3925  ;;  %v1849_v18 = vmul.f32 %v3924_v21, %v1845_v26  ;;  %3927 = vrcp.f32 %v1847_v49  ;;  %vm1854_vm4 = vweird.f32 %v3924_v21  ;;  %v1889_v35 = vand.u32 2147483648, %v1847_v49 }
 0x5d5   :  { %v1864_v59 = vmul.f32 %v3926_v17, %v1846_v7  ;;  %3929 = vtanh.f32 %v1835_v9  ;;  %vm1869_vm5 = vweird.f32 %v3926_v17  ;;  %vm1855_vm8 = vmor %vm1853_vm6, %vm1854_vm4  ;;  %vm1883_vm13 = vweird.f32 %v1847_v49 }
 0x5d6   :  { %v1850_v3 = vsub.f32 1.0, %v1849_v18  ;;  %vm1870_vm9 = vmor %vm1868_vm7, %vm1869_vm5  ;;  %v1875_v18 = vor.u32 1.1754944e-38, %v1874_v41  ;;  %v1890_v48 = vor.u32 1.1754944e-38, %v1889_v35  ;;  %v6125_v35 = vld [vmem:[#allocation15_spill] sm:$0xff] }
 0x5d7   :  { %v1865_v37 = vsub.f32 1.0, %v1864_v59 }
 0x5d8   :  { %v1851_v4 = vmul.f32 %v3924_v21, %v1850_v3 }
 0x5d9   :  { %v1866_v8 = vmul.f32 %v3926_v17, %v1865_v37 }
 0x5da   :  { %v3928_v47 = vpop.eup %3927  ;;  %v1852_v28 = vadd.f32 %v3924_v21, %v1851_v4 }
 0x5db   :  { %v1879_v58 = vmul.f32 %v3928_v47, %v1847_v49  ;;  %v1867_v2 = vadd.f32 %v3926_v17, %v1866_v8  ;;  %v3930_v9 = vpop.eup %3929  ;;  %vm1884_vm12 = vweird.f32 %v3928_v47 }
 0x5dc   :  { %v1856_v59 = vsel %vm1855_vm8, %v3924_v21, %v1852_v28  ;;  %v1887_v21 = vand.u32 2147483647, %v1847_v49  ;;  %vm1885_vm14 = vmor %vm1883_vm13, %vm1884_vm12  ;;  %v6112_v49 = vld [vmem:[#allocation99_spill] sm:$0xff]  ;;  %v6114_v28 = vld [vmem:[#allocation101_spill] sm:$0xff] }
 0x5dd   :  { %v1880_v20 = vsub.f32 1.0, %v1879_v58  ;;  %v1861_v3 = vsel %vm1858_vm10, %v1860_v55, %v1856_v59  ;;  %v1871_v27 = vsel %vm1870_vm9, %v3926_v17, %v1867_v2  ;;  %v6115_v58 = vld [vmem:[#allocation102_spill] sm:$0xff]  ;;  %v6116_v55 = vld [vmem:[#allocation103_spill] sm:$0xff]  ;;  %v6117_v2 = vld [vmem:[#allocation104_spill] sm:$0xff] }
 0x5de   :  { %v1876_v37 = vsel %vm1873_vm11, %v1875_v18, %v1871_v27  ;;  %v1895_v54 = vmul.f32 %v3930_v9, %v1861_v3  ;;  %vm1888_vm15 = vcmp.eq.f32.partialorder %v1887_v21, 8.507059e+37  ;;  %v6118_v18 = vld [vmem:[#allocation105_spill] sm:$0xff]  ;;  %v6119_v59 = vld [vmem:[#allocation10_spill] sm:$0xff]  ;;  %v6120_v9 = vld [vmem:[#allocation11_spill] sm:$0xff] }
 0x5df   :  { %v1881_v6 = vmul.f32 %v3928_v47, %v1880_v20  ;;  %v1894_v4 = vmul.f32 %v1876_v37, %v4909_v50  ;;  %v6107_v50 = vld [vmem:[#allocation94_spill] sm:$0xff]  ;;  %v6121_v3 = vld [vmem:[#allocation12_spill] sm:$0xff] }
 0x5e0   :  { %v6111_v20 = vld [vmem:[#allocation98_spill] sm:$0xff]  ;;  %v6122_v37 = vld [vmem:[#allocation16_spill] sm:$0xff] }
 0x5e1   :  { %v5051_v26 = vadd.f32 %v1895_v54, %v1894_v4  ;;  %v1882_v7 = vadd.f32 %v3928_v47, %v1881_v6  ;;  %v6108_v6 = vld [vmem:[#allocation95_spill] sm:$0xff]  ;;  %v6109_v54 = vld [vmem:[#allocation96_spill] sm:$0xff]  ;;  %v6123_v4 = vld [vmem:[#allocation13_spill] sm:$0xff] }
 0x5e2   :  { %v6126_v21 = vld [vmem:[#allocation20_spill] sm:$0xff] }
 0x5e3   :  { %3931 = vtanh.f32 %v5051_v26  ;;  %v1886_v41 = vsel %vm1885_vm14, %v3928_v47, %v1882_v7  ;;  %v6110_v47 = vld [vmem:[#allocation97_spill] sm:$0xff]  ;;  %v6124_v7 = vld [vmem:[#allocation14_spill] sm:$0xff] }
 0x5e4   :  { %v1891_v8 = vsel %vm1888_vm15, %v1890_v48, %v1886_v41  ;;  %v6127_v41 = vld [vmem:[#allocation17_spill] sm:$0xff]  ;;  %v6128_v48 = vld [vmem:[#allocation18_spill] sm:$0xff] }
 0x5e9   :  { %v3932_v17 = vpop.eup %3931 }
 0x5ea   :  { %v1898_v27 = vmul.f32 %v3932_v17, %v1891_v8  ;;  %v6129_v17 = vld [vmem:[#allocation19_spill] sm:$0xff]  ;;  %v6130_v8 = vld [vmem:[#allocation22_spill] sm:$0xff] }
 0x5ec   :  { %v1899_v23 = vpack.c.bf16 %v1898_v27, %v1898_v27  ;;  %v6131_v27 = vld [vmem:[#allocation21_spill] sm:$0xff] }
 0x5ee   :  { %1908 = vmatmul.bf16.vlgmr.msra.gmra.mxu0 %v1899_v23  ;;  %1921 = vmatmul.bf16.vlgmr.msra.gmra.mxu1 %v1899_v23 }
 0x5ef   :  { %1934 = vmatmul.bf16.vlgmr.msra.gmra.mxu2 %v1899_v23  ;;  %1947 = vmatmul.bf16.vlgmr.msra.gmra.mxu3 %v1899_v23  ;;  %v6132_v23 = vld [vmem:[#allocation23_spill] sm:$0xff] }
 0x5f0   :  { %2079 = vmatpush.bf16.msra.mxu0 %v5915_v15  ;;  %2092 = vmatpush.bf16.msra.mxu1 %v5916_v14 }
 0x5f1   :  { %2105 = vmatpush.bf16.msra.mxu2 %v5917_v24  ;;  %2118 = vmatpush.bf16.msra.mxu3 %v5918_v34 }
 0x5f4   :  { %2080 = vmatpush.bf16.msra.mxu0 %v5919_v46  ;;  %2093 = vmatpush.bf16.msra.mxu1 %v5920_v38 }
 0x5f5   :  { %2106 = vmatpush.bf16.msra.mxu2 %v5921_v30  ;;  %2119 = vmatpush.bf16.msra.mxu3 %v5922_v61 }
 0x5f8   :  { %2081 = vmatpush.bf16.msra.mxu0 %v5923_v32  ;;  %2094 = vmatpush.bf16.msra.mxu1 %v5924_v22 }
 0x5f9   :  { %2107 = vmatpush.bf16.msra.mxu2 %v5925_v5  ;;  %2120 = vmatpush.bf16.msra.mxu3 %v5926_v40 }
 0x5fc   :  { %2082 = vmatpush.bf16.msra.mxu0 %v5927_v31  ;;  %2095 = vmatpush.bf16.msra.mxu1 %v5928_v1 }
 0x5fd   :  { %2108 = vmatpush.bf16.msra.mxu2 %v5929_v42  ;;  %2121 = vmatpush.bf16.msra.mxu3 %v5930_v51 }
 0x5fe   :  { %1964 = vmatmul.bf16.vlgmr.msrb.gmra.mxu0 %v5004_v19  ;;  %1977 = vmatmul.bf16.vlgmr.msrb.gmra.mxu1 %v5004_v19 }
 0x5ff   :  { %1990 = vmatmul.bf16.vlgmr.msrb.gmra.mxu2 %v5004_v19  ;;  %2003 = vmatmul.bf16.vlgmr.msrb.gmra.mxu3 %v5004_v19  ;;  %v6113_v19 = vld [vmem:[#allocation100_spill] sm:$0xff] }
 0x600   :  { %2083 = vmatpush.bf16.msra.mxu0 %v4457_v63  ;;  %2096 = vmatpush.bf16.msra.mxu1 %v4459_v25 }
 0x601   :  { %2109 = vmatpush.bf16.msra.mxu2 %v5931_v39  ;;  %2122 = vmatpush.bf16.msra.mxu3 %v5932_v16 }
 0x604   :  { %2084 = vmatpush.bf16.msra.mxu0 %v6107_v50  ;;  %2097 = vmatpush.bf16.msra.mxu1 %v6108_v6 }
 0x605   :  { %2110 = vmatpush.bf16.msra.mxu2 %v6109_v54  ;;  %2123 = vmatpush.bf16.msra.mxu3 %v6110_v47 }
 0x608   :  { %2085 = vmatpush.bf16.msra.mxu0 %v6111_v20  ;;  %2098 = vmatpush.bf16.msra.mxu1 %v6112_v49 }
 0x609   :  { %2111 = vmatpush.bf16.msra.mxu2 %v6113_v19  ;;  %2124 = vmatpush.bf16.msra.mxu3 %v6114_v28 }
 0x60c   :  { %2086 = vmatpush.bf16.msra.mxu0 %v6115_v58  ;;  %2099 = vmatpush.bf16.msra.mxu1 %v6116_v55 }
 0x60d   :  { %2112 = vmatpush.bf16.msra.mxu2 %v6117_v2  ;;  %2125 = vmatpush.bf16.msra.mxu3 %v6118_v18 }
 0x610   :  { %2199 = vmatpush.bf16.msrb.mxu0 %v6119_v59  ;;  %2212 = vmatpush.bf16.msrb.mxu1 %v6120_v9 }
 0x611   :  { %2225 = vmatpush.bf16.msrb.mxu2 %v6121_v3  ;;  %2238 = vmatpush.bf16.msrb.mxu3 %v6122_v37  ;;  %v6133_v37 = vld [vmem:[#allocation24_spill] sm:$0xff] }
 0x614   :  { %2200 = vmatpush.bf16.msrb.mxu0 %v6123_v4  ;;  %2213 = vmatpush.bf16.msrb.mxu1 %v6124_v7  ;;  %v6134_v4 = vld [vmem:[#allocation26_spill] sm:$0xff]  ;;  %v6135_v7 = vld [vmem:[#allocation25_spill] sm:$0xff] }
 0x615   :  { %2226 = vmatpush.bf16.msrb.mxu2 %v6125_v35  ;;  %2239 = vmatpush.bf16.msrb.mxu3 %v6126_v21  ;;  %v6136_v35 = vld [vmem:[#allocation27_spill] sm:$0xff]  ;;  %v6137_v21 = vld [vmem:[#allocation28_spill] sm:$0xff] }
 0x618   :  { %2201 = vmatpush.bf16.msrb.mxu0 %v6127_v41  ;;  %2214 = vmatpush.bf16.msrb.mxu1 %v6128_v48  ;;  %v6138_v41 = vld [vmem:[#allocation30_spill] sm:$0xff]  ;;  %v6139_v48 = vld [vmem:[#allocation29_spill] sm:$0xff] }
 0x619   :  { %2227 = vmatpush.bf16.msrb.mxu2 %v6129_v17  ;;  %2240 = vmatpush.bf16.msrb.mxu3 %v6130_v8  ;;  %v6140_v17 = vld [vmem:[#allocation31_spill] sm:$0xff]  ;;  %v6141_v8 = vld [vmem:[#allocation32_spill] sm:$0xff] }
 0x61c   :  { %2202 = vmatpush.bf16.msrb.mxu0 %v6131_v27  ;;  %2215 = vmatpush.bf16.msrb.mxu1 %v6132_v23  ;;  %v6142_v27 = vld [vmem:[#allocation34_spill] sm:$0xff]  ;;  %v6143_v23 = vld [vmem:[#allocation33_spill] sm:$0xff] }
 0x61d   :  { %2228 = vmatpush.bf16.msrb.mxu2 %v6133_v37  ;;  %2241 = vmatpush.bf16.msrb.mxu3 %v6134_v4  ;;  %v6144_v37 = vld [vmem:[#allocation35_spill] sm:$0xff]  ;;  %v6145_v4 = vld [vmem:[#allocation36_spill] sm:$0xff] }
 0x620   :  { %2203 = vmatpush.bf16.msrb.mxu0 %v6135_v7  ;;  %2216 = vmatpush.bf16.msrb.mxu1 %v6136_v35  ;;  %v6146_v7 = vld [vmem:[#allocation38_spill] sm:$0xff]  ;;  %v6147_v35 = vld [vmem:[#allocation37_spill] sm:$0xff] }
 0x621   :  { %2229 = vmatpush.bf16.msrb.mxu2 %v6137_v21  ;;  %2242 = vmatpush.bf16.msrb.mxu3 %v6138_v41  ;;  %v6148_v21 = vld [vmem:[#allocation39_spill] sm:$0xff]  ;;  %v6149_v41 = vld [vmem:[#allocation40_spill] sm:$0xff] }
 0x624   :  { %2204 = vmatpush.bf16.msrb.mxu0 %v6139_v48  ;;  %2217 = vmatpush.bf16.msrb.mxu1 %v6140_v17  ;;  %v6150_v48 = vld [vmem:[#allocation41_spill] sm:$0xff] }
 0x625   :  { %2230 = vmatpush.bf16.msrb.mxu2 %v6141_v8  ;;  %2243 = vmatpush.bf16.msrb.mxu3 %v6142_v27 }
 0x628   :  { %2205 = vmatpush.bf16.msrb.mxu0 %v6143_v23  ;;  %2218 = vmatpush.bf16.msrb.mxu1 %v6144_v37 }
 0x629   :  { %2231 = vmatpush.bf16.msrb.mxu2 %v6145_v4  ;;  %2244 = vmatpush.bf16.msrb.mxu3 %v6146_v7 }
 0x62c   :  { %2206 = vmatpush.bf16.msrb.mxu0 %v6147_v35  ;;  %2219 = vmatpush.bf16.msrb.mxu1 %v6148_v21  ;;  %v1952_v35 = vld [vmem:[%s5573_s0 + $0x20] sm:$0x3] }
 0x62d   :  { %2232 = vmatpush.bf16.msrb.mxu2 %v6149_v41  ;;  %2245 = vmatpush.bf16.msrb.mxu3 %v6150_v48  ;;  %v1953_v41 = vld [vmem:[%s5573_s0 + $0x28] sm:$0x3] }
 0x66b   :  { %v5122_v17 = vpop.f32.mrf.mxu0  ;;  %v5124_v8 = vpop.f32.mrf.mxu1 }
 0x672   :  { %v5126_v27 = vpop.f32.mrf.mxu2  ;;  %v5128_v23 = vpop.f32.mrf.mxu3 }
 0x673   :  { %v1911_v37 = vpop.f32.mrf.mxu0  ;;  %v1924_v4 = vpop.f32.mrf.mxu1 }
 0x674   :  { %v1954_v37 = vld [vmem:[%s5573_s0 + $0x30] sm:$0x3] }
 0x67a   :  { %v1937_v21 = vpop.f32.mrf.mxu2  ;;  %v1950_v48 = vpop.f32.mrf.mxu3 }
 0x67b   :  { %v1965_v7 = vpop.f32.mrf.mxu0  ;;  %v1978_v3 = vpop.f32.mrf.mxu1 }
 0x67c   :  { %v2008_v9 = vadd.f32 %v1965_v7, %v1952_v35  ;;  %v2009_v59 = vadd.f32 %v1978_v3, %v1953_v41 }
 0x67e   :  { %v3638_v18 = vmul.f32 -1.442695, %v2008_v9  ;;  %v3639_v2 = vmul.f32 -1.442695, %v2009_v59  ;;  %v1955_v9 = vld [vmem:[%s5573_s0 + $0x38] sm:$0x3] }
 0x680   :  { %3933 = vpow2.f32 %v3638_v18 }
 0x681   :  { %3935 = vpow2.f32 %v3639_v2 }
 0x682   :  { %v1991_v4 = vpop.f32.mrf.mxu2  ;;  %v2004_v55 = vpop.f32.mrf.mxu3 }
 0x683   :  { %v2010_v58 = vadd.f32 %v1991_v4, %v1954_v37  ;;  %v1967_v28 = vpop.f32.mrf.mxu0  ;;  %v1980_v19 = vpop.f32.mrf.mxu1  ;;  %v2011_v41 = vadd.f32 %v2004_v55, %v1955_v9 }
 0x685   :  { %v3640_v49 = vmul.f32 -1.442695, %v2010_v58 }
 0x686   :  { %v3934_v21 = vpop.eup %3933 }
 0x687   :  { %v3936_v48 = vpop.eup %3935  ;;  %v2021_v20 = vadd.f32 1.0, %v3934_v21  ;;  %3937 = vpow2.f32 %v3640_v49 }
 0x688   :  { %v2022_v7 = vadd.f32 1.0, %v3936_v48 }
 0x689   :  { %3939 = vrcp.f32 %v2021_v20  ;;  %v2035_v49 = vand.u32 2147483648, %v2021_v20  ;;  %vm2029_vm2 = vweird.f32 %v2021_v20 }
 0x68a   :  { %3941 = vrcp.f32 %v2022_v7  ;;  %v1993_v59 = vpop.f32.mrf.mxu2  ;;  %v2006_v18 = vpop.f32.mrf.mxu3  ;;  %v2050_v21 = vand.u32 2147483648, %v2022_v7  ;;  %v2048_v47 = vand.u32 2147483647, %v2022_v7  ;;  %vm2044_vm3 = vweird.f32 %v2022_v7 }
 0x68b   :  { %v2033_v59 = vand.u32 2147483647, %v2021_v20  ;;  %v2036_v9 = vor.u32 1.1754944e-38, %v2035_v49 }
 0x68c   :  { %vm2049_vm7 = vcmp.eq.f32.partialorder %v2048_v47, 8.507059e+37 }
 0x68d   :  { %v3938_v2 = vpop.eup %3937  ;;  %vm2034_vm6 = vcmp.eq.f32.partialorder %v2033_v59, 8.507059e+37 }
 0x68e   :  { %v2023_v3 = vadd.f32 1.0, %v3938_v2 }
 0x68f   :  { %v3940_v35 = vpop.eup %3939 }
 0x690   :  { %v3942_v28 = vpop.eup %3941  ;;  %v2025_v19 = vmul.f32 %v3940_v35, %v2021_v20  ;;  %3943 = vrcp.f32 %v2023_v3  ;;  %vm2030_vm0 = vweird.f32 %v3940_v35  ;;  %v2065_v49 = vand.u32 2147483648, %v2023_v3 }
 0x691   :  { %v2040_v58 = vmul.f32 %v3942_v28, %v2022_v7  ;;  %3945 = vtanh.f32 %v2011_v41  ;;  %vm2045_vm1 = vweird.f32 %v3942_v28  ;;  %vm2031_vm4 = vmor %vm2029_vm2, %vm2030_vm0  ;;  %v2071_v41 = vrot.slane %v5001_v11, 6 }
 0x692   :  { %v2026_v37 = vsub.f32 1.0, %v2025_v19  ;;  %vm2046_vm5 = vmor %vm2044_vm3, %vm2045_vm1  ;;  %v2051_v19 = vor.u32 1.1754944e-38, %v2050_v21  ;;  %vm2059_vm9 = vweird.f32 %v2023_v3 }
 0x693   :  { %v2041_v4 = vsub.f32 1.0, %v2040_v58 }
 0x694   :  { %v2027_v48 = vmul.f32 %v3940_v35, %v2026_v37 }
 0x695   :  { %v2042_v18 = vmul.f32 %v3942_v28, %v2041_v4 }
 0x696   :  { %v3944_v54 = vpop.eup %3943  ;;  %v2028_v6 = vadd.f32 %v3940_v35, %v2027_v48 }
 0x697   :  { %v2055_v55 = vmul.f32 %v3944_v54, %v2023_v3  ;;  %v2043_v2 = vadd.f32 %v3942_v28, %v2042_v18  ;;  %v3946_v37 = vpop.eup %3945  ;;  %vm2060_vm8 = vweird.f32 %v3944_v54  ;;  %v6158_v18 = vld [vmem:[#allocation61_spill] sm:$0xff] }
 0x698   :  { %v2032_v58 = vsel %vm2031_vm4, %v3940_v35, %v2028_v6  ;;  %v2063_v6 = vand.u32 2147483647, %v2023_v3  ;;  %vm2061_vm10 = vmor %vm2059_vm9, %vm2060_vm8  ;;  %v2066_v35 = vor.u32 1.1754944e-38, %v2065_v49  ;;  %v6157_v3 = vld [vmem:[#allocation60_spill] sm:$0xff]  ;;  %v6168_v49 = vld [vmem:[#allocation107_spill] sm:$0xff] }
 0x699   :  { %v2056_v50 = vsub.f32 1.0, %v2055_v55  ;;  %v2037_v16 = vsel %vm2034_vm6, %v2036_v9, %v2032_v58  ;;  %v2047_v4 = vsel %vm2046_vm5, %v3942_v28, %v2043_v2  ;;  %v6159_v55 = vld [vmem:[#allocation62_spill] sm:$0xff]  ;;  %v6160_v9 = vld [vmem:[#allocation63_spill] sm:$0xff]  ;;  %v6161_v2 = vld [vmem:[#allocation64_spill] sm:$0xff] }
 0x69a   :  { %v2052_v39 = vsel %vm2049_vm7, %v2051_v19, %v2047_v4  ;;  %v2074_v25 = vmul.f32 %v3946_v37, %v2037_v16  ;;  %vm2064_vm11 = vcmp.eq.f32.partialorder %v2063_v6, 8.507059e+37  ;;  %v6154_v16 = vld [vmem:[#allocation57_spill] sm:$0xff]  ;;  %v6163_v58 = vld [vmem:[#allocation66_spill] sm:$0xff]  ;;  %v6165_v37 = vld [vmem:[#allocation68_spill] sm:$0xff]  ;;  %v1923_v6 = vadd.f32 %v5124_v8, %v6168_v49 }
 0x69b   :  { %v2057_v48 = vmul.f32 %v3944_v54, %v2056_v50  ;;  %v2073_v20 = vmul.f32 %v2071_v41, %v2052_v39  ;;  %v6153_v39 = vld [vmem:[#allocation56_spill] sm:$0xff]  ;;  %v6155_v50 = vld [vmem:[#allocation58_spill] sm:$0xff]  ;;  %v6162_v19 = vld [vmem:[#allocation65_spill] sm:$0xff] }
 0x69c   :  { %v6164_v41 = vld [vmem:[#allocation67_spill] sm:$0xff]  ;;  %v6166_v4 = vld [vmem:[#allocation69_spill] sm:$0xff] }
 0x69d   :  { %v5143_v7 = vadd.f32 %v2074_v25, %v2073_v20  ;;  %v2058_v63 = vadd.f32 %v3944_v54, %v2057_v48  ;;  %v6151_v25 = vld [vmem:[#allocation54_spill] sm:$0xff] }
 0x69e   :  { %v6167_v48 = vld [vmem:[#allocation106_spill] sm:$0xff] }
 0x69f   :  { %3947 = vtanh.f32 %v5143_v7  ;;  %v2062_v11 = vsel %vm2061_vm10, %v3944_v54, %v2058_v63  ;;  %v6152_v63 = vld [vmem:[#allocation55_spill] sm:$0xff]  ;;  %v1910_v20 = vadd.f32 %v5122_v17, %v6167_v48 }
 0x6a0   :  { %v2067_v28 = vsel %vm2064_vm11, %v2066_v35, %v2062_v11  ;;  %v6156_v54 = vld [vmem:[#allocation59_spill] sm:$0xff] }
 0x6a5   :  { %v3948_v21 = vpop.eup %3947 }
 0x6a6   :  { %v2077_v47 = vmul.f32 %v3948_v21, %v2067_v28 }
 0x6a8   :  { %v5146_v59 = vpack.c.bf16 %v2077_v47, %v2077_v47 }
 0x6aa   :  { %2087 = vmatmul.bf16.vlgmr.msra.gmra.mxu0 %v5146_v59  ;;  %2100 = vmatmul.bf16.vlgmr.msra.gmra.mxu1 %v5146_v59 }
 0x6ab   :  { %2113 = vmatmul.bf16.vlgmr.msra.gmra.mxu2 %v5146_v59  ;;  %2126 = vmatmul.bf16.vlgmr.msra.gmra.mxu3 %v5146_v59 }
 0x6ac   :  { %2255 = vmatpush.bf16.msra.mxu0 %v4284_v53  ;;  %2268 = vmatpush.bf16.msra.mxu1 %v4286_v56 }
 0x6ad   :  { %2281 = vmatpush.bf16.msra.mxu2 %v4288_v62  ;;  %2294 = vmatpush.bf16.msra.mxu3 %v4296_v12 }
 0x6b0   :  { %2256 = vmatpush.bf16.msra.mxu0 %v5947_v0  ;;  %2269 = vmatpush.bf16.msra.mxu1 %v5948_v60 }
 0x6b1   :  { %2282 = vmatpush.bf16.msra.mxu2 %v5949_v52  ;;  %2295 = vmatpush.bf16.msra.mxu3 %v5950_v13 }
 0x6b4   :  { %2257 = vmatpush.bf16.msra.mxu0 %v6015_v36  ;;  %2270 = vmatpush.bf16.msra.mxu1 %v6016_v44 }
 0x6b5   :  { %2283 = vmatpush.bf16.msra.mxu2 %v6017_v45  ;;  %2296 = vmatpush.bf16.msra.mxu3 %v6018_v43 }
 0x6b8   :  { %2258 = vmatpush.bf16.msra.mxu0 %v6083_v57  ;;  %2271 = vmatpush.bf16.msra.mxu1 %v6084_v33 }
 0x6b9   :  { %2284 = vmatpush.bf16.msra.mxu2 %v6085_v29  ;;  %2297 = vmatpush.bf16.msra.mxu3 %v6086_v10 }
 0x6bc   :  { %2259 = vmatpush.bf16.msra.mxu0 %v6151_v25  ;;  %2272 = vmatpush.bf16.msra.mxu1 %v6152_v63 }
 0x6bd   :  { %2285 = vmatpush.bf16.msra.mxu2 %v6153_v39  ;;  %2298 = vmatpush.bf16.msra.mxu3 %v6154_v16 }
 0x6c0   :  { %2260 = vmatpush.bf16.msra.mxu0 %v6155_v50  ;;  %2273 = vmatpush.bf16.msra.mxu1 %v6156_v54 }
 0x6c1   :  { %2286 = vmatpush.bf16.msra.mxu2 %v6157_v3  ;;  %2299 = vmatpush.bf16.msra.mxu3 %v6158_v18 }
 0x6c4   :  { %2261 = vmatpush.bf16.msra.mxu0 %v6159_v55  ;;  %2274 = vmatpush.bf16.msra.mxu1 %v6160_v9 }
 0x6c5   :  { %2287 = vmatpush.bf16.msra.mxu2 %v6161_v2  ;;  %2300 = vmatpush.bf16.msra.mxu3 %v6162_v19 }
 0x6c8   :  { %2262 = vmatpush.bf16.msra.mxu0 %v6163_v58  ;;  %2275 = vmatpush.bf16.msra.mxu1 %v6164_v41  ;;  %v6169_v58 = vld [vmem:[#allocation70_spill] sm:$0xff] }
 0x6c9   :  { %2288 = vmatpush.bf16.msra.mxu2 %v6165_v37  ;;  %2301 = vmatpush.bf16.msra.mxu3 %v6166_v4  ;;  %v1936_v41 = vadd.f32 %v5126_v27, %v6169_v58 }
 0x727   :  { %v2088_v11 = vpop.f32.mrf.mxu0  ;;  %v2101_v35 = vpop.f32.mrf.mxu1 }
 0x728   :  { %v2131_v21 = vadd.f32 %v2088_v11, %v1910_v20  ;;  %v2132_v28 = vadd.f32 %v2101_v35, %v1923_v6  ;;  %v6170_v35 = vld [vmem:[#allocation71_spill] sm:$0xff] }
 0x729   :  { %v1949_v27 = vadd.f32 %v5128_v23, %v6170_v35 }
 0x72a   :  { %v3641_v47 = vmul.f32 -1.442695, %v2131_v21  ;;  %v3642_v19 = vmul.f32 -1.442695, %v2132_v28 }
 0x72c   :  { %3949 = vpow2.f32 %v3641_v47 }
 0x72d   :  { %3951 = vpow2.f32 %v3642_v19 }
 0x72e   :  { %v2114_v37 = vpop.f32.mrf.mxu2  ;;  %v2127_v2 = vpop.f32.mrf.mxu3 }
 0x72f   :  { %v2133_v4 = vadd.f32 %v2114_v37, %v1936_v41  ;;  %v2090_v9 = vpop.f32.mrf.mxu0  ;;  %v2103_v55 = vpop.f32.mrf.mxu1  ;;  %v2134_v28 = vadd.f32 %v2127_v2, %v1949_v27 }
 0x731   :  { %v3643_v17 = vmul.f32 -1.442695, %v2133_v4 }
 0x732   :  { %v3950_v48 = vpop.eup %3949 }
 0x733   :  { %v3952_v18 = vpop.eup %3951  ;;  %v2144_v8 = vadd.f32 1.0, %v3950_v48  ;;  %3953 = vpow2.f32 %v3643_v17 }
 0x734   :  { %v2145_v49 = vadd.f32 1.0, %v3952_v18 }
 0x735   :  { %3955 = vrcp.f32 %v2144_v8  ;;  %v2158_v48 = vand.u32 2147483648, %v2144_v8  ;;  %v2156_v17 = vand.u32 2147483647, %v2144_v8  ;;  %vm2152_vm14 = vweird.f32 %v2144_v8 }
 0x736   :  { %3957 = vrcp.f32 %v2145_v49  ;;  %v2116_v20 = vpop.f32.mrf.mxu2  ;;  %v2129_v6 = vpop.f32.mrf.mxu3  ;;  %v2173_v18 = vand.u32 2147483648, %v2145_v49  ;;  %vm2167_vm15 = vweird.f32 %v2145_v49 }
 0x737   :  { %v2171_v6 = vand.u32 2147483647, %v2145_v49  ;;  %vm2157_vm2 = vcmp.eq.f32.partialorder %v2156_v17, 8.507059e+37 }
 0x739   :  { %v3954_v11 = vpop.eup %3953  ;;  %vm2172_vm3 = vcmp.eq.f32.partialorder %v2171_v6, 8.507059e+37 }
 0x73a   :  { %v2146_v19 = vadd.f32 1.0, %v3954_v11  ;;  %v2159_v11 = vor.u32 1.1754944e-38, %v2158_v48 }
 0x73b   :  { %v3956_v21 = vpop.eup %3955 }
 0x73c   :  { %v3958_v41 = vpop.eup %3957  ;;  %v2148_v9 = vmul.f32 %v3956_v21, %v2144_v8  ;;  %3959 = vrcp.f32 %v2146_v19  ;;  %vm2153_vm12 = vweird.f32 %v3956_v21  ;;  %v2188_v48 = vand.u32 2147483648, %v2146_v19 }
 0x73d   :  { %v2163_v55 = vmul.f32 %v3958_v41, %v2145_v49  ;;  %3961 = vtanh.f32 %v2134_v28  ;;  %vm2168_vm13 = vweird.f32 %v3958_v41  ;;  %vm2154_vm0 = vmor %vm2152_vm14, %vm2153_vm12  ;;  %vm2182_vm5 = vweird.f32 %v2146_v19 }
 0x73e   :  { %v2149_v37 = vsub.f32 1.0, %v2148_v9  ;;  %vm2169_vm1 = vmor %vm2167_vm15, %vm2168_vm13  ;;  %v2174_v9 = vor.u32 1.1754944e-38, %v2173_v18  ;;  %v2189_v17 = vor.u32 1.1754944e-38, %v2188_v48  ;;  %v6189_v48 = vld [vmem:[#allocation12_spill] sm:$0xff] }
 0x73f   :  { %v2164_v4 = vsub.f32 1.0, %v2163_v55 }
 0x740   :  { %v2150_v47 = vmul.f32 %v3956_v21, %v2149_v37 }
 0x741   :  { %v2165_v20 = vmul.f32 %v3958_v41, %v2164_v4 }
 0x742   :  { %v3960_v58 = vpop.eup %3959  ;;  %v2151_v23 = vadd.f32 %v3956_v21, %v2150_v47 }
 0x743   :  { %v2178_v2 = vmul.f32 %v3960_v58, %v2146_v19  ;;  %v2166_v27 = vadd.f32 %v3958_v41, %v2165_v20  ;;  %v3962_v28 = vpop.eup %3961  ;;  %vm2183_vm4 = vweird.f32 %v3960_v58 }
 0x744   :  { %v2155_v55 = vsel %vm2154_vm0, %v3956_v21, %v2151_v23  ;;  %v2186_v21 = vand.u32 2147483647, %v2146_v19  ;;  %vm2184_vm6 = vmor %vm2182_vm5, %vm2183_vm4  ;;  %v6176_v19 = vld [vmem:[#allocation95_spill] sm:$0xff]  ;;  %v6177_v23 = vld [vmem:[#allocation96_spill] sm:$0xff] }
 0x745   :  { %v2179_v35 = vsub.f32 1.0, %v2178_v2  ;;  %v2160_v37 = vsel %vm2157_vm2, %v2159_v11, %v2155_v55  ;;  %v2170_v3 = vsel %vm2169_vm1, %v3958_v41, %v2166_v27  ;;  %v6178_v2 = vld [vmem:[#allocation97_spill] sm:$0xff]  ;;  %v6179_v11 = vld [vmem:[#allocation98_spill] sm:$0xff]  ;;  %v6180_v27 = vld [vmem:[#allocation99_spill] sm:$0xff] }
 0x746   :  { %v2175_v4 = vsel %vm2172_vm3, %v2174_v9, %v2170_v3  ;;  %v2194_v54 = vmul.f32 %v3962_v28, %v2160_v37  ;;  %vm2187_vm7 = vcmp.eq.f32.partialorder %v2186_v21, 8.507059e+37  ;;  %v6182_v9 = vld [vmem:[#allocation101_spill] sm:$0xff]  ;;  %v6183_v55 = vld [vmem:[#allocation102_spill] sm:$0xff]  ;;  %v6184_v28 = vld [vmem:[#allocation103_spill] sm:$0xff] }
 0x747   :  { %v2180_v50 = vmul.f32 %v3960_v58, %v2179_v35  ;;  %v2193_v47 = vmul.f32 %v2175_v4, %v5051_v26  ;;  %v6171_v26 = vld [vmem:[#allocation90_spill] sm:$0xff]  ;;  %v6185_v37 = vld [vmem:[#allocation104_spill] sm:$0xff]  ;;  %v6186_v4 = vld [vmem:[#allocation105_spill] sm:$0xff] }
 0x748   :  { %v6175_v35 = vld [vmem:[#allocation94_spill] sm:$0xff]  ;;  %v6190_v21 = vld [vmem:[#allocation16_spill] sm:$0xff] }
 0x749   :  { %v5193_v8 = vadd.f32 %v2194_v54, %v2193_v47  ;;  %v2181_v49 = vadd.f32 %v3960_v58, %v2180_v50  ;;  %v6172_v50 = vld [vmem:[#allocation91_spill] sm:$0xff]  ;;  %v6173_v54 = vld [vmem:[#allocation92_spill] sm:$0xff]  ;;  %v6187_v47 = vld [vmem:[#allocation10_spill] sm:$0xff] }
 0x74b   :  { %3963 = vtanh.f32 %v5193_v8  ;;  %v2185_v18 = vsel %vm2184_vm6, %v3960_v58, %v2181_v49  ;;  %v6174_v58 = vld [vmem:[#allocation93_spill] sm:$0xff]  ;;  %v6188_v49 = vld [vmem:[#allocation11_spill] sm:$0xff] }
 0x74c   :  { %v2190_v20 = vsel %vm2187_vm7, %v2189_v17, %v2185_v18  ;;  %v6191_v18 = vld [vmem:[#allocation13_spill] sm:$0xff]  ;;  %v6192_v17 = vld [vmem:[#allocation14_spill] sm:$0xff] }
 0x751   :  { %v3964_v41 = vpop.eup %3963 }
 0x752   :  { %v2197_v3 = vmul.f32 %v3964_v41, %v2190_v20  ;;  %v6193_v41 = vld [vmem:[#allocation15_spill] sm:$0xff]  ;;  %v6194_v20 = vld [vmem:[#allocation20_spill] sm:$0xff] }
 0x754   :  { %v2198_v6 = vpack.c.bf16 %v2197_v3, %v2197_v3  ;;  %v6195_v3 = vld [vmem:[#allocation17_spill] sm:$0xff] }
 0x756   :  { %2207 = vmatmul.bf16.vlgmr.msrb.gmra.mxu0 %v2198_v6  ;;  %2220 = vmatmul.bf16.vlgmr.msrb.gmra.mxu1 %v2198_v6 }
 0x757   :  { %2233 = vmatmul.bf16.vlgmr.msrb.gmra.mxu2 %v2198_v6  ;;  %2246 = vmatmul.bf16.vlgmr.msrb.gmra.mxu3 %v2198_v6  ;;  %v6196_v6 = vld [vmem:[#allocation18_spill] sm:$0xff] }
 0x758   :  { %2393 = vmatpush.bf16.msrb.mxu0 %v5915_v15  ;;  %2406 = vmatpush.bf16.msrb.mxu1 %v5916_v14 }
 0x759   :  { %2419 = vmatpush.bf16.msrb.mxu2 %v5917_v24  ;;  %2432 = vmatpush.bf16.msrb.mxu3 %v5918_v34 }
 0x75c   :  { %2394 = vmatpush.bf16.msrb.mxu0 %v5919_v46  ;;  %2407 = vmatpush.bf16.msrb.mxu1 %v5920_v38 }
 0x75d   :  { %2420 = vmatpush.bf16.msrb.mxu2 %v5921_v30  ;;  %2433 = vmatpush.bf16.msrb.mxu3 %v5922_v61 }
 0x760   :  { %2395 = vmatpush.bf16.msrb.mxu0 %v5923_v32  ;;  %2408 = vmatpush.bf16.msrb.mxu1 %v5924_v22 }
 0x761   :  { %2421 = vmatpush.bf16.msrb.mxu2 %v5925_v5  ;;  %2434 = vmatpush.bf16.msrb.mxu3 %v5926_v40 }
 0x764   :  { %2396 = vmatpush.bf16.msrb.mxu0 %v5927_v31  ;;  %2409 = vmatpush.bf16.msrb.mxu1 %v5928_v1 }
 0x765   :  { %2422 = vmatpush.bf16.msrb.mxu2 %v5929_v42  ;;  %2435 = vmatpush.bf16.msrb.mxu3 %v5930_v51 }
 0x766   :  { %2263 = vmatmul.bf16.vlgmr.msra.gmra.mxu0 %v5146_v59  ;;  %2276 = vmatmul.bf16.vlgmr.msra.gmra.mxu1 %v5146_v59 }
 0x767   :  { %2289 = vmatmul.bf16.vlgmr.msra.gmra.mxu2 %v5146_v59  ;;  %2302 = vmatmul.bf16.vlgmr.msra.gmra.mxu3 %v5146_v59  ;;  %v6181_v59 = vld [vmem:[#allocation100_spill] sm:$0xff] }
 0x768   :  { %2397 = vmatpush.bf16.msrb.mxu0 %v6171_v26  ;;  %2410 = vmatpush.bf16.msrb.mxu1 %v6172_v50 }
 0x769   :  { %2423 = vmatpush.bf16.msrb.mxu2 %v6173_v54  ;;  %2436 = vmatpush.bf16.msrb.mxu3 %v6174_v58 }
 0x76c   :  { %2398 = vmatpush.bf16.msrb.mxu0 %v6175_v35  ;;  %2411 = vmatpush.bf16.msrb.mxu1 %v6176_v19 }
 0x76d   :  { %2424 = vmatpush.bf16.msrb.mxu2 %v6177_v23  ;;  %2437 = vmatpush.bf16.msrb.mxu3 %v6178_v2 }
 0x770   :  { %2399 = vmatpush.bf16.msrb.mxu0 %v6179_v11  ;;  %2412 = vmatpush.bf16.msrb.mxu1 %v6180_v27 }
 0x771   :  { %2425 = vmatpush.bf16.msrb.mxu2 %v6181_v59  ;;  %2438 = vmatpush.bf16.msrb.mxu3 %v6182_v9 }
 0x774   :  { %2400 = vmatpush.bf16.msrb.mxu0 %v6183_v55  ;;  %2413 = vmatpush.bf16.msrb.mxu1 %v6184_v28 }
 0x775   :  { %2426 = vmatpush.bf16.msrb.mxu2 %v6185_v37  ;;  %2439 = vmatpush.bf16.msrb.mxu3 %v6186_v4  ;;  %v6197_v4 = vld [vmem:[#allocation19_spill] sm:$0xff] }
 0x778   :  { %2513 = vmatpush.bf16.msra.mxu0 %v6187_v47  ;;  %2526 = vmatpush.bf16.msra.mxu1 %v6188_v49  ;;  %v6198_v47 = vld [vmem:[#allocation22_spill] sm:$0xff]  ;;  %v6199_v49 = vld [vmem:[#allocation21_spill] sm:$0xff] }
 0x779   :  { %2539 = vmatpush.bf16.msra.mxu2 %v6189_v48  ;;  %2552 = vmatpush.bf16.msra.mxu3 %v6190_v21  ;;  %v6200_v48 = vld [vmem:[#allocation23_spill] sm:$0xff]  ;;  %v6201_v21 = vld [vmem:[#allocation24_spill] sm:$0xff] }
 0x77c   :  { %2514 = vmatpush.bf16.msra.mxu0 %v6191_v18  ;;  %2527 = vmatpush.bf16.msra.mxu1 %v6192_v17  ;;  %v6202_v18 = vld [vmem:[#allocation26_spill] sm:$0xff]  ;;  %v6203_v17 = vld [vmem:[#allocation25_spill] sm:$0xff] }
 0x77d   :  { %2540 = vmatpush.bf16.msra.mxu2 %v6193_v41  ;;  %2553 = vmatpush.bf16.msra.mxu3 %v6194_v20  ;;  %v6204_v41 = vld [vmem:[#allocation27_spill] sm:$0xff]  ;;  %v6205_v20 = vld [vmem:[#allocation28_spill] sm:$0xff] }
 0x780   :  { %2515 = vmatpush.bf16.msra.mxu0 %v6195_v3  ;;  %2528 = vmatpush.bf16.msra.mxu1 %v6196_v6  ;;  %v6206_v3 = vld [vmem:[#allocation30_spill] sm:$0xff]  ;;  %v6207_v6 = vld [vmem:[#allocation29_spill] sm:$0xff] }
 0x781   :  { %2541 = vmatpush.bf16.msra.mxu2 %v6197_v4  ;;  %2554 = vmatpush.bf16.msra.mxu3 %v6198_v47  ;;  %v6208_v4 = vld [vmem:[#allocation31_spill] sm:$0xff]  ;;  %v6209_v47 = vld [vmem:[#allocation32_spill] sm:$0xff] }
 0x784   :  { %2516 = vmatpush.bf16.msra.mxu0 %v6199_v49  ;;  %2529 = vmatpush.bf16.msra.mxu1 %v6200_v48  ;;  %v6210_v49 = vld [vmem:[#allocation34_spill] sm:$0xff]  ;;  %v6211_v48 = vld [vmem:[#allocation33_spill] sm:$0xff] }
 0x785   :  { %2542 = vmatpush.bf16.msra.mxu2 %v6201_v21  ;;  %2555 = vmatpush.bf16.msra.mxu3 %v6202_v18  ;;  %v6212_v21 = vld [vmem:[#allocation35_spill] sm:$0xff]  ;;  %v6213_v18 = vld [vmem:[#allocation36_spill] sm:$0xff] }
 0x788   :  { %2517 = vmatpush.bf16.msra.mxu0 %v6203_v17  ;;  %2530 = vmatpush.bf16.msra.mxu1 %v6204_v41  ;;  %v6214_v17 = vld [vmem:[#allocation38_spill] sm:$0xff]  ;;  %v6215_v41 = vld [vmem:[#allocation37_spill] sm:$0xff] }
 0x789   :  { %2543 = vmatpush.bf16.msra.mxu2 %v6205_v20  ;;  %2556 = vmatpush.bf16.msra.mxu3 %v6206_v3  ;;  %v6216_v20 = vld [vmem:[#allocation39_spill] sm:$0xff]  ;;  %v6217_v3 = vld [vmem:[#allocation40_spill] sm:$0xff] }
 0x78c   :  { %2518 = vmatpush.bf16.msra.mxu0 %v6207_v6  ;;  %2531 = vmatpush.bf16.msra.mxu1 %v6208_v4  ;;  %v6218_v6 = vld [vmem:[#allocation41_spill] sm:$0xff] }
 0x78d   :  { %2544 = vmatpush.bf16.msra.mxu2 %v6209_v47  ;;  %2557 = vmatpush.bf16.msra.mxu3 %v6210_v49 }
 0x790   :  { %2519 = vmatpush.bf16.msra.mxu0 %v6211_v48  ;;  %2532 = vmatpush.bf16.msra.mxu1 %v6212_v21 }
 0x791   :  { %2545 = vmatpush.bf16.msra.mxu2 %v6213_v18  ;;  %2558 = vmatpush.bf16.msra.mxu3 %v6214_v17 }
 0x794   :  { %2520 = vmatpush.bf16.msra.mxu0 %v6215_v41  ;;  %2533 = vmatpush.bf16.msra.mxu1 %v6216_v20  ;;  %v2251_v20 = vld [vmem:[%s5573_s0 + $0x20] sm:$0xc] }
 0x795   :  { %2546 = vmatpush.bf16.msra.mxu2 %v6217_v3  ;;  %2559 = vmatpush.bf16.msra.mxu3 %v6218_v6  ;;  %v2252_v6 = vld [vmem:[%s5573_s0 + $0x28] sm:$0xc] }
 0x7d3   :  { %v5264_v4 = vpop.f32.mrf.mxu0  ;;  %v5266_v47 = vpop.f32.mrf.mxu1 }
 0x7da   :  { %v5268_v49 = vpop.f32.mrf.mxu2  ;;  %v5270_v48 = vpop.f32.mrf.mxu3 }
 0x7db   :  { %v2210_v21 = vpop.f32.mrf.mxu0  ;;  %v2223_v18 = vpop.f32.mrf.mxu1 }
 0x7e2   :  { %v2236_v37 = vpop.f32.mrf.mxu2  ;;  %v2249_v17 = vpop.f32.mrf.mxu3 }
 0x7e3   :  { %v2264_v41 = vpop.f32.mrf.mxu0  ;;  %v2277_v3 = vpop.f32.mrf.mxu1  ;;  %v2253_v37 = vld [vmem:[%s5573_s0 + $0x30] sm:$0xc] }
 0x7e4   :  { %v2311_v28 = vrot.slane %v2264_v41, 6  ;;  %v2312_v55 = vrot.slane %v2277_v3, 6 }
 0x7e6   :  { %v2319_v9 = vadd.f32 %v2311_v28, %v2251_v20  ;;  %v2320_v59 = vadd.f32 %v2312_v55, %v2252_v6  ;;  %v2254_v28 = vld [vmem:[%s5573_s0 + $0x38] sm:$0xc] }
 0x7e8   :  { %v3644_v27 = vmul.f32 -1.442695, %v2319_v9  ;;  %v3645_v11 = vmul.f32 -1.442695, %v2320_v59 }
 0x7ea   :  { %3965 = vpow2.f32 %v3644_v27  ;;  %v2290_v21 = vpop.f32.mrf.mxu2  ;;  %v2303_v18 = vpop.f32.mrf.mxu3 }
 0x7eb   :  { %3967 = vpow2.f32 %v3645_v11  ;;  %v2313_v17 = vrot.slane %v2290_v21, 6  ;;  %v2266_v2 = vpop.f32.mrf.mxu0  ;;  %v2279_v23 = vpop.f32.mrf.mxu1  ;;  %v2314_v27 = vrot.slane %v2303_v18, 6 }
 0x7ed   :  { %v2321_v19 = vadd.f32 %v2313_v17, %v2253_v37  ;;  %v2322_v23 = vadd.f32 %v2314_v27, %v2254_v28 }
 0x7ef   :  { %v3646_v35 = vmul.f32 -1.442695, %v2321_v19 }
 0x7f0   :  { %v3966_v58 = vpop.eup %3965 }
 0x7f1   :  { %v3968_v41 = vpop.eup %3967  ;;  %v2332_v3 = vadd.f32 1.0, %v3966_v58  ;;  %3969 = vpow2.f32 %v3646_v35 }
 0x7f2   :  { %v2333_v55 = vadd.f32 1.0, %v3968_v41  ;;  %v2292_v9 = vpop.f32.mrf.mxu2  ;;  %v2305_v59 = vpop.f32.mrf.mxu3 }
 0x7f3   :  { %3971 = vrcp.f32 %v2332_v3  ;;  %v2346_v21 = vand.u32 2147483648, %v2332_v3  ;;  %v2344_v18 = vand.u32 2147483647, %v2332_v3  ;;  %vm2340_vm10 = vweird.f32 %v2332_v3 }
 0x7f4   :  { %3973 = vrcp.f32 %v2333_v55  ;;  %v2361_v17 = vand.u32 2147483648, %v2333_v55  ;;  %v2359_v59 = vand.u32 2147483647, %v2333_v55  ;;  %vm2355_vm11 = vweird.f32 %v2333_v55 }
 0x7f5   :  { %v2347_v28 = vor.u32 1.1754944e-38, %v2346_v21  ;;  %vm2345_vm14 = vcmp.eq.f32.partialorder %v2344_v18, 8.507059e+37 }
 0x7f6   :  { %vm2360_vm15 = vcmp.eq.f32.partialorder %v2359_v59, 8.507059e+37  ;;  %v6225_v59 = vld [vmem:[#allocation64_spill] sm:$0xff] }
 0x7f7   :  { %v3970_v11 = vpop.eup %3969 }
 0x7f8   :  { %v2334_v20 = vadd.f32 1.0, %v3970_v11 }
 0x7f9   :  { %v3972_v2 = vpop.eup %3971 }
 0x7fa   :  { %v3974_v6 = vpop.eup %3973  ;;  %v2336_v19 = vmul.f32 %v3972_v2, %v2332_v3  ;;  %3975 = vrcp.f32 %v2334_v20  ;;  %vm2341_vm8 = vweird.f32 %v3972_v2  ;;  %v2376_v21 = vand.u32 2147483648, %v2334_v20 }
 0x7fb   :  { %v2351_v37 = vmul.f32 %v3974_v6, %v2333_v55  ;;  %3977 = vtanh.f32 %v2322_v23  ;;  %vm2356_vm9 = vweird.f32 %v3974_v6  ;;  %vm2342_vm12 = vmor %vm2340_vm10, %vm2341_vm8  ;;  %vm2370_vm1 = vweird.f32 %v2334_v20 }
 0x7fc   :  { %v2337_v58 = vsub.f32 1.0, %v2336_v19  ;;  %v2382_v19 = vrot.slane %v5143_v7, 6  ;;  %vm2357_vm13 = vmor %vm2355_vm11, %vm2356_vm9  ;;  %v2374_v7 = vand.u32 2147483647, %v2334_v20 }
 0x7fd   :  { %v2352_v35 = vsub.f32 1.0, %v2351_v37  ;;  %v2362_v37 = vor.u32 1.1754944e-38, %v2361_v17 }
 0x7fe   :  { %v2338_v41 = vmul.f32 %v3972_v2, %v2337_v58  ;;  %vm2375_vm3 = vcmp.eq.f32.partialorder %v2374_v7, 8.507059e+37 }
 0x7ff   :  { %v2353_v9 = vmul.f32 %v3974_v6, %v2352_v35 }
 0x800   :  { %v3976_v54 = vpop.eup %3975  ;;  %v2339_v50 = vadd.f32 %v3972_v2, %v2338_v41 }
 0x801   :  { %v2366_v27 = vmul.f32 %v3976_v54, %v2334_v20  ;;  %v2354_v11 = vadd.f32 %v3974_v6, %v2353_v9  ;;  %v3978_v58 = vpop.eup %3977  ;;  %vm2371_vm0 = vweird.f32 %v3976_v54  ;;  %v6224_v20 = vld [vmem:[#allocation63_spill] sm:$0xff] }
 0x802   :  { %v2343_v23 = vsel %vm2342_vm12, %v3972_v2, %v2339_v50  ;;  %vm2372_vm2 = vmor %vm2370_vm1, %vm2371_vm0  ;;  %v2377_v2 = vor.u32 1.1754944e-38, %v2376_v21 }
 0x803   :  { %v2367_v26 = vsub.f32 1.0, %v2366_v27  ;;  %v2348_v51 = vsel %vm2345_vm14, %v2347_v28, %v2343_v23  ;;  %v2358_v35 = vsel %vm2357_vm13, %v3974_v6, %v2354_v11  ;;  %v6226_v27 = vld [vmem:[#allocation65_spill] sm:$0xff]  ;;  %v6227_v28 = vld [vmem:[#allocation66_spill] sm:$0xff]  ;;  %v6228_v11 = vld [vmem:[#allocation67_spill] sm:$0xff] }
 0x804   :  { %v2363_v42 = vsel %vm2360_vm15, %v2362_v37, %v2358_v35  ;;  %v2385_v1 = vmul.f32 %v3978_v58, %v2348_v51  ;;  %v6230_v37 = vld [vmem:[#allocation69_spill] sm:$0xff]  ;;  %v6231_v23 = vld [vmem:[#allocation106_spill] sm:$0xff]  ;;  %v6232_v35 = vld [vmem:[#allocation107_spill] sm:$0xff] }
 0x805   :  { %v2368_v41 = vmul.f32 %v3976_v54, %v2367_v26  ;;  %v2384_v3 = vmul.f32 %v2382_v19, %v2363_v42  ;;  %v6221_v42 = vld [vmem:[#allocation60_spill] sm:$0xff]  ;;  %v6222_v26 = vld [vmem:[#allocation61_spill] sm:$0xff]  ;;  %v2209_v58 = vadd.f32 %v5264_v4, %v6231_v23 }
 0x806   :  { %v6229_v19 = vld [vmem:[#allocation68_spill] sm:$0xff] }
 0x807   :  { %v5285_v55 = vadd.f32 %v2385_v1, %v2384_v3  ;;  %v2369_v31 = vadd.f32 %v3976_v54, %v2368_v41  ;;  %v6220_v1 = vld [vmem:[#allocation59_spill] sm:$0xff]  ;;  %v2222_v41 = vadd.f32 %v5266_v47, %v6232_v35 }
 0x809   :  { %3979 = vtanh.f32 %v5285_v55  ;;  %v2373_v50 = vsel %vm2372_vm2, %v3976_v54, %v2369_v31  ;;  %v6219_v31 = vld [vmem:[#allocation58_spill] sm:$0xff] }
 0x80a   :  { %v2378_v6 = vsel %vm2375_vm3, %v2377_v2, %v2373_v50  ;;  %v6223_v54 = vld [vmem:[#allocation62_spill] sm:$0xff] }
 0x80f   :  { %v3980_v17 = vpop.eup %3979 }
 0x810   :  { %v2388_v18 = vmul.f32 %v3980_v17, %v2378_v6  ;;  %v6233_v6 = vld [vmem:[#allocation70_spill] sm:$0xff] }
 0x812   :  { %v2389_v9 = vpack.c.bf16 %v2388_v18, %v2388_v18  ;;  %v2235_v18 = vadd.f32 %v5268_v49, %v6233_v6 }
 0x814   :  { %v5288_v51 = vrot.slane %v2389_v9, 1 }
 0x816   :  { %2401 = vmatmul.bf16.vlgmr.msrb.gmra.mxu0 %v5288_v51  ;;  %2414 = vmatmul.bf16.vlgmr.msrb.gmra.mxu1 %v5288_v51 }
 0x817   :  { %2427 = vmatmul.bf16.vlgmr.msrb.gmra.mxu2 %v5288_v51  ;;  %2440 = vmatmul.bf16.vlgmr.msrb.gmra.mxu3 %v5288_v51 }
 0x818   :  { %2569 = vmatpush.bf16.msrb.mxu0 %v4284_v53  ;;  %2582 = vmatpush.bf16.msrb.mxu1 %v4286_v56 }
 0x819   :  { %2595 = vmatpush.bf16.msrb.mxu2 %v4288_v62  ;;  %2608 = vmatpush.bf16.msrb.mxu3 %v4296_v12 }
 0x81c   :  { %2570 = vmatpush.bf16.msrb.mxu0 %v5947_v0  ;;  %2583 = vmatpush.bf16.msrb.mxu1 %v5948_v60 }
 0x81d   :  { %2596 = vmatpush.bf16.msrb.mxu2 %v5949_v52  ;;  %2609 = vmatpush.bf16.msrb.mxu3 %v5950_v13 }
 0x820   :  { %2571 = vmatpush.bf16.msrb.mxu0 %v6015_v36  ;;  %2584 = vmatpush.bf16.msrb.mxu1 %v6016_v44 }
 0x821   :  { %2597 = vmatpush.bf16.msrb.mxu2 %v6017_v45  ;;  %2610 = vmatpush.bf16.msrb.mxu3 %v6018_v43 }
 0x824   :  { %2572 = vmatpush.bf16.msrb.mxu0 %v6083_v57  ;;  %2585 = vmatpush.bf16.msrb.mxu1 %v6084_v33 }
 0x825   :  { %2598 = vmatpush.bf16.msrb.mxu2 %v6085_v29  ;;  %2611 = vmatpush.bf16.msrb.mxu3 %v6086_v10 }
 0x828   :  { %2573 = vmatpush.bf16.msrb.mxu0 %v6151_v25  ;;  %2586 = vmatpush.bf16.msrb.mxu1 %v6152_v63 }
 0x829   :  { %2599 = vmatpush.bf16.msrb.mxu2 %v6153_v39  ;;  %2612 = vmatpush.bf16.msrb.mxu3 %v6154_v16 }
 0x82c   :  { %2574 = vmatpush.bf16.msrb.mxu0 %v6219_v31  ;;  %2587 = vmatpush.bf16.msrb.mxu1 %v6220_v1 }
 0x82d   :  { %2600 = vmatpush.bf16.msrb.mxu2 %v6221_v42  ;;  %2613 = vmatpush.bf16.msrb.mxu3 %v6222_v26 }
 0x830   :  { %2575 = vmatpush.bf16.msrb.mxu0 %v6223_v54  ;;  %2588 = vmatpush.bf16.msrb.mxu1 %v6224_v20 }
 0x831   :  { %2601 = vmatpush.bf16.msrb.mxu2 %v6225_v59  ;;  %2614 = vmatpush.bf16.msrb.mxu3 %v6226_v27 }
 0x834   :  { %2576 = vmatpush.bf16.msrb.mxu0 %v6227_v28  ;;  %2589 = vmatpush.bf16.msrb.mxu1 %v6228_v11 }
 0x835   :  { %2602 = vmatpush.bf16.msrb.mxu2 %v6229_v19  ;;  %2615 = vmatpush.bf16.msrb.mxu3 %v6230_v37 }
 0x893   :  { %v2402_v3 = vpop.f32.mrf.mxu0  ;;  %v2415_v21 = vpop.f32.mrf.mxu1 }
 0x894   :  { %v2445_v7 = vadd.f32 %v2402_v3, %v2209_v58  ;;  %v2446_v50 = vadd.f32 %v2415_v21, %v2222_v41  ;;  %v6234_v21 = vld [vmem:[#allocation71_spill] sm:$0xff] }
 0x895   :  { %v2248_v49 = vadd.f32 %v5270_v48, %v6234_v21 }
 0x896   :  { %v3647_v2 = vmul.f32 -1.442695, %v2445_v7  ;;  %v3648_v17 = vmul.f32 -1.442695, %v2446_v50 }
 0x898   :  { %3981 = vpow2.f32 %v3647_v2 }
 0x899   :  { %3983 = vpow2.f32 %v3648_v17 }
 0x89a   :  { %v2428_v9 = vpop.f32.mrf.mxu2  ;;  %v2441_v19 = vpop.f32.mrf.mxu3 }
 0x89b   :  { %v2447_v37 = vadd.f32 %v2428_v9, %v2235_v18  ;;  %v2404_v11 = vpop.f32.mrf.mxu0  ;;  %v2417_v28 = vpop.f32.mrf.mxu1  ;;  %v2448_v2 = vadd.f32 %v2441_v19, %v2248_v49 }
 0x89d   :  { %v3649_v4 = vmul.f32 -1.442695, %v2447_v37 }
 0x89e   :  { %v3982_v23 = vpop.eup %3981 }
 0x89f   :  { %v3984_v27 = vpop.eup %3983  ;;  %v2458_v47 = vadd.f32 1.0, %v3982_v23  ;;  %3985 = vpow2.f32 %v3649_v4 }
 0x8a0   :  { %v2459_v35 = vadd.f32 1.0, %v3984_v27 }
 0x8a1   :  { %3987 = vrcp.f32 %v2458_v47  ;;  %v2472_v23 = vand.u32 2147483648, %v2458_v47  ;;  %v2470_v4 = vand.u32 2147483647, %v2458_v47  ;;  %vm2466_vm6 = vweird.f32 %v2458_v47 }
 0x8a2   :  { %3989 = vrcp.f32 %v2459_v35  ;;  %v2430_v58 = vpop.f32.mrf.mxu2  ;;  %v2443_v41 = vpop.f32.mrf.mxu3  ;;  %v2487_v27 = vand.u32 2147483648, %v2459_v35  ;;  %vm2481_vm7 = vweird.f32 %v2459_v35 }
 0x8a3   :  { %v2485_v41 = vand.u32 2147483647, %v2459_v35  ;;  %vm2471_vm10 = vcmp.eq.f32.partialorder %v2470_v4, 8.507059e+37 }
 0x8a5   :  { %v3986_v3 = vpop.eup %3985  ;;  %vm2486_vm11 = vcmp.eq.f32.partialorder %v2485_v41, 8.507059e+37 }
 0x8a6   :  { %v2460_v7 = vadd.f32 1.0, %v3986_v3  ;;  %v2473_v3 = vor.u32 1.1754944e-38, %v2472_v23 }
 0x8a7   :  { %v3988_v50 = vpop.eup %3987 }
 0x8a8   :  { %v3990_v17 = vpop.eup %3989  ;;  %v2462_v11 = vmul.f32 %v3988_v50, %v2458_v47  ;;  %3991 = vrcp.f32 %v2460_v7  ;;  %vm2467_vm4 = vweird.f32 %v3988_v50  ;;  %v2502_v23 = vand.u32 2147483648, %v2460_v7 }
 0x8a9   :  { %v2477_v28 = vmul.f32 %v3990_v17, %v2459_v35  ;;  %3993 = vtanh.f32 %v2448_v2  ;;  %vm2482_vm5 = vweird.f32 %v3990_v17  ;;  %vm2468_vm8 = vmor %vm2466_vm6, %vm2467_vm4  ;;  %vm2496_vm13 = vweird.f32 %v2460_v7 }
 0x8aa   :  { %v2463_v37 = vsub.f32 1.0, %v2462_v11  ;;  %vm2483_vm9 = vmor %vm2481_vm7, %vm2482_vm5  ;;  %v2488_v11 = vor.u32 1.1754944e-38, %v2487_v27  ;;  %v2503_v4 = vor.u32 1.1754944e-38, %v2502_v23  ;;  %v6253_v23 = vld [vmem:[#allocation104_spill] sm:$0xff] }
 0x8ab   :  { %v2478_v18 = vsub.f32 1.0, %v2477_v28 }
 0x8ac   :  { %v2464_v9 = vmul.f32 %v3988_v50, %v2463_v37 }
 0x8ad   :  { %v2479_v58 = vmul.f32 %v3990_v17, %v2478_v18 }
 0x8ae   :  { %v3992_v6 = vpop.eup %3991  ;;  %v2465_v48 = vadd.f32 %v3988_v50, %v2464_v9 }
 0x8af   :  { %v2492_v19 = vmul.f32 %v3992_v6, %v2460_v7  ;;  %v2480_v49 = vadd.f32 %v3990_v17, %v2479_v58  ;;  %v3994_v2 = vpop.eup %3993  ;;  %vm2497_vm12 = vweird.f32 %v3992_v6 }
 0x8b0   :  { %v2469_v28 = vsel %vm2468_vm8, %v3988_v50, %v2465_v48  ;;  %v2500_v50 = vand.u32 2147483647, %v2460_v7  ;;  %vm2498_vm14 = vmor %vm2496_vm13, %vm2497_vm12  ;;  %v6240_v7 = vld [vmem:[#allocation91_spill] sm:$0xff]  ;;  %v6241_v48 = vld [vmem:[#allocation92_spill] sm:$0xff] }
 0x8b1   :  { %v2493_v21 = vsub.f32 1.0, %v2492_v19  ;;  %v2474_v37 = vsel %vm2471_vm10, %v2473_v3, %v2469_v28  ;;  %v2484_v59 = vsel %vm2483_vm9, %v3990_v17, %v2480_v49  ;;  %v6242_v19 = vld [vmem:[#allocation93_spill] sm:$0xff]  ;;  %v6243_v3 = vld [vmem:[#allocation94_spill] sm:$0xff]  ;;  %v6244_v49 = vld [vmem:[#allocation95_spill] sm:$0xff] }
 0x8b2   :  { %v2489_v18 = vsel %vm2486_vm11, %v2488_v11, %v2484_v59  ;;  %v2508_v20 = vmul.f32 %v3994_v2, %v2474_v37  ;;  %vm2501_vm15 = vcmp.eq.f32.partialorder %v2500_v50, 8.507059e+37  ;;  %v6245_v11 = vld [vmem:[#allocation96_spill] sm:$0xff]  ;;  %v6246_v28 = vld [vmem:[#allocation97_spill] sm:$0xff]  ;;  %v6247_v2 = vld [vmem:[#allocation98_spill] sm:$0xff] }
 0x8b3   :  { %v2494_v54 = vmul.f32 %v3992_v6, %v2493_v21  ;;  %v2507_v9 = vmul.f32 %v2489_v18, %v5193_v8  ;;  %v6235_v8 = vld [vmem:[#allocation86_spill] sm:$0xff]  ;;  %v6248_v37 = vld [vmem:[#allocation99_spill] sm:$0xff]  ;;  %v6250_v18 = vld [vmem:[#allocation101_spill] sm:$0xff] }
 0x8b4   :  { %v6239_v21 = vld [vmem:[#allocation90_spill] sm:$0xff]  ;;  %v6254_v50 = vld [vmem:[#allocation105_spill] sm:$0xff] }
 0x8b5   :  { %v5335_v47 = vadd.f32 %v2508_v20, %v2507_v9  ;;  %v2495_v35 = vadd.f32 %v3992_v6, %v2494_v54  ;;  %v6236_v54 = vld [vmem:[#allocation87_spill] sm:$0xff]  ;;  %v6237_v20 = vld [vmem:[#allocation88_spill] sm:$0xff]  ;;  %v6251_v9 = vld [vmem:[#allocation102_spill] sm:$0xff] }
 0x8b7   :  { %3995 = vtanh.f32 %v5335_v47  ;;  %v2499_v27 = vsel %vm2498_vm14, %v3992_v6, %v2495_v35  ;;  %v6238_v6 = vld [vmem:[#allocation89_spill] sm:$0xff]  ;;  %v6252_v35 = vld [vmem:[#allocation103_spill] sm:$0xff] }
 0x8b8   :  { %v2504_v58 = vsel %vm2501_vm15, %v2503_v4, %v2499_v27  ;;  %v6255_v27 = vld [vmem:[#allocation10_spill] sm:$0xff]  ;;  %v6256_v4 = vld [vmem:[#allocation11_spill] sm:$0xff] }
 0x8bd   :  { %v3996_v17 = vpop.eup %3995 }
 0x8be   :  { %v2511_v59 = vmul.f32 %v3996_v17, %v2504_v58  ;;  %v6257_v17 = vld [vmem:[#allocation12_spill] sm:$0xff] }
 0x8bf   :  { %v6258_v58 = vld [vmem:[#allocation16_spill] sm:$0xff] }
 0x8c0   :  { %v2512_v41 = vpack.c.bf16 %v2511_v59, %v2511_v59  ;;  %v6259_v59 = vld [vmem:[#allocation13_spill] sm:$0xff] }
 0x8c2   :  { %2521 = vmatmul.bf16.vlgmr.msra.gmra.mxu0 %v2512_v41  ;;  %2534 = vmatmul.bf16.vlgmr.msra.gmra.mxu1 %v2512_v41 }
 0x8c3   :  { %2547 = vmatmul.bf16.vlgmr.msra.gmra.mxu2 %v2512_v41  ;;  %2560 = vmatmul.bf16.vlgmr.msra.gmra.mxu3 %v2512_v41  ;;  %v6260_v41 = vld [vmem:[#allocation14_spill] sm:$0xff] }
 0x8c4   :  { %2707 = vmatpush.bf16.msra.mxu0 %v5915_v15  ;;  %2720 = vmatpush.bf16.msra.mxu1 %v5916_v14 }
 0x8c5   :  { %2733 = vmatpush.bf16.msra.mxu2 %v5917_v24  ;;  %2746 = vmatpush.bf16.msra.mxu3 %v5918_v34 }
 0x8c8   :  { %2708 = vmatpush.bf16.msra.mxu0 %v5919_v46  ;;  %2721 = vmatpush.bf16.msra.mxu1 %v5920_v38 }
 0x8c9   :  { %2734 = vmatpush.bf16.msra.mxu2 %v5921_v30  ;;  %2747 = vmatpush.bf16.msra.mxu3 %v5922_v61 }
 0x8cc   :  { %2709 = vmatpush.bf16.msra.mxu0 %v5923_v32  ;;  %2722 = vmatpush.bf16.msra.mxu1 %v5924_v22 }
 0x8cd   :  { %2735 = vmatpush.bf16.msra.mxu2 %v5925_v5  ;;  %2748 = vmatpush.bf16.msra.mxu3 %v5926_v40 }
 0x8d0   :  { %2710 = vmatpush.bf16.msra.mxu0 %v6235_v8  ;;  %2723 = vmatpush.bf16.msra.mxu1 %v6236_v54 }
 0x8d1   :  { %2736 = vmatpush.bf16.msra.mxu2 %v6237_v20  ;;  %2749 = vmatpush.bf16.msra.mxu3 %v6238_v6 }
 0x8d2   :  { %2577 = vmatmul.bf16.vlgmr.msrb.gmra.mxu0 %v5288_v51  ;;  %2590 = vmatmul.bf16.vlgmr.msrb.gmra.mxu1 %v5288_v51 }
 0x8d3   :  { %2603 = vmatmul.bf16.vlgmr.msrb.gmra.mxu2 %v5288_v51  ;;  %2616 = vmatmul.bf16.vlgmr.msrb.gmra.mxu3 %v5288_v51  ;;  %v6249_v51 = vld [vmem:[#allocation100_spill] sm:$0xff] }
 0x8d4   :  { %2711 = vmatpush.bf16.msra.mxu0 %v6239_v21  ;;  %2724 = vmatpush.bf16.msra.mxu1 %v6240_v7 }
 0x8d5   :  { %2737 = vmatpush.bf16.msra.mxu2 %v6241_v48  ;;  %2750 = vmatpush.bf16.msra.mxu3 %v6242_v19 }
 0x8d8   :  { %2712 = vmatpush.bf16.msra.mxu0 %v6243_v3  ;;  %2725 = vmatpush.bf16.msra.mxu1 %v6244_v49 }
 0x8d9   :  { %2738 = vmatpush.bf16.msra.mxu2 %v6245_v11  ;;  %2751 = vmatpush.bf16.msra.mxu3 %v6246_v28 }
 0x8dc   :  { %2713 = vmatpush.bf16.msra.mxu0 %v6247_v2  ;;  %2726 = vmatpush.bf16.msra.mxu1 %v6248_v37 }
 0x8dd   :  { %2739 = vmatpush.bf16.msra.mxu2 %v6249_v51  ;;  %2752 = vmatpush.bf16.msra.mxu3 %v6250_v18  ;;  %v6261_v18 = vld [vmem:[#allocation15_spill] sm:$0xff] }
 0x8e0   :  { %2714 = vmatpush.bf16.msra.mxu0 %v6251_v9  ;;  %2727 = vmatpush.bf16.msra.mxu1 %v6252_v35  ;;  %v6262_v9 = vld [vmem:[#allocation20_spill] sm:$0xff]  ;;  %v6263_v35 = vld [vmem:[#allocation17_spill] sm:$0xff] }
 0x8e1   :  { %2740 = vmatpush.bf16.msra.mxu2 %v6253_v23  ;;  %2753 = vmatpush.bf16.msra.mxu3 %v6254_v50  ;;  %v6264_v23 = vld [vmem:[#allocation18_spill] sm:$0xff]  ;;  %v6265_v50 = vld [vmem:[#allocation19_spill] sm:$0xff] }
 0x8e4   :  { %2827 = vmatpush.bf16.msrb.mxu0 %v6255_v27  ;;  %2840 = vmatpush.bf16.msrb.mxu1 %v6256_v4  ;;  %v6266_v27 = vld [vmem:[#allocation22_spill] sm:$0xff]  ;;  %v6267_v4 = vld [vmem:[#allocation21_spill] sm:$0xff] }
 0x8e5   :  { %2853 = vmatpush.bf16.msrb.mxu2 %v6257_v17  ;;  %2866 = vmatpush.bf16.msrb.mxu3 %v6258_v58  ;;  %v6268_v17 = vld [vmem:[#allocation23_spill] sm:$0xff]  ;;  %v6269_v58 = vld [vmem:[#allocation24_spill] sm:$0xff] }
 0x8e8   :  { %2828 = vmatpush.bf16.msrb.mxu0 %v6259_v59  ;;  %2841 = vmatpush.bf16.msrb.mxu1 %v6260_v41  ;;  %v6270_v59 = vld [vmem:[#allocation26_spill] sm:$0xff]  ;;  %v6271_v41 = vld [vmem:[#allocation25_spill] sm:$0xff] }
 0x8e9   :  { %2854 = vmatpush.bf16.msrb.mxu2 %v6261_v18  ;;  %2867 = vmatpush.bf16.msrb.mxu3 %v6262_v9  ;;  %v6272_v18 = vld [vmem:[#allocation27_spill] sm:$0xff]  ;;  %v6273_v9 = vld [vmem:[#allocation28_spill] sm:$0xff] }
 0x8ec   :  { %2829 = vmatpush.bf16.msrb.mxu0 %v6263_v35  ;;  %2842 = vmatpush.bf16.msrb.mxu1 %v6264_v23  ;;  %v6274_v35 = vld [vmem:[#allocation30_spill] sm:$0xff]  ;;  %v6275_v23 = vld [vmem:[#allocation29_spill] sm:$0xff] }
 0x8ed   :  { %2855 = vmatpush.bf16.msrb.mxu2 %v6265_v50  ;;  %2868 = vmatpush.bf16.msrb.mxu3 %v6266_v27  ;;  %v6276_v50 = vld [vmem:[#allocation31_spill] sm:$0xff]  ;;  %v6277_v27 = vld [vmem:[#allocation32_spill] sm:$0xff] }
 0x8f0   :  { %2830 = vmatpush.bf16.msrb.mxu0 %v6267_v4  ;;  %2843 = vmatpush.bf16.msrb.mxu1 %v6268_v17  ;;  %v6278_v4 = vld [vmem:[#allocation34_spill] sm:$0xff]  ;;  %v6279_v17 = vld [vmem:[#allocation33_spill] sm:$0xff] }
 0x8f1   :  { %2856 = vmatpush.bf16.msrb.mxu2 %v6269_v58  ;;  %2869 = vmatpush.bf16.msrb.mxu3 %v6270_v59  ;;  %v6280_v58 = vld [vmem:[#allocation35_spill] sm:$0xff]  ;;  %v6281_v59 = vld [vmem:[#allocation36_spill] sm:$0xff] }
 0x8f4   :  { %2831 = vmatpush.bf16.msrb.mxu0 %v6271_v41  ;;  %2844 = vmatpush.bf16.msrb.mxu1 %v6272_v18  ;;  %v6282_v41 = vld [vmem:[#allocation38_spill] sm:$0xff]  ;;  %v6283_v18 = vld [vmem:[#allocation37_spill] sm:$0xff] }
 0x8f5   :  { %2857 = vmatpush.bf16.msrb.mxu2 %v6273_v9  ;;  %2870 = vmatpush.bf16.msrb.mxu3 %v6274_v35  ;;  %v6284_v9 = vld [vmem:[#allocation39_spill] sm:$0xff]  ;;  %v6285_v35 = vld [vmem:[#allocation40_spill] sm:$0xff] }
 0x8f8   :  { %2832 = vmatpush.bf16.msrb.mxu0 %v6275_v23  ;;  %2845 = vmatpush.bf16.msrb.mxu1 %v6276_v50  ;;  %v6286_v23 = vld [vmem:[#allocation41_spill] sm:$0xff] }
 0x8f9   :  { %2858 = vmatpush.bf16.msrb.mxu2 %v6277_v27  ;;  %2871 = vmatpush.bf16.msrb.mxu3 %v6278_v4 }
 0x8fc   :  { %2833 = vmatpush.bf16.msrb.mxu0 %v6279_v17  ;;  %2846 = vmatpush.bf16.msrb.mxu1 %v6280_v58 }
 0x8fd   :  { %2859 = vmatpush.bf16.msrb.mxu2 %v6281_v59  ;;  %2872 = vmatpush.bf16.msrb.mxu3 %v6282_v41 }
 0x900   :  { %2834 = vmatpush.bf16.msrb.mxu0 %v6283_v18  ;;  %2847 = vmatpush.bf16.msrb.mxu1 %v6284_v9  ;;  %v2565_v18 = vld [vmem:[%s5573_s0 + $0x20] sm:$0x30] }
 0x901   :  { %2860 = vmatpush.bf16.msrb.mxu2 %v6285_v35  ;;  %2873 = vmatpush.bf16.msrb.mxu3 %v6286_v23  ;;  %v2566_v35 = vld [vmem:[%s5573_s0 + $0x28] sm:$0x30] }
 0x93f   :  { %v5406_v50 = vpop.f32.mrf.mxu0  ;;  %v5408_v27 = vpop.f32.mrf.mxu1 }
 0x946   :  { %v5410_v4 = vpop.f32.mrf.mxu2  ;;  %v5412_v17 = vpop.f32.mrf.mxu3 }
 0x947   :  { %v2524_v58 = vpop.f32.mrf.mxu0  ;;  %v2537_v59 = vpop.f32.mrf.mxu1 }
 0x94e   :  { %v2550_v51 = vpop.f32.mrf.mxu2  ;;  %v2563_v41 = vpop.f32.mrf.mxu3 }
 0x94f   :  { %v2578_v9 = vpop.f32.mrf.mxu0  ;;  %v2591_v23 = vpop.f32.mrf.mxu1  ;;  %v2567_v51 = vld [vmem:[%s5573_s0 + $0x30] sm:$0x30] }
 0x950   :  { %v2625_v37 = vrot.slane %v2578_v9, 4  ;;  %v2626_v2 = vrot.slane %v2591_v23, 4 }
 0x952   :  { %v2633_v28 = vadd.f32 %v2625_v37, %v2565_v18  ;;  %v2634_v11 = vadd.f32 %v2626_v2, %v2566_v35  ;;  %v2568_v37 = vld [vmem:[%s5573_s0 + $0x38] sm:$0x30] }
 0x954   :  { %v3650_v49 = vmul.f32 -1.442695, %v2633_v28  ;;  %v3651_v3 = vmul.f32 -1.442695, %v2634_v11 }
 0x956   :  { %3997 = vpow2.f32 %v3650_v49  ;;  %v2604_v58 = vpop.f32.mrf.mxu2  ;;  %v2617_v59 = vpop.f32.mrf.mxu3 }
 0x957   :  { %3999 = vpow2.f32 %v3651_v3  ;;  %v2627_v41 = vrot.slane %v2604_v58, 4  ;;  %v2580_v19 = vpop.f32.mrf.mxu0  ;;  %v2593_v48 = vpop.f32.mrf.mxu1  ;;  %v2628_v49 = vrot.slane %v2617_v59, 4 }
 0x959   :  { %v2635_v7 = vadd.f32 %v2627_v41, %v2567_v51  ;;  %v2636_v48 = vadd.f32 %v2628_v49, %v2568_v37 }
 0x95b   :  { %v3652_v21 = vmul.f32 -1.442695, %v2635_v7 }
 0x95c   :  { %v3998_v6 = vpop.eup %3997 }
 0x95d   :  { %v4000_v9 = vpop.eup %3999  ;;  %v2646_v23 = vadd.f32 1.0, %v3998_v6  ;;  %4001 = vpow2.f32 %v3652_v21 }
 0x95e   :  { %v2647_v2 = vadd.f32 1.0, %v4000_v9  ;;  %v2606_v28 = vpop.f32.mrf.mxu2  ;;  %v2619_v11 = vpop.f32.mrf.mxu3 }
 0x95f   :  { %4003 = vrcp.f32 %v2646_v23  ;;  %v2660_v58 = vand.u32 2147483648, %v2646_v23  ;;  %v2658_v59 = vand.u32 2147483647, %v2646_v23  ;;  %vm2654_vm2 = vweird.f32 %v2646_v23 }
 0x960   :  { %4005 = vrcp.f32 %v2647_v2  ;;  %v2675_v41 = vand.u32 2147483648, %v2647_v2  ;;  %v2673_v11 = vand.u32 2147483647, %v2647_v2  ;;  %vm2669_vm3 = vweird.f32 %v2647_v2 }
 0x961   :  { %v2661_v37 = vor.u32 1.1754944e-38, %v2660_v58  ;;  %vm2659_vm6 = vcmp.eq.f32.partialorder %v2658_v59, 8.507059e+37 }
 0x962   :  { %vm2674_vm7 = vcmp.eq.f32.partialorder %v2673_v11, 8.507059e+37 }
 0x963   :  { %v4002_v3 = vpop.eup %4001 }
 0x964   :  { %v2648_v18 = vadd.f32 1.0, %v4002_v3 }
 0x965   :  { %v4004_v19 = vpop.eup %4003 }
 0x966   :  { %v4006_v35 = vpop.eup %4005  ;;  %v2650_v7 = vmul.f32 %v4004_v19, %v2646_v23  ;;  %4007 = vrcp.f32 %v2648_v18  ;;  %vm2655_vm0 = vweird.f32 %v4004_v19  ;;  %v2690_v58 = vand.u32 2147483648, %v2648_v18 }
 0x967   :  { %v2665_v51 = vmul.f32 %v4006_v35, %v2647_v2  ;;  %4009 = vtanh.f32 %v2636_v48  ;;  %vm2670_vm1 = vweird.f32 %v4006_v35  ;;  %vm2656_vm4 = vmor %vm2654_vm2, %vm2655_vm0  ;;  %vm2684_vm9 = vweird.f32 %v2648_v18 }
 0x968   :  { %v2651_v6 = vsub.f32 1.0, %v2650_v7  ;;  %v2696_v7 = vrot.slane %v5285_v55, 6  ;;  %vm2671_vm5 = vmor %vm2669_vm3, %vm2670_vm1  ;;  %v2688_v55 = vand.u32 2147483647, %v2648_v18 }
 0x969   :  { %v2666_v21 = vsub.f32 1.0, %v2665_v51  ;;  %v2676_v51 = vor.u32 1.1754944e-38, %v2675_v41 }
 0x96a   :  { %v2652_v9 = vmul.f32 %v4004_v19, %v2651_v6  ;;  %vm2689_vm11 = vcmp.eq.f32.partialorder %v2688_v55, 8.507059e+37 }
 0x96b   :  { %v2667_v28 = vmul.f32 %v4006_v35, %v2666_v21 }
 0x96c   :  { %v4008_v20 = vpop.eup %4007  ;;  %v2653_v54 = vadd.f32 %v4004_v19, %v2652_v9 }
 0x96d   :  { %v2680_v49 = vmul.f32 %v4008_v20, %v2648_v18  ;;  %v2668_v3 = vadd.f32 %v4006_v35, %v2667_v28  ;;  %v4010_v6 = vpop.eup %4009  ;;  %vm2685_vm8 = vweird.f32 %v4008_v20 }
 0x96e   :  { %v2657_v48 = vsel %vm2656_vm4, %v4004_v19, %v2653_v54  ;;  %vm2686_vm10 = vmor %vm2684_vm9, %vm2685_vm8  ;;  %v2691_v19 = vor.u32 1.1754944e-38, %v2690_v58 }
 0x96f   :  { %v2681_v8 = vsub.f32 1.0, %v2680_v49  ;;  %v2662_v40 = vsel %vm2659_vm6, %v2661_v37, %v2657_v48  ;;  %v2672_v21 = vsel %vm2671_vm5, %v4006_v35, %v2668_v3  ;;  %v6298_v49 = vld [vmem:[#allocation71_spill] sm:$0xff] }
 0x970   :  { %v2677_v5 = vsel %vm2674_vm7, %v2676_v51, %v2672_v21  ;;  %v2699_v22 = vmul.f32 %v4010_v6, %v2662_v40 }
 0x971   :  { %v2682_v9 = vmul.f32 %v4008_v20, %v2681_v8  ;;  %v2698_v23 = vmul.f32 %v2696_v7, %v2677_v5  ;;  %v6293_v5 = vld [vmem:[#allocation68_spill] sm:$0xff] }
 0x973   :  { %v5427_v2 = vadd.f32 %v2699_v22, %v2698_v23  ;;  %v2683_v32 = vadd.f32 %v4008_v20, %v2682_v9  ;;  %v6292_v22 = vld [vmem:[#allocation67_spill] sm:$0xff] }
 0x975   :  { %4011 = vtanh.f32 %v5427_v2  ;;  %v2687_v54 = vsel %vm2686_vm10, %v4008_v20, %v2683_v32  ;;  %v6291_v32 = vld [vmem:[#allocation66_spill] sm:$0xff] }
 0x976   :  { %v2692_v35 = vsel %vm2689_vm11, %v2691_v19, %v2687_v54 }
 0x97b   :  { %v4012_v41 = vpop.eup %4011 }
 0x97c   :  { %v2702_v59 = vmul.f32 %v4012_v41, %v2692_v35 }
 0x97e   :  { %v2703_v28 = vpack.c.bf16 %v2702_v59, %v2702_v59 }
 0x980   :  { %v5430_v40 = vrot.slane %v2703_v28, 2 }
 0x982   :  { %2715 = vmatmul.bf16.vlgmr.msra.gmra.mxu0 %v5430_v40  ;;  %2728 = vmatmul.bf16.vlgmr.msra.gmra.mxu1 %v5430_v40 }
 0x983   :  { %2741 = vmatmul.bf16.vlgmr.msra.gmra.mxu2 %v5430_v40  ;;  %2754 = vmatmul.bf16.vlgmr.msra.gmra.mxu3 %v5430_v40 }
 0x984   :  { %2883 = vmatpush.bf16.msra.mxu0 %v4284_v53  ;;  %2896 = vmatpush.bf16.msra.mxu1 %v4286_v56  ;;  %v6287_v53 = vld [vmem:[#allocation62_spill] sm:$0xff]  ;;  %v6288_v56 = vld [vmem:[#allocation63_spill] sm:$0xff] }
 0x985   :  { %2909 = vmatpush.bf16.msra.mxu2 %v4288_v62  ;;  %2922 = vmatpush.bf16.msra.mxu3 %v4296_v12  ;;  %v6289_v62 = vld [vmem:[#allocation64_spill] sm:$0xff]  ;;  %v6290_v12 = vld [vmem:[#allocation65_spill] sm:$0xff] }
 0x988   :  { %2884 = vmatpush.bf16.msra.mxu0 %v5947_v0  ;;  %2897 = vmatpush.bf16.msra.mxu1 %v5948_v60  ;;  %v6294_v0 = vld [vmem:[#allocation69_spill] sm:$0xff]  ;;  %v6295_v60 = vld [vmem:[#allocation106_spill] sm:$0xff] }
 0x989   :  { %2910 = vmatpush.bf16.msra.mxu2 %v5949_v52  ;;  %2923 = vmatpush.bf16.msra.mxu3 %v5950_v13  ;;  %v2523_v52 = vadd.f32 %v5406_v50, %v6295_v60  ;;  %v6296_v13 = vld [vmem:[#allocation107_spill] sm:$0xff] }
 0x98c   :  { %2885 = vmatpush.bf16.msra.mxu0 %v6015_v36  ;;  %2898 = vmatpush.bf16.msra.mxu1 %v6016_v44  ;;  %v2536_v36 = vadd.f32 %v5408_v27, %v6296_v13 }
 0x98d   :  { %2911 = vmatpush.bf16.msra.mxu2 %v6017_v45  ;;  %2924 = vmatpush.bf16.msra.mxu3 %v6018_v43 }
 0x990   :  { %2886 = vmatpush.bf16.msra.mxu0 %v6083_v57  ;;  %2899 = vmatpush.bf16.msra.mxu1 %v6084_v33 }
 0x991   :  { %2912 = vmatpush.bf16.msra.mxu2 %v6085_v29  ;;  %2925 = vmatpush.bf16.msra.mxu3 %v6086_v10  ;;  %v6297_v10 = vld [vmem:[#allocation70_spill] sm:$0xff] }
 0x994   :  { %2887 = vmatpush.bf16.msra.mxu0 %v6151_v25  ;;  %2900 = vmatpush.bf16.msra.mxu1 %v6152_v63  ;;  %v2549_v25 = vadd.f32 %v5410_v4, %v6297_v10  ;;  %v2562_v4 = vadd.f32 %v5412_v17, %v6298_v49 }
 0x995   :  { %2913 = vmatpush.bf16.msra.mxu2 %v6153_v39  ;;  %2926 = vmatpush.bf16.msra.mxu3 %v6154_v16 }
 0x998   :  { %2888 = vmatpush.bf16.msra.mxu0 %v6219_v31  ;;  %2901 = vmatpush.bf16.msra.mxu1 %v6220_v1 }
 0x999   :  { %2914 = vmatpush.bf16.msra.mxu2 %v6221_v42  ;;  %2927 = vmatpush.bf16.msra.mxu3 %v6222_v26 }
 0x99c   :  { %2889 = vmatpush.bf16.msra.mxu0 %v6287_v53  ;;  %2902 = vmatpush.bf16.msra.mxu1 %v6288_v56 }
 0x99d   :  { %2915 = vmatpush.bf16.msra.mxu2 %v6289_v62  ;;  %2928 = vmatpush.bf16.msra.mxu3 %v6290_v12 }
 0x9a0   :  { %2890 = vmatpush.bf16.msra.mxu0 %v6291_v32  ;;  %2903 = vmatpush.bf16.msra.mxu1 %v6292_v22 }
 0x9a1   :  { %2916 = vmatpush.bf16.msra.mxu2 %v6293_v5  ;;  %2929 = vmatpush.bf16.msra.mxu3 %v6294_v0 }
 0x9ff   :  { %v2716_v44 = vpop.f32.mrf.mxu0  ;;  %v2729_v45 = vpop.f32.mrf.mxu1 }
 0xa00   :  { %v2759_v43 = vadd.f32 %v2716_v44, %v2523_v52  ;;  %v2760_v57 = vadd.f32 %v2729_v45, %v2536_v36 }
 0xa02   :  { %v3653_v33 = vmul.f32 -1.442695, %v2759_v43  ;;  %v3654_v29 = vmul.f32 -1.442695, %v2760_v57 }
 0xa04   :  { %4013 = vpow2.f32 %v3653_v33 }
 0xa05   :  { %4015 = vpow2.f32 %v3654_v29 }
 0xa06   :  { %v2742_v63 = vpop.f32.mrf.mxu2  ;;  %v2755_v39 = vpop.f32.mrf.mxu3 }
 0xa07   :  { %v2761_v16 = vadd.f32 %v2742_v63, %v2549_v25  ;;  %v2718_v31 = vpop.f32.mrf.mxu0  ;;  %v2731_v1 = vpop.f32.mrf.mxu1  ;;  %v2762_v7 = vadd.f32 %v2755_v39, %v2562_v4  ;;  %v6318_v4 = vld [vmem:[#allocation101_spill] sm:$0xff] }
 0xa08   :  { %v6300_v1 = vld [vmem:[#allocation83_spill] sm:$0xff] }
 0xa09   :  { %v3655_v42 = vmul.f32 -1.442695, %v2761_v16 }
 0xa0a   :  { %v4014_v26 = vpop.eup %4013 }
 0xa0b   :  { %v4016_v8 = vpop.eup %4015  ;;  %v2772_v20 = vadd.f32 1.0, %v4014_v26  ;;  %4017 = vpow2.f32 %v3655_v42  ;;  %v6301_v42 = vld [vmem:[#allocation84_spill] sm:$0xff]  ;;  %v6310_v26 = vld [vmem:[#allocation93_spill] sm:$0xff] }
 0xa0c   :  { %v2773_v50 = vadd.f32 1.0, %v4016_v8  ;;  %v6311_v8 = vld [vmem:[#allocation94_spill] sm:$0xff] }
 0xa0d   :  { %4019 = vrcp.f32 %v2772_v20  ;;  %v2786_v23 = vand.u32 2147483648, %v2772_v20  ;;  %v2784_v54 = vand.u32 2147483647, %v2772_v20  ;;  %vm2780_vm14 = vweird.f32 %v2772_v20 }
 0xa0e   :  { %4021 = vrcp.f32 %v2773_v50  ;;  %v2744_v27 = vpop.f32.mrf.mxu2  ;;  %v2757_v18 = vpop.f32.mrf.mxu3  ;;  %v2801_v58 = vand.u32 2147483648, %v2773_v50  ;;  %v2799_v41 = vand.u32 2147483647, %v2773_v50  ;;  %vm2795_vm15 = vweird.f32 %v2773_v50 }
 0xa0f   :  { %v2787_v28 = vor.u32 1.1754944e-38, %v2786_v23  ;;  %vm2785_vm2 = vcmp.eq.f32.partialorder %v2784_v54, 8.507059e+37  ;;  %v6314_v27 = vld [vmem:[#allocation97_spill] sm:$0xff]  ;;  %v6315_v18 = vld [vmem:[#allocation98_spill] sm:$0xff] }
 0xa10   :  { %v2802_v56 = vor.u32 1.1754944e-38, %v2801_v58  ;;  %vm2800_vm3 = vcmp.eq.f32.partialorder %v2799_v41, 8.507059e+37 }
 0xa11   :  { %v4018_v11 = vpop.eup %4017 }
 0xa12   :  { %v2774_v37 = vadd.f32 1.0, %v4018_v11  ;;  %v6316_v11 = vld [vmem:[#allocation99_spill] sm:$0xff] }
 0xa13   :  { %v4020_v3 = vpop.eup %4019 }
 0xa14   :  { %v4022_v51 = vpop.eup %4021  ;;  %v2776_v48 = vmul.f32 %v4020_v3, %v2772_v20  ;;  %4023 = vrcp.f32 %v2774_v37  ;;  %vm2781_vm12 = vweird.f32 %v4020_v3  ;;  %v2816_v57 = vand.u32 2147483648, %v2774_v37  ;;  %v6312_v20 = vld [vmem:[#allocation95_spill] sm:$0xff] }
 0xa15   :  { %v2791_v6 = vmul.f32 %v4022_v51, %v2773_v50  ;;  %4025 = vtanh.f32 %v2762_v7  ;;  %vm2796_vm13 = vweird.f32 %v4022_v51  ;;  %vm2782_vm0 = vmor %vm2780_vm14, %vm2781_vm12  ;;  %vm2810_vm5 = vweird.f32 %v2774_v37  ;;  %v6313_v50 = vld [vmem:[#allocation96_spill] sm:$0xff] }
 0xa16   :  { %v2777_v21 = vsub.f32 1.0, %v2776_v48  ;;  %vm2797_vm1 = vmor %vm2795_vm15, %vm2796_vm13  ;;  %v2814_v33 = vand.u32 2147483647, %v2774_v37  ;;  %v2817_v25 = vor.u32 1.1754944e-38, %v2816_v57  ;;  %v6321_v7 = vld [vmem:[#allocation104_spill] sm:$0xff] }
 0xa17   :  { %v2792_v9 = vsub.f32 1.0, %v2791_v6 }
 0xa18   :  { %v2778_v55 = vmul.f32 %v4020_v3, %v2777_v21  ;;  %vm2815_vm7 = vcmp.eq.f32.partialorder %v2814_v33, 8.507059e+37 }
 0xa19   :  { %v2793_v19 = vmul.f32 %v4022_v51, %v2792_v9 }
 0xa1a   :  { %v4024_v35 = vpop.eup %4023  ;;  %v2779_v17 = vadd.f32 %v4020_v3, %v2778_v55 }
 0xa1b   :  { %v2806_v59 = vmul.f32 %v4024_v35, %v2774_v37  ;;  %v2794_v53 = vadd.f32 %v4022_v51, %v2793_v19  ;;  %v4026_v12 = vpop.eup %4025  ;;  %vm2811_vm4 = vweird.f32 %v4024_v35  ;;  %v6319_v37 = vld [vmem:[#allocation102_spill] sm:$0xff] }
 0xa1c   :  { %v2783_v62 = vsel %vm2782_vm0, %v4020_v3, %v2779_v17  ;;  %vm2812_vm6 = vmor %vm2810_vm5, %vm2811_vm4  ;;  %v6320_v3 = vld [vmem:[#allocation103_spill] sm:$0xff]  ;;  %v2879_v19 = vld [vmem:[%s5573_s0 + $0x20] sm:$0xc0] }
 0xa1d   :  { %v2807_v32 = vsub.f32 1.0, %v2806_v59  ;;  %v2788_v22 = vsel %vm2785_vm2, %v2787_v28, %v2783_v62  ;;  %v2798_v5 = vsel %vm2797_vm1, %v4022_v51, %v2794_v53  ;;  %v6322_v51 = vld [vmem:[#allocation105_spill] sm:$0xff] }
 0xa1e   :  { %v2803_v0 = vsel %vm2800_vm3, %v2802_v56, %v2798_v5  ;;  %v2822_v52 = vmul.f32 %v4026_v12, %v2788_v22 }
 0xa1f   :  { %v2808_v36 = vmul.f32 %v4024_v35, %v2807_v32  ;;  %v2821_v44 = vmul.f32 %v2803_v0, %v5335_v47  ;;  %v6299_v47 = vld [vmem:[#allocation82_spill] sm:$0xff]  ;;  %v2881_v32 = vld [vmem:[%s5573_s0 + $0x30] sm:$0xc0] }
 0xa21   :  { %v5477_v45 = vadd.f32 %v2822_v52, %v2821_v44  ;;  %v2809_v43 = vadd.f32 %v4024_v35, %v2808_v36 }
 0xa23   :  { %4027 = vtanh.f32 %v5477_v45  ;;  %v2813_v29 = vsel %vm2812_vm6, %v4024_v35, %v2809_v43  ;;  %v2880_v35 = vld [vmem:[%s5573_s0 + $0x28] sm:$0xc0] }
 0xa24   :  { %v2818_v39 = vsel %vm2815_vm7, %v2817_v25, %v2813_v29 }
 0xa29   :  { %v4028_v63 = vpop.eup %4027 }
 0xa2a   :  { %v2825_v16 = vmul.f32 %v4028_v63, %v2818_v39 }
 0xa2c   :  { %v2826_v31 = vpack.c.bf16 %v2825_v16, %v2825_v16 }
 0xa2e   :  { %2835 = vmatmul.bf16.vlgmr.msrb.gmra.mxu0 %v2826_v31  ;;  %2848 = vmatmul.bf16.vlgmr.msrb.gmra.mxu1 %v2826_v31 }
 0xa2f   :  { %2861 = vmatmul.bf16.vlgmr.msrb.gmra.mxu2 %v2826_v31  ;;  %2874 = vmatmul.bf16.vlgmr.msrb.gmra.mxu3 %v2826_v31  ;;  %v2882_v31 = vld [vmem:[%s5573_s0 + $0x38] sm:$0xc0] }
 0xa30   :  { %3021 = vmatpush.bf16.msrb.mxu0 %v5915_v15  ;;  %3034 = vmatpush.bf16.msrb.mxu1 %v5916_v14  ;;  %v6302_v15 = vld [vmem:[#allocation85_spill] sm:$0xff]  ;;  %v6303_v14 = vld [vmem:[#allocation86_spill] sm:$0xff] }
 0xa31   :  { %3047 = vmatpush.bf16.msrb.mxu2 %v5917_v24  ;;  %3060 = vmatpush.bf16.msrb.mxu3 %v5918_v34  ;;  %v6304_v24 = vld [vmem:[#allocation87_spill] sm:$0xff]  ;;  %v6305_v34 = vld [vmem:[#allocation88_spill] sm:$0xff] }
 0xa34   :  { %3022 = vmatpush.bf16.msrb.mxu0 %v5919_v46  ;;  %3035 = vmatpush.bf16.msrb.mxu1 %v5920_v38  ;;  %v6306_v46 = vld [vmem:[#allocation89_spill] sm:$0xff]  ;;  %v6307_v38 = vld [vmem:[#allocation90_spill] sm:$0xff] }
 0xa35   :  { %3048 = vmatpush.bf16.msrb.mxu2 %v5921_v30  ;;  %3061 = vmatpush.bf16.msrb.mxu3 %v5922_v61  ;;  %v6308_v30 = vld [vmem:[#allocation91_spill] sm:$0xff]  ;;  %v6309_v61 = vld [vmem:[#allocation92_spill] sm:$0xff] }
 0xa38   :  { %3023 = vmatpush.bf16.msrb.mxu0 %v6299_v47  ;;  %3036 = vmatpush.bf16.msrb.mxu1 %v6300_v1 }
 0xa39   :  { %3049 = vmatpush.bf16.msrb.mxu2 %v6301_v42  ;;  %3062 = vmatpush.bf16.msrb.mxu3 %v6302_v15 }
 0xa3c   :  { %3024 = vmatpush.bf16.msrb.mxu0 %v6303_v14  ;;  %3037 = vmatpush.bf16.msrb.mxu1 %v6304_v24 }
 0xa3d   :  { %3050 = vmatpush.bf16.msrb.mxu2 %v6305_v34  ;;  %3063 = vmatpush.bf16.msrb.mxu3 %v6306_v46 }
 0xa3e   :  { %2891 = vmatmul.bf16.vlgmr.msra.gmra.mxu0 %v5430_v40  ;;  %2904 = vmatmul.bf16.vlgmr.msra.gmra.mxu1 %v5430_v40 }
 0xa3f   :  { %2917 = vmatmul.bf16.vlgmr.msra.gmra.mxu2 %v5430_v40  ;;  %2930 = vmatmul.bf16.vlgmr.msra.gmra.mxu3 %v5430_v40  ;;  %v6317_v40 = vld [vmem:[#allocation100_spill] sm:$0xff] }
 0xa40   :  { %3025 = vmatpush.bf16.msrb.mxu0 %v6307_v38  ;;  %3038 = vmatpush.bf16.msrb.mxu1 %v6308_v30 }
 0xa41   :  { %3051 = vmatpush.bf16.msrb.mxu2 %v6309_v61  ;;  %3064 = vmatpush.bf16.msrb.mxu3 %v6310_v26 }
 0xa44   :  { %3026 = vmatpush.bf16.msrb.mxu0 %v6311_v8  ;;  %3039 = vmatpush.bf16.msrb.mxu1 %v6312_v20 }
 0xa45   :  { %3052 = vmatpush.bf16.msrb.mxu2 %v6313_v50  ;;  %3065 = vmatpush.bf16.msrb.mxu3 %v6314_v27 }
 0xa48   :  { %3027 = vmatpush.bf16.msrb.mxu0 %v6315_v18  ;;  %3040 = vmatpush.bf16.msrb.mxu1 %v6316_v11 }
 0xa49   :  { %3053 = vmatpush.bf16.msrb.mxu2 %v6317_v40  ;;  %3066 = vmatpush.bf16.msrb.mxu3 %v6318_v4 }
 0xa4c   :  { %3028 = vmatpush.bf16.msrb.mxu0 %v6319_v37  ;;  %3041 = vmatpush.bf16.msrb.mxu1 %v6320_v3  ;;  %v3010_v37 = vrot.slane %v5427_v2, 6 }
 0xa4d   :  { %3054 = vmatpush.bf16.msrb.mxu2 %v6321_v7  ;;  %3067 = vmatpush.bf16.msrb.mxu3 %v6322_v51 }
 0xaab   :  { %v5516_v48 = vpop.f32.mrf.mxu0  ;;  %v5518_v6 = vpop.f32.mrf.mxu1 }
 0xab2   :  { %v5520_v21 = vpop.f32.mrf.mxu2  ;;  %v5522_v9 = vpop.f32.mrf.mxu3 }
 0xab3   :  { %v2838_v23 = vpop.f32.mrf.mxu0  ;;  %v2851_v58 = vpop.f32.mrf.mxu1 }
 0xaba   :  { %v2864_v55 = vpop.f32.mrf.mxu2  ;;  %v2877_v54 = vpop.f32.mrf.mxu3 }
 0xabb   :  { %v2892_v41 = vpop.f32.mrf.mxu0  ;;  %v2905_v17 = vpop.f32.mrf.mxu1 }
 0xabc   :  { %v2939_v59 = vrot.slane %v2892_v41, 2  ;;  %v2940_v28 = vrot.slane %v2905_v17, 2 }
 0xabe   :  { %v2947_v53 = vadd.f32 %v2939_v59, %v2879_v19  ;;  %v2948_v56 = vadd.f32 %v2940_v28, %v2880_v35 }
 0xac0   :  { %v3656_v62 = vmul.f32 -1.442695, %v2947_v53  ;;  %v3657_v12 = vmul.f32 -1.442695, %v2948_v56 }
 0xac2   :  { %4029 = vpow2.f32 %v3656_v62  ;;  %v2918_v22 = vpop.f32.mrf.mxu2  ;;  %v2931_v5 = vpop.f32.mrf.mxu3 }
 0xac3   :  { %4031 = vpow2.f32 %v3657_v12  ;;  %v2941_v0 = vrot.slane %v2918_v22, 2  ;;  %v2894_v52 = vpop.f32.mrf.mxu0  ;;  %v2907_v36 = vpop.f32.mrf.mxu1  ;;  %v2942_v16 = vrot.slane %v2931_v5, 2 }
 0xac4   :  { %v3796_v52 = vld [vmem:[%s5578_s5 + $0x30] sm:$0xff]  ;;  %v3795_v36 = vld [vmem:[%s5578_s5 + $0x28] sm:$0xff] }
 0xac5   :  { %v2949_v44 = vadd.f32 %v2941_v0, %v2881_v32  ;;  %v2950_v15 = vadd.f32 %v2942_v16, %v2882_v31  ;;  %v3797_v0 = vld [vmem:[%s5578_s5 + $0x38] sm:$0xff] }
 0xac6   :  { %3209 = vmatpush.bf16.msra.mxu0 %v3797_v0 }
 0xac7   :  { %v3658_v43 = vmul.f32 -1.442695, %v2949_v44  ;;  %v3794_v44 = vld [vmem:[%s5578_s5 + $0x20] sm:$0xff] }
 0xac8   :  { %v4030_v57 = vpop.eup %4029 }
 0xac9   :  { %v4032_v33 = vpop.eup %4031  ;;  %v2960_v29 = vadd.f32 1.0, %v4030_v57  ;;  %4033 = vpow2.f32 %v3658_v43  ;;  %v2837_v43 = vadd.f32 %v5516_v48, %v6295_v60  ;;  %v2850_v57 = vadd.f32 %v5518_v6, %v6296_v13  ;;  %v3791_v60 = vld [vmem:[%s5578_s5 + $0x8] sm:$0xff] }
 0xaca   :  { %v2961_v25 = vadd.f32 1.0, %v4032_v33  ;;  %v2920_v63 = vpop.f32.mrf.mxu2  ;;  %v2933_v39 = vpop.f32.mrf.mxu3  ;;  %3210 = vmatpush.bf16.msra.mxu0 %v3796_v52  ;;  %v3793_v33 = vld [vmem:[%s5578_s5 + $0x18] sm:$0xff]  ;;  %v2863_v13 = vadd.f32 %v5520_v21, %v6297_v10 }
 0xacb   :  { %4035 = vrcp.f32 %v2960_v29  ;;  %v2974_v30 = vand.u32 2147483648, %v2960_v29  ;;  %v2972_v8 = vand.u32 2147483647, %v2960_v29  ;;  %vm2968_vm10 = vweird.f32 %v2960_v29 }
 0xacc   :  { %4037 = vrcp.f32 %v2961_v25  ;;  %v2989_v61 = vand.u32 2147483648, %v2961_v25  ;;  %v2987_v50 = vand.u32 2147483647, %v2961_v25  ;;  %vm2983_vm11 = vweird.f32 %v2961_v25 }
 0xacd   :  { %v2975_v40 = vor.u32 1.1754944e-38, %v2974_v30  ;;  %vm2973_vm14 = vcmp.eq.f32.partialorder %v2972_v8, 8.507059e+37 }
 0xace   :  { %v2990_v3 = vor.u32 1.1754944e-38, %v2989_v61  ;;  %vm2988_vm15 = vcmp.eq.f32.partialorder %v2987_v50, 8.507059e+37  ;;  %3211 = vmatpush.bf16.msra.mxu0 %v3795_v36 }
 0xacf   :  { %v4034_v47 = vpop.eup %4033 }
 0xad0   :  { %v2962_v1 = vadd.f32 1.0, %v4034_v47  ;;  %v3792_v47 = vld [vmem:[%s5578_s5 + $0x10] sm:$0xff] }
 0xad1   :  { %v4036_v42 = vpop.eup %4035 }
 0xad2   :  { %v4038_v14 = vpop.eup %4037  ;;  %v2964_v24 = vmul.f32 %v4036_v42, %v2960_v29  ;;  %4039 = vrcp.f32 %v2962_v1  ;;  %vm2969_vm8 = vweird.f32 %v4036_v42  ;;  %v3004_v28 = vand.u32 2147483648, %v2962_v1  ;;  %3212 = vmatpush.bf16.msra.mxu0 %v3794_v44 }
 0xad3   :  { %v2979_v34 = vmul.f32 %v4038_v14, %v2961_v25  ;;  %4041 = vtanh.f32 %v2950_v15  ;;  %vm2984_vm9 = vweird.f32 %v4038_v14  ;;  %vm2970_vm12 = vmor %vm2968_vm10, %vm2969_vm8  ;;  %vm2998_vm1 = vweird.f32 %v2962_v1 }
 0xad4   :  { %v2965_v46 = vsub.f32 1.0, %v2964_v24  ;;  %vm2985_vm13 = vmor %vm2983_vm11, %vm2984_vm9  ;;  %v3002_v2 = vand.u32 2147483647, %v2962_v1  ;;  %v3005_v56 = vor.u32 1.1754944e-38, %v3004_v28 }
 0xad5   :  { %v2980_v38 = vsub.f32 1.0, %v2979_v34 }
 0xad6   :  { %v2966_v26 = vmul.f32 %v4036_v42, %v2965_v46  ;;  %vm3003_vm3 = vcmp.eq.f32.partialorder %v3002_v2, 8.507059e+37  ;;  %3213 = vmatpush.bf16.msra.mxu0 %v3793_v33 }
 0xad7   :  { %v2981_v20 = vmul.f32 %v4038_v14, %v2980_v38 }
 0xad8   :  { %v4040_v27 = vpop.eup %4039  ;;  %v2967_v18 = vadd.f32 %v4036_v42, %v2966_v26  ;;  %v2876_v26 = vadd.f32 %v5522_v9, %v6298_v49 }
 0xad9   :  { %v2994_v11 = vmul.f32 %v4040_v27, %v2962_v1  ;;  %v2982_v4 = vadd.f32 %v4038_v14, %v2981_v20  ;;  %v4042_v51 = vpop.eup %4041  ;;  %vm2999_vm0 = vweird.f32 %v4040_v27 }
 0xada   :  { %v2971_v7 = vsel %vm2970_vm12, %v4036_v42, %v2967_v18  ;;  %vm3000_vm2 = vmor %vm2998_vm1, %vm2999_vm0  ;;  %3214 = vmatpush.bf16.msra.mxu0 %v3792_v47  ;;  %vm3222_vm0 = vcmask 1024  }
 0xadb   :  { %v2995_v23 = vsub.f32 1.0, %v2994_v11  ;;  %v2976_v58 = vsel %vm2973_vm14, %v2975_v40, %v2971_v7  ;;  %v2986_v55 = vsel %vm2985_vm13, %v4038_v14, %v2982_v4  ;;  %v3790_v14 = vld [vmem:[%s5578_s5] sm:$0xff] }
 0xadc   :  { %v2991_v54 = vsel %vm2988_vm15, %v2990_v3, %v2986_v55  ;;  %v3013_v19 = vmul.f32 %v4042_v51, %v2976_v58 }
 0xadd   :  { %v2996_v41 = vmul.f32 %v4040_v27, %v2995_v23  ;;  %v3012_v35 = vmul.f32 %v3010_v37, %v2991_v54 }
 0xade   :  { %3215 = vmatpush.bf16.msra.mxu0 %v3791_v60 }
 0xadf   :  { %v3014_v17 = vadd.f32 %v3013_v19, %v3012_v35  ;;  %v2997_v59 = vadd.f32 %v4040_v27, %v2996_v41 }
 0xae1   :  { %4043 = vtanh.f32 %v3014_v17  ;;  %v3001_v53 = vsel %vm3000_vm2, %v4040_v27, %v2997_v59 }
 0xae2   :  { %v3006_v12 = vsel %vm3003_vm3, %v3005_v56, %v3001_v53  ;;  %3216 = vmatpush.bf16.msra.mxu0 %v3790_v14 }
 0xae7   :  { %v4044_v62 = vpop.eup %4043 }
 0xae8   :  { %v3016_v32 = vmul.f32 %v4044_v62, %v3006_v12 }
 0xaea   :  { %v3017_v22 = vpack.c.bf16 %v3016_v32, %v3016_v32 }
 0xaec   :  { %v3019_v5 = vrot.slane %v3017_v22, 3 }
 0xaee   :  { %3029 = vmatmul.bf16.vlgmr.msrb.gmra.mxu0 %v3019_v5  ;;  %3042 = vmatmul.bf16.vlgmr.msrb.gmra.mxu1 %v3019_v5 }
 0xaef   :  { %3055 = vmatmul.bf16.vlgmr.msrb.gmra.mxu2 %v3019_v5  ;;  %3068 = vmatmul.bf16.vlgmr.msrb.gmra.mxu3 %v3019_v5 }
 0xb6b   :  { %v3030_v29 = vpop.f32.mrf.mxu0  ;;  %v3043_v25 = vpop.f32.mrf.mxu1 }
 0xb6c   :  { %v3073_v63 = vadd.f32 %v3030_v29, %v2837_v43  ;;  %v3074_v39 = vadd.f32 %v3043_v25, %v2850_v57  ;;  %v3804_v29 = vld [vmem:[#allocation2] ss:$0 sm:$0xff] }
 0xb6e   :  { %v3659_v16 = vmul.f32 -1.442695, %v3073_v63  ;;  %v3660_v31 = vmul.f32 -1.442695, %v3074_v39 }
 0xb70   :  { %4045 = vpow2.f32 %v3659_v16 }
 0xb71   :  { %4047 = vpow2.f32 %v3660_v31 }
 0xb72   :  { %v3056_v48 = vpop.f32.mrf.mxu2  ;;  %v3069_v6 = vpop.f32.mrf.mxu3 }
 0xb73   :  { %v3075_v1 = vadd.f32 %v3056_v48, %v2863_v13  ;;  %v3032_v42 = vpop.f32.mrf.mxu0  ;;  %v3045_v15 = vpop.f32.mrf.mxu1  ;;  %v3076_v50 = vadd.f32 %v3069_v6, %v2876_v26 }
 0xb75   :  { %v3661_v24 = vmul.f32 -1.442695, %v3075_v1 }
 0xb76   :  { %v4046_v34 = vpop.eup %4045 }
 0xb77   :  { %v4048_v46 = vpop.eup %4047  ;;  %v3086_v38 = vadd.f32 1.0, %v4046_v34  ;;  %4049 = vpow2.f32 %v3661_v24 }
 0xb78   :  { %v3087_v30 = vadd.f32 1.0, %v4048_v46 }
 0xb79   :  { %4051 = vrcp.f32 %v3086_v38  ;;  %v3100_v37 = vand.u32 2147483648, %v3086_v38  ;;  %v3098_v51 = vand.u32 2147483647, %v3086_v38  ;;  %vm3094_vm6 = vweird.f32 %v3086_v38 }
 0xb7a   :  { %4053 = vrcp.f32 %v3087_v30  ;;  %v3058_v10 = vpop.f32.mrf.mxu2  ;;  %v3071_v21 = vpop.f32.mrf.mxu3  ;;  %v3115_v3 = vand.u32 2147483648, %v3087_v30  ;;  %v3113_v58 = vand.u32 2147483647, %v3087_v30  ;;  %vm3109_vm7 = vweird.f32 %v3087_v30 }
 0xb7b   :  { %v3101_v54 = vor.u32 1.1754944e-38, %v3100_v37  ;;  %vm3099_vm10 = vcmp.eq.f32.partialorder %v3098_v51, 8.507059e+37 }
 0xb7c   :  { %v3116_v41 = vor.u32 1.1754944e-38, %v3115_v3  ;;  %vm3114_vm11 = vcmp.eq.f32.partialorder %v3113_v58, 8.507059e+37 }
 0xb7d   :  { %v4050_v61 = vpop.eup %4049 }
 0xb7e   :  { %v3088_v8 = vadd.f32 1.0, %v4050_v61 }
 0xb7f   :  { %v4052_v20 = vpop.eup %4051 }
 0xb80   :  { %v4054_v27 = vpop.eup %4053  ;;  %v3090_v18 = vmul.f32 %v4052_v20, %v3086_v38  ;;  %4055 = vrcp.f32 %v3088_v8  ;;  %vm3095_vm4 = vweird.f32 %v4052_v20  ;;  %v3130_v5 = vand.u32 2147483648, %v3088_v8 }
 0xb81   :  { %v3105_v11 = vmul.f32 %v4054_v27, %v3087_v30  ;;  %4057 = vtanh.f32 %v3076_v50  ;;  %vm3110_vm5 = vweird.f32 %v4054_v27  ;;  %vm3096_vm8 = vmor %vm3094_vm6, %vm3095_vm4  ;;  %vm3124_vm13 = vweird.f32 %v3088_v8 }
 0xb82   :  { %v3091_v40 = vsub.f32 1.0, %v3090_v18  ;;  %vm3111_vm9 = vmor %vm3109_vm7, %vm3110_vm5  ;;  %v3128_v0 = vand.u32 2147483647, %v3088_v8  ;;  %v3131_v36 = vor.u32 1.1754944e-38, %v3130_v5 }
 0xb83   :  { %v3106_v4 = vsub.f32 1.0, %v3105_v11 }
 0xb84   :  { %v3092_v7 = vmul.f32 %v4052_v20, %v3091_v40  ;;  %vm3129_vm15 = vcmp.eq.f32.partialorder %v3128_v0, 8.507059e+37 }
 0xb85   :  { %v3107_v23 = vmul.f32 %v4054_v27, %v3106_v4 }
 0xb86   :  { %v4056_v55 = vpop.eup %4055  ;;  %v3093_v49 = vadd.f32 %v4052_v20, %v3092_v7 }
 0xb87   :  { %v3120_v9 = vmul.f32 %v4056_v55, %v3088_v8  ;;  %v3108_v19 = vadd.f32 %v4054_v27, %v3107_v23  ;;  %v4058_v17 = vpop.eup %4057  ;;  %vm3125_vm12 = vweird.f32 %v4056_v55 }
 0xb88   :  { %v3097_v35 = vsel %vm3096_vm8, %v4052_v20, %v3093_v49  ;;  %vm3126_vm14 = vmor %vm3124_vm13, %vm3125_vm12 }
 0xb89   :  { %v3121_v59 = vsub.f32 1.0, %v3120_v9  ;;  %v3102_v28 = vsel %vm3099_vm10, %v3101_v54, %v3097_v35  ;;  %v3112_v2 = vsel %vm3111_vm9, %v4054_v27, %v3108_v19 }
 0xb8a   :  { %v3117_v53 = vsel %vm3114_vm11, %v3116_v41, %v3112_v2  ;;  %v3136_v56 = vmul.f32 %v4058_v17, %v3102_v28 }
 0xb8b   :  { %v3122_v62 = vmul.f32 %v4056_v55, %v3121_v59  ;;  %v3135_v12 = vmul.f32 %v3117_v53, %v5477_v45 }
 0xb8d   :  { %v3137_v32 = vadd.f32 %v3136_v56, %v3135_v12  ;;  %v3123_v22 = vadd.f32 %v4056_v55, %v3122_v62 }
 0xb8f   :  { %4059 = vtanh.f32 %v3137_v32  ;;  %v3127_v52 = vsel %vm3126_vm14, %v4056_v55, %v3123_v22 }
 0xb90   :  { %v3132_v43 = vsel %vm3129_vm15, %v3131_v36, %v3127_v52 }
 0xb95   :  { %v4060_v44 = vpop.eup %4059 }
 0xb96   :  { %v3139_v57 = vmul.f32 %v4060_v44, %v3132_v43 }
 0xb98   :  { %v3140_v33 = vpack.c.bf16 %v3139_v57, %v3139_v57 }
 0xb9a   :  { %3217 = vmatmul.bf16.vlgmr.msra.gmra.mxu0 %v3140_v33 }
 0xc17   :  { %v3218_v25 = vpop.f32.mrf.mxu0 }
 0xc18   :  { %v3219_v45 = vadd.f32 %v3804_v29, %v3218_v25 }
 0xc1a   :  { %3223 = vst.msk [vmem:[%s5580_s7] sm:$0x3] %vm3222_vm0, %v3219_v45 }
 0xc1f   :  { %v3220_v63 = vpop.f32.mrf.mxu0 }
 0xc20   :  { %3228 = vsyncpa [#allocation4], 1 }
 0xc21   :  { %3229 = vsyncpa [#allocation6], 1 }

</bundles_post_ra>
